<compile_context>
chip_gen: v6e
topology: v6e:2x2x1
jax: 0.10.0
libtpu: 0.0.40
codegen_flags: <defaults>
</compile_context>

<pallas_src>
import functools
import math

import jax
import jax.numpy as jnp
from jax import lax
from jax.experimental import pallas as pl
from jax.experimental.pallas import tpu as pltpu


def _is_legacy_chip():
    """True on chips without bf16 VPU/EUP (<= v5): keep elementwise math f32,
    use 128-wide hidden tiles (matched to the 128x128 MXU)."""
    try:
        kind = jax.devices()[0].device_kind.lower()
    except Exception:
        return False
    return any(v in kind for v in ("v2", "v3", "v4", "v5"))


def _gelu(x, approx=False):
    """GELU: exact erf (PyTorch nn.GELU default, computed in f32) or optional
    tanh approximation (EUP tanh -> near-free slot, slightly different numerics)."""
    if approx:
        c = math.sqrt(2.0 / math.pi)
        return 0.5 * x * (1.0 + jnp.tanh(c * (x + 0.044715 * (x * x * x))))
    xf = x.astype(jnp.float32)
    return (0.5 * xf * (1.0 + lax.erf(xf * (1.0 / math.sqrt(2.0))))).astype(x.dtype)


def _mlp_kernel(x_ref, w1_ref, b1_ref, dww_ref, dwb_ref, w2_ref, b2_ref,
                o_ref, dws_ref, *, H, W, ew_dtype, approx_gelu):
    # Per grid step (b, ct):
    #   x_ref   (1, H, W, Cin)   bf16
    #   w1_ref  (n_ct, Cin, tC)  bf16      b1_ref  (n_ct, 1, tC)  f32
    #   dww_ref (n_ct, 9, tC)    ew        dwb_ref (n_ct, 1, tC)  ew
    #   w2_ref  (n_ct, tC, Cout) bf16      b2_ref  (1, Cout)      f32
    #   o_ref   (1, H, W, Cout)  f32  (resident across ct -> fc2 accumulator)
    #   dws_ref (H, W, tC)       ew   (depthwise-conv accumulator scratch)
    ct = pl.program_id(1)
    n_ct = pl.num_programs(1)
    Cin = x_ref.shape[3]
    tC = w1_ref.shape[2]
    Cout = w2_ref.shape[2]

    # --- fc1: 1x1 conv == channel matmul (bf16 MXU, f32 accumulate) + GELU ---
    x = x_ref[0].reshape(H * W, Cin)
    h32 = jnp.dot(x, w1_ref[ct], preferred_element_type=jnp.float32) + b1_ref[ct]
    h32 = _gelu(h32, approx_gelu).reshape(H, W, tC)

    # --- depthwise 3x3 conv, stride 1, padding 1 ---
    # W-shifted copies: sublane roll (XLU) in f32 with boundary masks from an
    # iota column index, then cast to the elementwise dtype (bf16 on v6e/v7x).
    col = lax.broadcasted_iota(jnp.int32, (1, W, 1), 1)
    h_l = jnp.where(col > 0, pltpu.roll(h32, 1, axis=1), 0.0).astype(ew_dtype)      # h[:, x-1, :]
    h_r = jnp.where(col < W - 1, pltpu.roll(h32, W - 1, axis=1), 0.0).astype(ew_dtype)  # h[:, x+1, :]
    h = h32.astype(ew_dtype)

    k = dww_ref[ct]  # (9, tC), row-major (ky, kx) taps
    # Running accumulation in the scratch: center row taps + bias first, then
    # top / bottom row contributions added to leading-axis (plane) row slices.
    dws_ref[...] = h * k[4] + h_l * k[3] + h_r * k[5] + dwb_ref[ct]
    top = h[:H - 1] * k[1] + h_l[:H - 1] * k[0] + h_r[:H - 1] * k[2]   # row y-1 -> y
    dws_ref[pl.ds(1, H - 1)] = dws_ref[pl.ds(1, H - 1)] + top
    bot = h[1:] * k[7] + h_l[1:] * k[6] + h_r[1:] * k[8]               # row y+1 -> y
    dws_ref[pl.ds(0, H - 1)] = dws_ref[pl.ds(0, H - 1)] + bot

    d = _gelu(dws_ref[...], approx_gelu).reshape(H * W, tC)

    # --- fc2 partial product for this hidden tile (bf16 MXU, f32 accumulate) ---
    partial = jnp.dot(d.astype(jnp.bfloat16), w2_ref[ct],
                      preferred_element_type=jnp.float32)

    # Accumulate into the resident output block (out index map ignores ct).
    @pl.when(ct == 0)
    def _():
        o_ref[0] = partial.reshape(H, W, Cout)

    @pl.when(ct != 0)
    def _():
        o_ref[0] = o_ref[0] + partial.reshape(H, W, Cout)

    # Finalize: bias + GELU in place.  Dropout(p=0.0) is the identity.
    @pl.when(ct == n_ct - 1)
    def _():
        acc = o_ref[0].reshape(H * W, Cout)
        o_ref[0] = _gelu(acc + b2_ref[...], approx_gelu
                         ).reshape(H, W, Cout).astype(o_ref.dtype)


def mlp_pallas(x_nchw, w1, b1, dww, dwb, w2, b2, *, block_c=None,
               ew_dtype=None, approx_gelu=False):
    """Forward pass of Mlp.  x_nchw: (B, Cin, H, W).
    w1: (Cin, Chid), b1: (Chid,), dww: (3,3,Chid), dwb: (Chid,),
    w2: (Chid, Cout), b2: (Cout,).  Returns (B, Cout, H, W) float32."""
    B, Cin, H, W = x_nchw.shape
    Chid = w1.shape[1]
    Cout = w2.shape[1]

    legacy = _is_legacy_chip()
    if block_c is None:
        block_c = 128 if legacy else 256            # match MXU width per generation
    if ew_dtype is None:
        ew_dtype = jnp.float32 if legacy else jnp.bfloat16
    if Chid % block_c != 0:
        block_c = 128 if Chid % 128 == 0 else Chid  # fall back gracefully
    n_ct = Chid // block_c
    # Note: W should be a multiple of 8 (16 for bf16) for relayout-free reshapes.

    # Layout plumbing only (see TODO at top of file).  Input cast to bf16 here
    # so the NHWC HBM intermediate is half-width.
    x_nhwc = jnp.transpose(x_nchw, (0, 2, 3, 1)).astype(jnp.bfloat16)

    # Pre-reshape weights so each hidden tile is a leading-axis index in-kernel.
    w1_t = w1.reshape(Cin, n_ct, block_c).transpose(1, 0, 2).astype(jnp.bfloat16)
    b1_t = b1.reshape(n_ct, 1, block_c).astype(jnp.float32)
    dww_t = dww.reshape(9, n_ct, block_c).transpose(1, 0, 2).astype(ew_dtype)
    dwb_t = dwb.reshape(n_ct, 1, block_c).astype(ew_dtype)
    w2_t = w2.reshape(n_ct, block_c, Cout).astype(jnp.bfloat16)
    b2_t = b2.reshape(1, Cout).astype(jnp.float32)

    kernel = functools.partial(_mlp_kernel, H=H, W=W, ew_dtype=ew_dtype,
                               approx_gelu=approx_gelu)

    # VMEM budget: blocks (double-buffered), resident weights, dwconv scratch,
    # elementwise temporaries, clamped to 3/4 of the chip's physical VMEM.
    ew_b = jnp.dtype(ew_dtype).itemsize
    est = (2 * H * W * Cin * 2                      # x block (bf16) x 2 buffers
           + 2 * H * W * Cout * 4                   # out block (f32) x 2 buffers
           + 2 * (Cin * Chid * 2 + Chid * Cout * 2) # resident fc1/fc2 weights
           + 2 * (Chid * 4 + 10 * Chid * ew_b + Cout * 4)  # biases + dw weights
           + H * W * block_c * ew_b                 # dwconv scratch
           + 8 * H * W * block_c * max(ew_b, 2)     # live elementwise temps / spill
           + 2 * H * W * max(block_c, Cout) * 4)    # f32 fc1/fc2 intermediates
    try:
        vmem_cap = int(pltpu.get_tpu_info().vmem_capacity_bytes)
    except Exception:
        vmem_cap = 64 << 20                         # conservative: v7x per-core size
    vmem_limit = int(min(max(est + (4 << 20), 32 << 20), (vmem_cap * 3) // 4))

    out_nhwc = pl.pallas_call(
        kernel,
        out_shape=jax.ShapeDtypeStruct((B, H, W, Cout), jnp.float32),
        grid_spec=pltpu.PrefetchScalarGridSpec(
            num_scalar_prefetch=0,
            grid=(B, n_ct),
            in_specs=[
                pl.BlockSpec((1, H, W, Cin), lambda b, c: (b, 0, 0, 0)),
                pl.BlockSpec((n_ct, Cin, block_c), lambda b, c: (0, 0, 0)),
                pl.BlockSpec((n_ct, 1, block_c), lambda b, c: (0, 0, 0)),
                pl.BlockSpec((n_ct, 9, block_c), lambda b, c: (0, 0, 0)),
                pl.BlockSpec((n_ct, 1, block_c), lambda b, c: (0, 0, 0)),
                pl.BlockSpec((n_ct, block_c, Cout), lambda b, c: (0, 0, 0)),
                pl.BlockSpec((1, Cout), lambda b, c: (0, 0)),
            ],
            out_specs=pl.BlockSpec((1, H, W, Cout), lambda b, c: (b, 0, 0, 0)),
            scratch_shapes=[pltpu.VMEM((H, W, block_c), ew_dtype)],
        ),
        compiler_params=pltpu.CompilerParams(
            dimension_semantics=("parallel", "arbitrary"),
            vmem_limit_bytes=vmem_limit),
    )(x_nhwc, w1_t, b1_t, dww_t, dwb_t, w2_t, b2_t)

    return jnp.transpose(out_nhwc, (0, 3, 1, 2))


def mlp_reference_f32(x_nchw, w1, b1, dww, dwb, w2, b2):
    """Plain-JAX f32 reference mirroring the exact PyTorch forward (NCHW convs)."""
    Chid = w1.shape[1]
    w1_oihw = jnp.transpose(w1, (1, 0))[:, :, None, None]
    h = lax.conv_general_dilated(x_nchw, w1_oihw, (1, 1), "VALID",
                                 dimension_numbers=("NCHW", "OIHW", "NCHW"))
    h = _gelu(h + b1[None, :, None, None])
    dw_oihw = jnp.transpose(dww, (2, 0, 1))[:, None, :, :]
    d = lax.conv_general_dilated(h, dw_oihw, (1, 1), ((1, 1), (1, 1)),
                                 dimension_numbers=("NCHW", "OIHW", "NCHW"),
                                 feature_group_count=Chid)
    d = _gelu(d + dwb[None, :, None, None])
    w2_oihw = jnp.transpose(w2, (1, 0))[:, :, None, None]
    o = lax.conv_general_dilated(d, w2_oihw, (1, 1), "VALID",
                                 dimension_numbers=("NCHW", "OIHW", "NCHW"))
    return _gelu(o + b2[None, :, None, None])   # dropout p=0.0 is identity


def mlp_reference_precise(x_nchw, w1, b1, dww, dwb, w2, b2, ew_dtype):
    """Plain-JAX mirror of the kernel's numerics (bf16 matmuls, f32 accumulate,
    ew_dtype depthwise conv, f32 exact GELU) for the correctness check."""
    B, Cin, H, W = x_nchw.shape
    x = jnp.transpose(x_nchw, (0, 2, 3, 1)).astype(jnp.bfloat16)
    h = jnp.einsum("bhwc,cd->bhwd", x, w1.astype(jnp.bfloat16),
                   preferred_element_type=jnp.float32) + b1
    h = _gelu(h).astype(ew_dtype)
    hp = jnp.pad(h, ((0, 0), (1, 1), (1, 1), (0, 0)))
    d = jnp.zeros_like(h)
    for ky in range(3):
        for kx in range(3):
            d = d + hp[:, ky:ky + H, kx:kx + W, :] * dww[ky, kx].astype(ew_dtype)
    d = _gelu(d + dwb.astype(ew_dtype))
    o = jnp.einsum("bhwc,cd->bhwd", d.astype(jnp.bfloat16), w2.astype(jnp.bfloat16),
                   preferred_element_type=jnp.float32) + b2
    return jnp.transpose(_gelu(o), (0, 3, 1, 2))


if __name__ == "__main__":
    # Channel counts are multiples of 128 so channels fill the 128-lane axis
    # (lane-dense loads/stores), matching realistic Mix-FFN deployments.
    B, Cin, H, W = 2, 128, 16, 16
    Chid, Cout = 256, Cin  # out_features defaults to in_features

    key = jax.random.PRNGKey(0)
    ks = jax.random.split(key, 7)

    x = jax.random.normal(ks[0], (B, Cin, H, W), dtype=jnp.float32)

    # Conv2d init scales from the PyTorch module: normal(0, sqrt(2 / fan_out)).
    std_fc1 = math.sqrt(2.0 / (1 * 1 * Chid))
    std_dw = math.sqrt(2.0 / (3 * 3 * Chid // Chid))
    std_fc2 = math.sqrt(2.0 / (1 * 1 * Cout))

    w1 = jax.random.normal(ks[1], (Cin, Chid), jnp.float32) * std_fc1
    b1 = jax.random.normal(ks[2], (Chid,), jnp.float32) * 0.1
    dww = jax.random.normal(ks[3], (3, 3, Chid), jnp.float32) * std_dw
    dwb = jax.random.normal(ks[4], (Chid,), jnp.float32) * 0.1
    w2 = jax.random.normal(ks[5], (Chid, Cout), jnp.float32) * std_fc2
    b2 = jax.random.normal(ks[6], (Cout,), jnp.float32) * 0.1

    out = jax.block_until_ready(mlp_pallas(x, w1, b1, dww, dwb, w2, b2))
    assert out.shape == (B, Cout, H, W)

    # Check vs. a plain-JAX mirror of the kernel's numerics (tight on <=v5
    # where elementwise math is f32; relaxed for the bf16 elementwise chain).
    legacy = _is_legacy_chip()
    ew = jnp.float32 if legacy else jnp.bfloat16
    ref_p = jax.block_until_ready(
        mlp_reference_precise(x, w1, b1, dww, dwb, w2, b2, ew))
    tol = 5e-3 if legacy else 1e-1
    err_p = float(jnp.max(jnp.abs(out - ref_p)))
    assert jnp.allclose(out, ref_p, atol=tol, rtol=tol), err_p

    # Loose sanity check vs. the exact f32 conv reference (bf16 matmul inputs
    # and bf16 elementwise on newer chips => relaxed tolerance is expected).
    ref_f = jax.block_until_ready(mlp_reference_f32(x, w1, b1, dww, dwb, w2, b2))
    err_f = float(jnp.max(jnp.abs(out - ref_f)))
    assert jnp.allclose(out, ref_f, atol=2e-1, rtol=2e-1), err_f

    print("KERNEL_OK")
</pallas_src>

<mosaic_0001>
module attributes {stable_mosaic.version = 11 : i64} {
  func.func @_mlp_kernel(%arg0: i32, %arg1: i32, %arg2: memref<1x16x16x128xbf16, #tpu.memory_space<vmem>>, %arg3: memref<1x128x256xbf16, #tpu.memory_space<vmem>>, %arg4: memref<1x1x256xf32, #tpu.memory_space<vmem>>, %arg5: memref<1x9x256xbf16, #tpu.memory_space<vmem>>, %arg6: memref<1x1x256xbf16, #tpu.memory_space<vmem>>, %arg7: memref<1x256x128xbf16, #tpu.memory_space<vmem>>, %arg8: memref<1x128xf32, #tpu.memory_space<vmem>>, %arg9: memref<1x16x16x128xf32, #tpu.memory_space<vmem>>, %arg10: memref<16x16x256xbf16, #tpu.memory_space<vmem>>) attributes {dimension_semantics = [#tpu.dimension_semantics<parallel>, #tpu.dimension_semantics<arbitrary>], iteration_bounds = array<i64: 2, 1>, scalar_prefetch = 0 : i64, scratch_operands = 1 : i64, tpu.core_type = #tpu.core_type<tc>, window_params = [{transform_indices = @transform_0, window_bounds = array<i64: 1, 16, 16, 128>}, {pipeline_mode = #tpu.pipeline_mode<synchronous>, transform_indices = @transform_1, window_bounds = array<i64: 1, 128, 256>}, {pipeline_mode = #tpu.pipeline_mode<synchronous>, transform_indices = @transform_2, window_bounds = array<i64: 1, 1, 256>}, {pipeline_mode = #tpu.pipeline_mode<synchronous>, transform_indices = @transform_3, window_bounds = array<i64: 1, 9, 256>}, {pipeline_mode = #tpu.pipeline_mode<synchronous>, transform_indices = @transform_4, window_bounds = array<i64: 1, 1, 256>}, {pipeline_mode = #tpu.pipeline_mode<synchronous>, transform_indices = @transform_5, window_bounds = array<i64: 1, 256, 128>}, {pipeline_mode = #tpu.pipeline_mode<synchronous>, transform_indices = @transform_6, window_bounds = array<i64: 1, 128>}, {transform_indices = @transform_7, window_bounds = array<i64: 1, 16, 16, 128>}]} {
    %c0 = arith.constant 0 : index
    %c0_0 = arith.constant 0 : index
    %c0_1 = arith.constant 0 : index
    %c0_2 = arith.constant 0 : index
    %0 = vector.load %arg2[%c0, %c0_0, %c0_1, %c0_2] : memref<1x16x16x128xbf16, #tpu.memory_space<vmem>>, vector<1x16x16x128xbf16>
    %1 = vector.shape_cast %0 : vector<1x16x16x128xbf16> to vector<16x16x128xbf16>
    %2 = vector.shape_cast %1 : vector<16x16x128xbf16> to vector<256x128xbf16>
    %3 = arith.index_cast %arg1 : i32 to index
    %c0_3 = arith.constant 0 : index
    %c0_4 = arith.constant 0 : index
    %4 = vector.load %arg3[%3, %c0_3, %c0_4] : memref<1x128x256xbf16, #tpu.memory_space<vmem>>, vector<1x128x256xbf16>
    %5 = vector.shape_cast %4 : vector<1x128x256xbf16> to vector<128x256xbf16>
    %cst = arith.constant dense<0.000000e+00> : vector<256x256xf32>
    %6 = tpu.matmul %2, %5, %cst {dimension_numbers = #tpu.dot_dimension_numbers<[1], [0], [0], [1], [0, 0, 1, 1], [], []>} : vector<256x128xbf16>, vector<128x256xbf16>, vector<256x256xf32> -> vector<256x256xf32>
    %7 = arith.index_cast %arg1 : i32 to index
    %c0_5 = arith.constant 0 : index
    %c0_6 = arith.constant 0 : index
    %8 = vector.load %arg4[%7, %c0_5, %c0_6] : memref<1x1x256xf32, #tpu.memory_space<vmem>>, vector<1x1x256xf32>
    %9 = vector.shape_cast %8 : vector<1x1x256xf32> to vector<1x256xf32>
    %10 = vector.broadcast %9 : vector<1x256xf32> to vector<256x256xf32>
    %11 = arith.addf %6, %10 : vector<256x256xf32>
    %cst_7 = arith.constant 5.000000e-01 : f32
    %12 = vector.broadcast %cst_7 : f32 to vector<256x256xf32>
    %13 = arith.mulf %12, %11 : vector<256x256xf32>
    %cst_8 = arith.constant 0.707106769 : f32
    %14 = vector.broadcast %cst_8 : f32 to vector<256x256xf32>
    %15 = arith.mulf %11, %14 : vector<256x256xf32>
    %16 = math.erf %15 : vector<256x256xf32>
    %cst_9 = arith.constant 1.000000e+00 : f32
    %17 = vector.broadcast %cst_9 : f32 to vector<256x256xf32>
    %18 = arith.addf %17, %16 : vector<256x256xf32>
    %19 = arith.mulf %13, %18 : vector<256x256xf32>
    %20 = vector.shape_cast %19 : vector<256x256xf32> to vector<16x16x256xf32>
    %21 = tpu.iota {dimensions = array<i32: 1>} : vector<1x16x1xi32>
    %c0_i32 = arith.constant 0 : i32
    %22 = vector.broadcast %c0_i32 : i32 to vector<1x16x1xi32>
    %23 = arith.cmpi sgt, %21, %22 : vector<1x16x1xi32>
    %c1_i32 = arith.constant 1 : i32
    %24 = tpu.dynamic_rotate %20 by %c1_i32 dim 1 : vector<16x16x256xf32>, i32 -> vector<16x16x256xf32>
    %cst_10 = arith.constant 0.000000e+00 : f32
    %25 = vector.shape_cast %23 : vector<1x16x1xi1> to vector<1x16x1xi1>
    %26 = vector.broadcast %25 : vector<1x16x1xi1> to vector<16x16x256xi1>
    %27 = vector.broadcast %cst_10 : f32 to vector<16x16x256xf32>
    %28 = arith.select %26, %24, %27 : vector<16x16x256xi1>, vector<16x16x256xf32>
    %29 = arith.truncf %28 : vector<16x16x256xf32> to vector<16x16x256xbf16>
    %c15_i32 = arith.constant 15 : i32
    %30 = vector.broadcast %c15_i32 : i32 to vector<1x16x1xi32>
    %31 = arith.cmpi slt, %21, %30 : vector<1x16x1xi32>
    %c15_i32_11 = arith.constant 15 : i32
    %32 = tpu.dynamic_rotate %20 by %c15_i32_11 dim 1 : vector<16x16x256xf32>, i32 -> vector<16x16x256xf32>
    %cst_12 = arith.constant 0.000000e+00 : f32
    %33 = vector.shape_cast %31 : vector<1x16x1xi1> to vector<1x16x1xi1>
    %34 = vector.broadcast %33 : vector<1x16x1xi1> to vector<16x16x256xi1>
    %35 = vector.broadcast %cst_12 : f32 to vector<16x16x256xf32>
    %36 = arith.select %34, %32, %35 : vector<16x16x256xi1>, vector<16x16x256xf32>
    %37 = arith.truncf %36 : vector<16x16x256xf32> to vector<16x16x256xbf16>
    %38 = arith.truncf %20 : vector<16x16x256xf32> to vector<16x16x256xbf16>
    %39 = arith.index_cast %arg1 : i32 to index
    %c0_13 = arith.constant 0 : index
    %c0_14 = arith.constant 0 : index
    %40 = vector.load %arg5[%39, %c0_13, %c0_14] : memref<1x9x256xbf16, #tpu.memory_space<vmem>>, vector<1x9x256xbf16>
    %41 = vector.shape_cast %40 : vector<1x9x256xbf16> to vector<9x256xbf16>
    %42 = vector.extract_strided_slice %41 {offsets = [4, 0], sizes = [1, 256], strides = [1, 1]} : vector<9x256xbf16> to vector<1x256xbf16>
    %43 = vector.shape_cast %42 : vector<1x256xbf16> to vector<256xbf16>
    %44 = vector.shape_cast %43 : vector<256xbf16> to vector<1x1x256xbf16>
    %45 = vector.broadcast %44 : vector<1x1x256xbf16> to vector<16x16x256xbf16>
    %46 = arith.mulf %38, %45 : vector<16x16x256xbf16>
    %47 = vector.extract_strided_slice %41 {offsets = [3, 0], sizes = [1, 256], strides = [1, 1]} : vector<9x256xbf16> to vector<1x256xbf16>
    %48 = vector.shape_cast %47 : vector<1x256xbf16> to vector<256xbf16>
    %49 = vector.shape_cast %48 : vector<256xbf16> to vector<1x1x256xbf16>
    %50 = vector.broadcast %49 : vector<1x1x256xbf16> to vector<16x16x256xbf16>
    %51 = arith.mulf %29, %50 : vector<16x16x256xbf16>
    %52 = arith.addf %46, %51 : vector<16x16x256xbf16>
    %53 = vector.extract_strided_slice %41 {offsets = [5, 0], sizes = [1, 256], strides = [1, 1]} : vector<9x256xbf16> to vector<1x256xbf16>
    %54 = vector.shape_cast %53 : vector<1x256xbf16> to vector<256xbf16>
    %55 = vector.shape_cast %54 : vector<256xbf16> to vector<1x1x256xbf16>
    %56 = vector.broadcast %55 : vector<1x1x256xbf16> to vector<16x16x256xbf16>
    %57 = arith.mulf %37, %56 : vector<16x16x256xbf16>
    %58 = arith.addf %52, %57 : vector<16x16x256xbf16>
    %59 = arith.index_cast %arg1 : i32 to index
    %c0_15 = arith.constant 0 : index
    %c0_16 = arith.constant 0 : index
    %60 = vector.load %arg6[%59, %c0_15, %c0_16] : memref<1x1x256xbf16, #tpu.memory_space<vmem>>, vector<1x1x256xbf16>
    %61 = vector.shape_cast %60 : vector<1x1x256xbf16> to vector<1x256xbf16>
    %62 = vector.shape_cast %61 : vector<1x256xbf16> to vector<1x1x256xbf16>
    %63 = vector.broadcast %62 : vector<1x1x256xbf16> to vector<16x16x256xbf16>
    %64 = arith.addf %58, %63 : vector<16x16x256xbf16>
    %c0_17 = arith.constant 0 : index
    %c0_18 = arith.constant 0 : index
    %c0_19 = arith.constant 0 : index
    %65 = vector.load %arg10[%c0_17, %c0_18, %c0_19] : memref<16x16x256xbf16, #tpu.memory_space<vmem>>, vector<16x16x256xbf16>
    tpu.vector_store %arg10[%c0_17, %c0_18, %c0_19], %64 {strides = array<i32>} : memref<16x16x256xbf16, #tpu.memory_space<vmem>>, vector<16x16x256xbf16>,
    %66 = vector.extract_strided_slice %38 {offsets = [0, 0, 0], sizes = [15, 16, 256], strides = [1, 1, 1]} : vector<16x16x256xbf16> to vector<15x16x256xbf16>
    %67 = vector.extract_strided_slice %41 {offsets = [1, 0], sizes = [1, 256], strides = [1, 1]} : vector<9x256xbf16> to vector<1x256xbf16>
    %68 = vector.shape_cast %67 : vector<1x256xbf16> to vector<256xbf16>
    %69 = vector.shape_cast %68 : vector<256xbf16> to vector<1x1x256xbf16>
    %70 = vector.broadcast %69 : vector<1x1x256xbf16> to vector<15x16x256xbf16>
    %71 = arith.mulf %66, %70 : vector<15x16x256xbf16>
    %72 = vector.extract_strided_slice %29 {offsets = [0, 0, 0], sizes = [15, 16, 256], strides = [1, 1, 1]} : vector<16x16x256xbf16> to vector<15x16x256xbf16>
    %73 = vector.extract_strided_slice %41 {offsets = [0, 0], sizes = [1, 256], strides = [1, 1]} : vector<9x256xbf16> to vector<1x256xbf16>
    %74 = vector.shape_cast %73 : vector<1x256xbf16> to vector<256xbf16>
    %75 = vector.shape_cast %74 : vector<256xbf16> to vector<1x1x256xbf16>
    %76 = vector.broadcast %75 : vector<1x1x256xbf16> to vector<15x16x256xbf16>
    %77 = arith.mulf %72, %76 : vector<15x16x256xbf16>
    %78 = arith.addf %71, %77 : vector<15x16x256xbf16>
    %79 = vector.extract_strided_slice %37 {offsets = [0, 0, 0], sizes = [15, 16, 256], strides = [1, 1, 1]} : vector<16x16x256xbf16> to vector<15x16x256xbf16>
    %80 = vector.extract_strided_slice %41 {offsets = [2, 0], sizes = [1, 256], strides = [1, 1]} : vector<9x256xbf16> to vector<1x256xbf16>
    %81 = vector.shape_cast %80 : vector<1x256xbf16> to vector<256xbf16>
    %82 = vector.shape_cast %81 : vector<256xbf16> to vector<1x1x256xbf16>
    %83 = vector.broadcast %82 : vector<1x1x256xbf16> to vector<15x16x256xbf16>
    %84 = arith.mulf %79, %83 : vector<15x16x256xbf16>
    %85 = arith.addf %78, %84 : vector<15x16x256xbf16>
    %c1 = arith.constant 1 : index
    %c0_20 = arith.constant 0 : index
    %c0_21 = arith.constant 0 : index
    %86 = vector.load %arg10[%c1, %c0_20, %c0_21] : memref<16x16x256xbf16, #tpu.memory_space<vmem>>, vector<15x16x256xbf16>
    %87 = arith.addf %86, %85 : vector<15x16x256xbf16>
    %c1_22 = arith.constant 1 : index
    %c0_23 = arith.constant 0 : index
    %c0_24 = arith.constant 0 : index
    %88 = vector.load %arg10[%c1_22, %c0_23, %c0_24] : memref<16x16x256xbf16, #tpu.memory_space<vmem>>, vector<15x16x256xbf16>
    tpu.vector_store %arg10[%c1_22, %c0_23, %c0_24], %87 {strides = array<i32>} : memref<16x16x256xbf16, #tpu.memory_space<vmem>>, vector<15x16x256xbf16>,
    %89 = vector.extract_strided_slice %38 {offsets = [1, 0, 0], sizes = [15, 16, 256], strides = [1, 1, 1]} : vector<16x16x256xbf16> to vector<15x16x256xbf16>
    %90 = vector.extract_strided_slice %41 {offsets = [7, 0], sizes = [1, 256], strides = [1, 1]} : vector<9x256xbf16> to vector<1x256xbf16>
    %91 = vector.shape_cast %90 : vector<1x256xbf16> to vector<256xbf16>
    %92 = vector.shape_cast %91 : vector<256xbf16> to vector<1x1x256xbf16>
    %93 = vector.broadcast %92 : vector<1x1x256xbf16> to vector<15x16x256xbf16>
    %94 = arith.mulf %89, %93 : vector<15x16x256xbf16>
    %95 = vector.extract_strided_slice %29 {offsets = [1, 0, 0], sizes = [15, 16, 256], strides = [1, 1, 1]} : vector<16x16x256xbf16> to vector<15x16x256xbf16>
    %96 = vector.extract_strided_slice %41 {offsets = [6, 0], sizes = [1, 256], strides = [1, 1]} : vector<9x256xbf16> to vector<1x256xbf16>
    %97 = vector.shape_cast %96 : vector<1x256xbf16> to vector<256xbf16>
    %98 = vector.shape_cast %97 : vector<256xbf16> to vector<1x1x256xbf16>
    %99 = vector.broadcast %98 : vector<1x1x256xbf16> to vector<15x16x256xbf16>
    %100 = arith.mulf %95, %99 : vector<15x16x256xbf16>
    %101 = arith.addf %94, %100 : vector<15x16x256xbf16>
    %102 = vector.extract_strided_slice %37 {offsets = [1, 0, 0], sizes = [15, 16, 256], strides = [1, 1, 1]} : vector<16x16x256xbf16> to vector<15x16x256xbf16>
    %103 = vector.extract_strided_slice %41 {offsets = [8, 0], sizes = [1, 256], strides = [1, 1]} : vector<9x256xbf16> to vector<1x256xbf16>
    %104 = vector.shape_cast %103 : vector<1x256xbf16> to vector<256xbf16>
    %105 = vector.shape_cast %104 : vector<256xbf16> to vector<1x1x256xbf16>
    %106 = vector.broadcast %105 : vector<1x1x256xbf16> to vector<15x16x256xbf16>
    %107 = arith.mulf %102, %106 : vector<15x16x256xbf16>
    %108 = arith.addf %101, %107 : vector<15x16x256xbf16>
    %c0_25 = arith.constant 0 : index
    %c0_26 = arith.constant 0 : index
    %c0_27 = arith.constant 0 : index
    %109 = vector.load %arg10[%c0_25, %c0_26, %c0_27] : memref<16x16x256xbf16, #tpu.memory_space<vmem>>, vector<15x16x256xbf16>
    %110 = arith.addf %109, %108 : vector<15x16x256xbf16>
    %c0_28 = arith.constant 0 : index
    %c0_29 = arith.constant 0 : index
    %c0_30 = arith.constant 0 : index
    %111 = vector.load %arg10[%c0_28, %c0_29, %c0_30] : memref<16x16x256xbf16, #tpu.memory_space<vmem>>, vector<15x16x256xbf16>
    tpu.vector_store %arg10[%c0_28, %c0_29, %c0_30], %110 {strides = array<i32>} : memref<16x16x256xbf16, #tpu.memory_space<vmem>>, vector<15x16x256xbf16>,
    %c0_31 = arith.constant 0 : index
    %c0_32 = arith.constant 0 : index
    %c0_33 = arith.constant 0 : index
    %112 = vector.load %arg10[%c0_31, %c0_32, %c0_33] : memref<16x16x256xbf16, #tpu.memory_space<vmem>>, vector<16x16x256xbf16>
    %113 = arith.extf %112 : vector<16x16x256xbf16> to vector<16x16x256xf32>
    %cst_34 = arith.constant 5.000000e-01 : f32
    %114 = vector.broadcast %cst_34 : f32 to vector<16x16x256xf32>
    %115 = arith.mulf %114, %113 : vector<16x16x256xf32>
    %cst_35 = arith.constant 0.707106769 : f32
    %116 = vector.broadcast %cst_35 : f32 to vector<16x16x256xf32>
    %117 = arith.mulf %113, %116 : vector<16x16x256xf32>
    %118 = math.erf %117 : vector<16x16x256xf32>
    %cst_36 = arith.constant 1.000000e+00 : f32
    %119 = vector.broadcast %cst_36 : f32 to vector<16x16x256xf32>
    %120 = arith.addf %119, %118 : vector<16x16x256xf32>
    %121 = arith.mulf %115, %120 : vector<16x16x256xf32>
    %122 = arith.truncf %121 : vector<16x16x256xf32> to vector<16x16x256xbf16>
    %123 = vector.shape_cast %122 : vector<16x16x256xbf16> to vector<256x256xbf16>
    %124 = arith.index_cast %arg1 : i32 to index
    %c0_37 = arith.constant 0 : index
    %c0_38 = arith.constant 0 : index
    %125 = vector.load %arg7[%124, %c0_37, %c0_38] : memref<1x256x128xbf16, #tpu.memory_space<vmem>>, vector<1x256x128xbf16>
    %126 = vector.shape_cast %125 : vector<1x256x128xbf16> to vector<256x128xbf16>
    %cst_39 = arith.constant dense<0.000000e+00> : vector<256x128xf32>
    %127 = tpu.matmul %123, %126, %cst_39 {dimension_numbers = #tpu.dot_dimension_numbers<[1], [0], [0], [1], [0, 0, 1, 1], [], []>} : vector<256x256xbf16>, vector<256x128xbf16>, vector<256x128xf32> -> vector<256x128xf32>
    %c0_i32_40 = arith.constant 0 : i32
    %128 = arith.cmpi eq, %arg1, %c0_i32_40 : i32
    %129 = arith.extui %128 : i1 to i32
    %c0_i32_41 = arith.constant 0 : i32
    %130 = arith.cmpi ne, %129, %c0_i32_41 : i32
    scf.if %130 {
      %137 = vector.shape_cast %127 : vector<256x128xf32> to vector<16x16x128xf32>
      %c0_46 = arith.constant 0 : index
      %c0_47 = arith.constant 0 : index
      %c0_48 = arith.constant 0 : index
      %c0_49 = arith.constant 0 : index
      %138 = vector.load %arg9[%c0_46, %c0_47, %c0_48, %c0_49] : memref<1x16x16x128xf32, #tpu.memory_space<vmem>>, vector<1x16x16x128xf32>
      %139 = vector.shape_cast %138 : vector<1x16x16x128xf32> to vector<16x16x128xf32>
      %140 = vector.shape_cast %137 : vector<16x16x128xf32> to vector<1x16x16x128xf32>
      tpu.vector_store %arg9[%c0_46, %c0_47, %c0_48, %c0_49], %140 {strides = array<i32>} : memref<1x16x16x128xf32, #tpu.memory_space<vmem>>, vector<1x16x16x128xf32>,
    } else {
    }
    %c0_i32_42 = arith.constant 0 : i32
    %131 = arith.cmpi ne, %arg1, %c0_i32_42 : i32
    %132 = arith.extui %131 : i1 to i32
    %c0_i32_43 = arith.constant 0 : i32
    %133 = arith.cmpi ne, %132, %c0_i32_43 : i32
    scf.if %133 {
      %c0_46 = arith.constant 0 : index
      %c0_47 = arith.constant 0 : index
      %c0_48 = arith.constant 0 : index
      %c0_49 = arith.constant 0 : index
      %137 = vector.load %arg9[%c0_46, %c0_47, %c0_48, %c0_49] : memref<1x16x16x128xf32, #tpu.memory_space<vmem>>, vector<1x16x16x128xf32>
      %138 = vector.shape_cast %137 : vector<1x16x16x128xf32> to vector<16x16x128xf32>
      %139 = vector.shape_cast %127 : vector<256x128xf32> to vector<16x16x128xf32>
      %140 = arith.addf %138, %139 : vector<16x16x128xf32>
      %c0_50 = arith.constant 0 : index
      %c0_51 = arith.constant 0 : index
      %c0_52 = arith.constant 0 : index
      %c0_53 = arith.constant 0 : index
      %141 = vector.load %arg9[%c0_50, %c0_51, %c0_52, %c0_53] : memref<1x16x16x128xf32, #tpu.memory_space<vmem>>, vector<1x16x16x128xf32>
      %142 = vector.shape_cast %141 : vector<1x16x16x128xf32> to vector<16x16x128xf32>
      %143 = vector.shape_cast %140 : vector<16x16x128xf32> to vector<1x16x16x128xf32>
      tpu.vector_store %arg9[%c0_50, %c0_51, %c0_52, %c0_53], %143 {strides = array<i32>} : memref<1x16x16x128xf32, #tpu.memory_space<vmem>>, vector<1x16x16x128xf32>,
    } else {
    }
    %c0_i32_44 = arith.constant 0 : i32
    %134 = arith.cmpi eq, %arg1, %c0_i32_44 : i32
    %135 = arith.extui %134 : i1 to i32
    %c0_i32_45 = arith.constant 0 : i32
    %136 = arith.cmpi ne, %135, %c0_i32_45 : i32
    scf.if %136 {
      %c0_46 = arith.constant 0 : index
      %c0_47 = arith.constant 0 : index
      %c0_48 = arith.constant 0 : index
      %c0_49 = arith.constant 0 : index
      %137 = vector.load %arg9[%c0_46, %c0_47, %c0_48, %c0_49] : memref<1x16x16x128xf32, #tpu.memory_space<vmem>>, vector<1x16x16x128xf32>
      %138 = vector.shape_cast %137 : vector<1x16x16x128xf32> to vector<16x16x128xf32>
      %139 = vector.shape_cast %138 : vector<16x16x128xf32> to vector<256x128xf32>
      %c0_50 = arith.constant 0 : index
      %c0_51 = arith.constant 0 : index
      %140 = vector.load %arg8[%c0_50, %c0_51] : memref<1x128xf32, #tpu.memory_space<vmem>>, vector<1x128xf32>
      %141 = vector.broadcast %140 : vector<1x128xf32> to vector<256x128xf32>
      %142 = arith.addf %139, %141 : vector<256x128xf32>
      %cst_52 = arith.constant 5.000000e-01 : f32
      %143 = vector.broadcast %cst_52 : f32 to vector<256x128xf32>
      %144 = arith.mulf %143, %142 : vector<256x128xf32>
      %cst_53 = arith.constant 0.707106769 : f32
      %145 = vector.broadcast %cst_53 : f32 to vector<256x128xf32>
      %146 = arith.mulf %142, %145 : vector<256x128xf32>
      %147 = math.erf %146 : vector<256x128xf32>
      %cst_54 = arith.constant 1.000000e+00 : f32
      %148 = vector.broadcast %cst_54 : f32 to vector<256x128xf32>
      %149 = arith.addf %148, %147 : vector<256x128xf32>
      %150 = arith.mulf %144, %149 : vector<256x128xf32>
      %151 = vector.shape_cast %150 : vector<256x128xf32> to vector<16x16x128xf32>
      %c0_55 = arith.constant 0 : index
      %c0_56 = arith.constant 0 : index
      %c0_57 = arith.constant 0 : index
      %c0_58 = arith.constant 0 : index
      %152 = vector.load %arg9[%c0_55, %c0_56, %c0_57, %c0_58] : memref<1x16x16x128xf32, #tpu.memory_space<vmem>>, vector<1x16x16x128xf32>
      %153 = vector.shape_cast %152 : vector<1x16x16x128xf32> to vector<16x16x128xf32>
      %154 = vector.shape_cast %151 : vector<16x16x128xf32> to vector<1x16x16x128xf32>
      tpu.vector_store %arg9[%c0_55, %c0_56, %c0_57, %c0_58], %154 {strides = array<i32>} : memref<1x16x16x128xf32, #tpu.memory_space<vmem>>, vector<1x16x16x128xf32>,
    } else {
    }
    return
  }
  func.func @transform_0(%arg0: i32, %arg1: i32) -> (i32, i32, i32, i32) {
    %c0_i32 = arith.constant 0 : i32
    %c0_i32_0 = arith.constant 0 : i32
    %c0_i32_1 = arith.constant 0 : i32
    %c0_i32_2 = arith.constant 0 : i32
    return %arg0, %c0_i32, %c0_i32_0, %c0_i32_1 : i32, i32, i32, i32
  }
  func.func @transform_1(%arg0: i32, %arg1: i32) -> (i32, i32, i32) {
    %c0_i32 = arith.constant 0 : i32
    %c0_i32_0 = arith.constant 0 : i32
    %c0_i32_1 = arith.constant 0 : i32
    %c0_i32_2 = arith.constant 0 : i32
    return %c0_i32, %c0_i32_0, %c0_i32_1 : i32, i32, i32
  }
  func.func @transform_2(%arg0: i32, %arg1: i32) -> (i32, i32, i32) {
    %c0_i32 = arith.constant 0 : i32
    %c0_i32_0 = arith.constant 0 : i32
    %c0_i32_1 = arith.constant 0 : i32
    %c0_i32_2 = arith.constant 0 : i32
    return %c0_i32, %c0_i32_0, %c0_i32_1 : i32, i32, i32
  }
  func.func @transform_3(%arg0: i32, %arg1: i32) -> (i32, i32, i32) {
    %c0_i32 = arith.constant 0 : i32
    %c0_i32_0 = arith.constant 0 : i32
    %c0_i32_1 = arith.constant 0 : i32
    %c0_i32_2 = arith.constant 0 : i32
    return %c0_i32, %c0_i32_0, %c0_i32_1 : i32, i32, i32
  }
  func.func @transform_4(%arg0: i32, %arg1: i32) -> (i32, i32, i32) {
    %c0_i32 = arith.constant 0 : i32
    %c0_i32_0 = arith.constant 0 : i32
    %c0_i32_1 = arith.constant 0 : i32
    %c0_i32_2 = arith.constant 0 : i32
    return %c0_i32, %c0_i32_0, %c0_i32_1 : i32, i32, i32
  }
  func.func @transform_5(%arg0: i32, %arg1: i32) -> (i32, i32, i32) {
    %c0_i32 = arith.constant 0 : i32
    %c0_i32_0 = arith.constant 0 : i32
    %c0_i32_1 = arith.constant 0 : i32
    %c0_i32_2 = arith.constant 0 : i32
    return %c0_i32, %c0_i32_0, %c0_i32_1 : i32, i32, i32
  }
  func.func @transform_6(%arg0: i32, %arg1: i32) -> (i32, i32) {
    %c0_i32 = arith.constant 0 : i32
    %c0_i32_0 = arith.constant 0 : i32
    %c0_i32_1 = arith.constant 0 : i32
    return %c0_i32, %c0_i32_0 : i32, i32
  }
  func.func @transform_7(%arg0: i32, %arg1: i32) -> (i32, i32, i32, i32) {
    %c0_i32 = arith.constant 0 : i32
    %c0_i32_0 = arith.constant 0 : i32
    %c0_i32_1 = arith.constant 0 : i32
    %c0_i32_2 = arith.constant 0 : i32
    return %arg0, %c0_i32, %c0_i32_0, %c0_i32_1 : i32, i32, i32, i32
  }
}

</mosaic_0001>

<bundles_post_ra>
// kernel: tpu_custom_call.1
= control target key start
LH: loop header
LB: loop body
LE: loop exit
PB: predicated region body
PF: predicated region fallthrough
CT: control target
= control target key end

     0   :  { %s7556_s0 = inlined_call_operand.hbm [shape: bf16[2,16,16,128], index: 0, kind: input, shape index: {}]   ;;  %s7557_s1 = inlined_call_operand.hbm [shape: bf16[1,128,256], index: 1, kind: input, shape index: {}]   ;;  %s7558_s2 = inlined_call_operand.vmem [shape: f32[1,1,256], index: 2, kind: input, shape index: {}]   ;;  %s7559_s3 = inlined_call_operand.hbm [shape: bf16[1,9,256], index: 3, kind: input, shape index: {}]   ;;  %s7560_s4 = inlined_call_operand.vmem [shape: bf16[1,1,256], index: 4, kind: input, shape index: {}]   ;;  %s7561_s5 = inlined_call_operand.hbm [shape: bf16[1,256,128], index: 5, kind: input, shape index: {}]   ;;  %s7562_s6 = inlined_call_operand.vmem [shape: f32[1,128], index: 6, kind: input, shape index: {}]   ;;  %s7563_s7 = inlined_call_operand.hbm [shape: f32[2,16,16,128], index: 7, kind: output, shape index: {}]  }
   0x1   :  { %7654 = sst [smem:[#allocation93_spill]] %s7557_s1 }
   0x2   :  { %7655 = sst [smem:[#allocation94_spill]] %s7559_s3 }
   0x3   :  { %7656 = sst [smem:[#allocation95_spill]] %s7561_s5 }
   0x4   :  { %12 = vsyncpa [#allocation4], 0 }
   0x5   :  { %14 = vsyncpa [#allocation4 + $0x1], 0 }
   0x6   :  { %15 = vsyncpa [#allocation7], 0 }
   0x7   :  { %16 = vsyncpa [#allocation10], 0 }
   0x8   :  { %17 = vsyncpa [#allocation5], 0 }
   0x9   :  { %19 = vsyncpa [#allocation5 + $0x1], 0  ;;  %s5200_s24 = smov 0   ;;  %s5202_s25 = smov 0  }
   0xa   :  { %s5204_s26 = smov 0   ;;  %s5206_s27 = smov 0  }
   0xb   :  { %s5208_s28 = smov 0   ;;  %s5210_s29 = smov 0  }
   0xc LB: > { %s4189_s30 = sadd.s32 4294967295, %s5145_s29   ;;  %s4190_s8 = sadd.s32 4294967294, %s5145_s29   ;;  %s5145_s29 = sphi %s5210_s29, %s25_s29   ;;  %s5141_s28 = sphi %s5208_s28, %s7990_s28   ;;  %s5137_s27 = sphi %s5206_s27, %s7989_s27   ;;  %s5133_s26 = sphi %s5204_s26, %s7988_s26   ;;  %s5129_s25 = sphi %s5202_s25, %s7987_s25   ;;  %s5125_s24 = sphi %s5200_s24, %s7986_s24  }
   0xd   : > { %p57_p0 = scmp.ne.s32.totalorder %s5129_s25, %s5125_s24  ;;  %p5234_p1 = scmp.eq.s32.totalorder %s4189_s30, 0 }
   0xe   : > { %p5238_p2 = scmp.eq.s32.totalorder %s4189_s30, 1  ;;  %p213_p3 = scmp.eq.s32.totalorder %s4190_s8, 1 }
   0xf   : > { %s7657_s9 = scalar_select %p5234_p1, 1, 0 }
  0x10   : > { %p5244_p4 = por %p5234_p1, %p57_p0  ;;  %p4191_p5 = scmp.ge.s32.totalorder %s5145_s29, 1 }
  0x11   : > { %p5249_p6 = por %p213_p3, %p57_p0  ;;  %p220_p7 = scmp.lt.s32.totalorder %s5145_s29, 3 }
  0x12   : > { %s7659_s11 = scalar_select %p5244_p4, 1, 0 }
  0x13   : > { %s7660_s12 = scalar_select %p5249_p6, 1, 0 }
  0x14   : > { %p5254_p8 = pnand %p4191_p5, %p220_p7  ;;  %s5147_s14 = smov [#allocation6]  }
  0x15   : > { %s232_s15 = sshll.u32 %s5147_s14, 4  ;;  %s5148_s17 = smov [#allocation8]   ;;  %s233_s15 = int_to_ptr.vmem [resolvable:$true] %s232_s15 }
  0x16   : > { %s7661_s13 = scalar_select %p5254_p8, 1, 0 }
  0x17   : > { %p4486_p9 = pneg %p5254_p8  ;;  %s248_s18 = sshll.u32 %s5148_s17, 4  ;;  %s249_s18 = int_to_ptr.vmem [resolvable:$true] %s248_s18 }
  0x18   : > { %s5149_s19 = smov [#allocation9]   ;;  %s4962_s21 = scalar_lea.vmem %s233_s15, 2048 }
  0x19   : > { %p5263_p11 = pnand %p4486_p9, %p5234_p1  ;;  %s264_s20 = sshll.u32 %s5149_s19, 4  ;;  %s265_s20 = int_to_ptr.vmem [resolvable:$true] %s264_s20 }
  0x1a   : > { %p4963_p13 = scmp.ne.s32.totalorder %s233_s15, %s4962_s21  ;;  %p4970_p5 = scmp.lt.s32.totalorder %s233_s15, %s233_s15 }
  0x1b   : > { %p4953_p12 = pneg %p5263_p11  ;;  %p4971_p7 = scmp.lt.s32.totalorder %s4962_s21, %s4962_s21 }
  0x1d   : > { %p4965_p0 = pnand %p4963_p13, %p4953_p12  ;;  %p4972_p9 = por %p4971_p7, %p4970_p5 }
  0x1f   : > { %p4966_p3 = pneg %p4965_p0 }
  0x21   : > { %p4973_p10 = pnand %p4972_p9, %p4966_p3 }
  0x23   : > { %4976 = shalt.err (!%p4973_p10)
}
  0x24   : > { %s5150_s22 = smov 128   ;;  %s5151_s23 = smov 8  }
  0x25   : > { %s7663_s1 = sld [smem:[#allocation93_spill]]  ;;  %s4988_s14 = scalar_lea.vmem %s249_s18, 256 }
  0x26   : > { %p4989_p6 = scmp.ne.s32.totalorder %s249_s18, %s4988_s14  ;;  %p4996_p1 = scmp.lt.s32.totalorder %s249_s18, %s249_s18 }
  0x27   : > { %p4997_p4 = scmp.lt.s32.totalorder %s4988_s14, %s4988_s14 }
  0x28   : > { %p4991_p13 = pnand %p4989_p6, %p4953_p12 }
  0x29   : > { %p4998_p5 = por %p4997_p4, %p4996_p1 }
  0x2a   : > { %p4992_p0 = pneg %p4991_p13 }
  0x2b   : > { %4489 = dma.hbm_to_vmem [thread:$0]  (!%p5263_p11), %s7663_s1, 2048, %s233_s15, [#allocation7], %s5150_s22, %s5150_s22, %s5151_s23  }
  0x2c   : > { %p4999_p3 = pnand %p4998_p5, %p4992_p0 }
  0x2e   : > { %5002 = shalt.err (!%p4999_p3)
}
  0x2f   : > { %s7664_s3 = sld [smem:[#allocation94_spill]]  ;;  %s5014_s15 = scalar_lea.vmem %s265_s20, 2048 }
  0x30   : > { %p5015_p10 = scmp.ne.s32.totalorder %s265_s20, %s5014_s15  ;;  %p5022_p9 = scmp.lt.s32.totalorder %s265_s20, %s265_s20 }
  0x31   : > { %p5023_p13 = scmp.lt.s32.totalorder %s5014_s15, %s5014_s15 }
  0x32   : > { %p5017_p7 = pnand %p5015_p10, %p4953_p12 }
  0x33   : > { %p5024_p8 = por %p5023_p13, %p5022_p9 }
  0x34   : > { %p5018_p6 = pneg %p5017_p7 }
  0x35   : > { %4492 = dma.hbm_to_vmem [thread:$0]  (!%p5263_p11), %s7664_s3, 256, %s249_s18, [#allocation7], %s5150_s22, %s5150_s22, %s5151_s23  }
  0x36   : > { %p5025_p1 = pnand %p5024_p8, %p5018_p6 }
  0x38   : > { %5028 = shalt.err (!%p5025_p1)
}
  0x39   : > { %s7568_s21 = smov 64   ;;  %s7569_s18 = smov 4  }
  0x3a   : > { %s7665_s5 = sld [smem:[#allocation95_spill]]  ;;  %s44_s30 = sadd.s32 1, %s5133_s26 }
  0x3b   : > { %s37_s8 = sadd.s32 1, %s5141_s28  ;;  %p51_p4 = scmp.ne.s32.totalorder %s5133_s26, %s5129_s25 }
  0x3c   : > { %p39_p8 = scmp.ge.s32.totalorder %s37_s8, 2  ;;  %p52_p12 = scmp.eq.s32.totalorder %s5145_s29, 0 }
  0x3d   : > { %p5303_p0 = por %p5238_p2, %p51_p4  ;;  %p4507_p5 = scmp.lt.s32.totalorder %s5145_s29, 2 }
  0x3e   : > { %s7992_s8 = smov (%p39_p8, %s37_s8), 0  ;;  %p53_p3 = por %p52_p12, %p51_p4 }
  0x3f   : > { %s281_s16 = sand.u32 1, %s5133_s26   ;;  %s41_s17 = ssub.s32 %s5141_s28, %s7992_s8 }
  0x40   : > { %4495 = dma.hbm_to_vmem [thread:$0]  (!%p5263_p11), %s7665_s5, 2048, %s265_s20, [#allocation10], %s7568_s21, %s7568_s21, %s7569_s18  }
  0x41   : > { %p42_p10 = scmp.eq.s32.totalorder %s41_s17, 0  ;;  %s4196_s20 = sshll.u32 %s281_s16, 7 }
  0x42   : > { %s4356_s19 = sshll.u32 %s5141_s28, 11  ;;  %s285_s21 = scalar_lea.vmem [#allocation3], %s4196_s20 }
  0x43   : > { %s5315_s15 = scalar_select %p42_p10, %s5133_s26, %s44_s30  }
  0x44   : > { %s291_s10 = scalar_lea.hbm %s7556_s0, %s4356_s19  ;;  %s292_s18 = sshll.u32 %s285_s21, 4  ;;  %s293_s18 = int_to_ptr.vmem [resolvable:$true] %s292_s18 }
  0x45   : > { %p5322_p2 = pnand %p4507_p5, %p53_p3  ;;  %s282_s3 = scalar_lea.sflag [#allocation4], %s281_s16 }
  0x46   : > { %s5042_s17 = scalar_lea.vmem %s293_s18, 2048  ;;  %s5154_s30 = smov [#allocation3]  }
  0x47   : > { %p5031_p11 = pneg %p5322_p2  ;;  %p5043_p7 = scmp.ne.s32.totalorder %s293_s18, %s5042_s17 }
  0x48   : > { %s5047_s5 = sshll.u32 %s5154_s30, 4  ;;  %s5048_s5 = int_to_ptr.vmem [resolvable:$false] %s5047_s5 }
  0x49   : > { %p5045_p6 = pnand %p5043_p7, %p5031_p11  ;;  %s5049_s19 = scalar_lea.vmem %s5048_s5, 4096 }
  0x4a   : > { %p5050_p13 = scmp.lt.s32.totalorder %s293_s18, %s5048_s5  ;;  %p5051_p1 = scmp.lt.s32.totalorder %s5049_s19, %s5042_s17 }
  0x4b   : > { %p5046_p9 = pneg %p5045_p6 }
  0x4c   : > { %p5052_p4 = por %p5051_p1, %p5050_p13 }
  0x4e   : > { %p5053_p8 = pnand %p5052_p4, %p5046_p9 }
  0x50   : > { %5056 = shalt.err (!%p5053_p8)
}
  0x51   : > { %s7668_s21 = smov 4   ;;  %s7669_s20 = smov 64  }
  0x52   : > { %4499 = dma.hbm_to_vmem [thread:$0]  (!%p5322_p2), %s291_s10, 2048, %s293_s18, %s282_s3, %s7669_s20, %s7669_s20, %s7668_s21  }
  0x53   : > { %p7670_p12 = scmp.ne.s32.totalorder %s7661_s13, 0 }
  0x55   : > { %304 = sbr.rel (%p7670_p12) target bundleno = 1064 (0x428), region = 48 }
  0x5a   : > { %s5336_s16 = sand.u32 1, %s5129_s25   ;;  %p7671_p5 = scmp.ne.s32.totalorder %s7659_s11, 0 }
  0x5b   : > { %s4200_s5 = sshll.u32 %s5336_s16, 7  ;;  %s307_s22 = scalar_lea.sflag [#allocation4], %s5336_s16 }
  0x5c   : > { %s5340_s23 = scalar_lea.vmem [#allocation3], %s4200_s5 }
  0x5d   : > { %5108 = dma.done.wait (%p7671_p5), %s307_s22, 2048  }
  0x5e   : > { %5110 = vsyncadd (%p7671_p5), %s307_s22, 4294965248  ;;  %p7672_p3 = scmp.ne.s32.totalorder %s7657_s9, 0 }
  0x60   : > { %5112 = dma.done.wait (%p7672_p3), [#allocation7], 2304  }
  0x61   : > { %5114 = vsyncadd (%p7672_p3), [#allocation7], 4294964992 }
  0x62   : > { %5116 = dma.done.wait (%p7672_p3), [#allocation10], 2048  }
  0x63   : > { %5118 = vsyncadd (%p7672_p3), [#allocation10], 4294965248  ;;  %v5155_v0 = vmov 0   ;;  %v4571_v1 = vld [vmem:[#allocation6 + $0x74] ss:$8 sps:$4 sm:$0xff]   ;;  %v4595_v17 = vld [vmem:[%s5340_s23] sm:$0xff]   ;;  %v409_v37 = vlaneseq }
  0x64   : > { %627 = vmatprep.mubr.bf16.mxu0 %v5155_v0  ;;  %v4573_v2 = vld [vmem:[#allocation6 + $0x70] ss:$8 sps:$4 sm:$0xff]   ;;  %595 = vmatprep.subr.bf16.mxu0 %v4571_v1  ;;  %v4574_v3 = vld [vmem:[#allocation6 + $0x64] ss:$8 sps:$4 sm:$0xff]   ;;  %v4576_v4 = vld [vmem:[#allocation6 + $0x60] ss:$8 sps:$4 sm:$0xff]  }
  0x65   : > { %596 = vmatpush1.bf16.msra.mxu0 %v4573_v2  ;;  %v4577_v5 = vld [vmem:[#allocation6 + $0x54] ss:$8 sps:$4 sm:$0xff]   ;;  %v4579_v6 = vld [vmem:[#allocation6 + $0x50] ss:$8 sps:$4 sm:$0xff]   ;;  %v4580_v7 = vld [vmem:[#allocation6 + $0x44] ss:$8 sps:$4 sm:$0xff]  }
  0x66   : > { %597 = vmatprep.subr.bf16.mxu0 %v4574_v3  ;;  %v4582_v8 = vld [vmem:[#allocation6 + $0x40] ss:$8 sps:$4 sm:$0xff]   ;;  %v4583_v9 = vld [vmem:[#allocation6 + $0x34] ss:$8 sps:$4 sm:$0xff]   ;;  %v4585_v10 = vld [vmem:[#allocation6 + $0x30] ss:$8 sps:$4 sm:$0xff]  }
  0x67   : > { %v4586_v11 = vld [vmem:[#allocation6 + $0x24] ss:$8 sps:$4 sm:$0xff]   ;;  %v4588_v12 = vld [vmem:[#allocation6 + $0x20] ss:$8 sps:$4 sm:$0xff]   ;;  %v4589_v13 = vld [vmem:[#allocation6 + $0x14] ss:$8 sps:$4 sm:$0xff]  }
  0x68   : > { %v4591_v14 = vld [vmem:[#allocation6 + $0x10] ss:$8 sps:$4 sm:$0xff]   ;;  %v4592_v15 = vld [vmem:[#allocation6 + $0x4] ss:$8 sps:$4 sm:$0xff]   ;;  %v4594_v16 = vld [vmem:[#allocation6] ss:$8 sps:$4 sm:$0xff]  }
  0x69   : > { %598 = vmatpush1.bf16.msra.mxu0 %v4576_v4  ;;  %v4596_v18 = vld [vmem:[%s5340_s23 + $0x8] sm:$0xff]   ;;  %v4597_v19 = vld [vmem:[%s5340_s23 + $0x10] sm:$0xff]   ;;  %v4598_v20 = vld [vmem:[%s5340_s23 + $0x18] sm:$0xff]   ;;  %v5386_v39 = vshrl.u32 %v409_v37, 7  ;;  %s4204_s10 = sshll.u32 %s5336_s16, 8  ;;  %s4357_s30 = sshll.u32 %s5137_s27, 12 }
  0x6a   : > { %599 = vmatprep.subr.bf16.mxu0 %v4577_v5  ;;  %v4599_v21 = vld [vmem:[%s5340_s23 + $0x20] sm:$0xff]   ;;  %v4600_v22 = vld [vmem:[%s5340_s23 + $0x28] sm:$0xff]   ;;  %v4601_v23 = vld [vmem:[%s5340_s23 + $0x30] sm:$0xff]   ;;  %s7430_s17 = scalar_lea.vmem [#allocation11], %s4204_s10  ;;  %s7505_s5 = scalar_lea.hbm %s7563_s7, %s4357_s30 }
  0x6b   : > { %v4602_v24 = vld [vmem:[%s5340_s23 + $0x38] sm:$0xff]   ;;  %v4603_v25 = vld [vmem:[%s5340_s23 + $0x40] sm:$0xff]   ;;  %v4604_v26 = vld [vmem:[%s5340_s23 + $0x48] sm:$0xff]   ;;  %v5389_v41 = vsub.s32 0, %v5386_v39  ;;  %v5395_v43 = vsub.s32 1, %v5386_v39  ;;  %v1620_v4 = vsub.s32 2, %v5386_v39 }
  0x6c   : > { %v4605_v27 = vld [vmem:[%s5340_s23 + $0x50] sm:$0xff]   ;;  %v4606_v28 = vld [vmem:[%s5340_s23 + $0x58] sm:$0xff]   ;;  %v4607_v29 = vld [vmem:[%s5340_s23 + $0x60] sm:$0xff]   ;;  %vm1177_vm0 = vcmp.lt.s32.totalorder %v5386_v39, 1  ;;  %vm1408_vm1 = vcmp.lt.s32.totalorder %v5386_v39, 7  ;;  %vm1111_vm2 = vcmp.gt.s32.totalorder %v5386_v39, 0 }
  0x6d   : > { %600 = vmatpush1.bf16.msra.mxu0 %v4579_v6  ;;  %v4608_v30 = vld [vmem:[%s5340_s23 + $0x68] sm:$0xff]   ;;  %v4609_v31 = vld [vmem:[%s5340_s23 + $0x70] sm:$0xff]   ;;  %v4610_v32 = vld [vmem:[%s5340_s23 + $0x78] sm:$0xff]   ;;  %7673 = vst [vmem:[#allocation16_spill] sm:$0xff] %v5389_v41  ;;  %s4069_s19 = sshll.u32 %s7430_s17, 4  ;;  %s4056_s22 = scalar_lea.sflag [#allocation5], %s5336_s16  ;;  %s7507_s19 = int_to_ptr.vmem [resolvable:$true] %s4069_s19 }
  0x6e   : > { %601 = vmatprep.subr.bf16.mxu0 %v4580_v7  ;;  %v4613_v33 = vld [vmem:[#allocation9 + $0x78] sm:$0xff]   ;;  %v4615_v35 = vld [vmem:[#allocation9 + $0x70] sm:$0xff]   ;;  %v4617_v38 = vld [vmem:[#allocation9 + $0x68] sm:$0xff]   ;;  %s5057_s23 = scalar_lea.vmem %s7507_s19, 4096  ;;  %s5157_s27 = smov [#allocation11]  }
  0x6f   : > { %v4614_v34 = vld [vmem:[#allocation9 + $0x38] sm:$0xff]   ;;  %4358 = vmatprep.subr.bf16.mxu1 %v4613_v33  ;;  %v4616_v36 = vld [vmem:[#allocation9 + $0x30] sm:$0xff]   ;;  %v4618_v40 = vld [vmem:[#allocation9 + $0x28] sm:$0xff]   ;;  %p5058_p10 = scmp.ne.s32.totalorder %s7507_s19, %s5057_s23  ;;  %s5061_s1 = sshll.u32 %s5157_s27, 4  ;;  %s5062_s1 = int_to_ptr.vmem [resolvable:$false] %s5061_s1 }
  0x70   : > { %4359 = vmatpush3.bf16.msra.mxu1 %v4614_v34  ;;  %v407_v42 = vld [vmem:[%s7558_s2] sm:$0x3]  ;;  %v4619_v44 = vld [vmem:[#allocation9 + $0x60] sm:$0xff]   ;;  %s5063_s3 = scalar_lea.vmem %s5062_s1, 8192  ;;  %p5064_p7 = scmp.lt.s32.totalorder %s7507_s19, %s5062_s1 }
  0x71   : > { %602 = vmatpush1.bf16.msra.mxu0 %v4582_v8  ;;  %4360 = vmatprep.subr.bf16.mxu1 %v4615_v35  ;;  %v5398_v45 = vrot.slane %v407_v42, %v5389_v41  ;;  %v4620_v46 = vld [vmem:[#allocation9 + $0x20] sm:$0xff]   ;;  %v5401_v47 = vrot.slane %v407_v42, %v5395_v43  ;;  %v1608_v48 = vld [vmem:[#allocation8] sm:$0xff]  ;;  %p5059_p2 = pnand %p5058_p10, %p5303_p0  ;;  %p5065_p6 = scmp.lt.s32.totalorder %s5063_s3, %s5057_s23 }
  0x72   : > { %603 = vmatprep.subr.bf16.mxu0 %v4583_v9  ;;  %v4237_v52 = vcombine.low %v1608_v48, %v1608_v48  ;;  %v4238_v56 = vcombine.high %v1608_v48, %v1608_v48  ;;  %v4621_v9 = vld [vmem:[#allocation9 + $0x58] sm:$0xff]   ;;  %v4624_v48 = vld [vmem:[#allocation9 + $0x10] sm:$0xff]  }
  0x73   : > { %7674 = vst [vmem:[#allocation17_spill] sm:$0xff] %v5398_v45  ;;  %7675 = vst [vmem:[#allocation18_spill] sm:$0xff] %v5401_v47  ;;  %p5060_p11 = pneg %p5059_p2  ;;  %p5066_p9 = por %p5065_p6, %p5064_p7 }
  0x74   : > { %4361 = vmatpush3.bf16.msra.mxu1 %v4616_v36  ;;  %v1661_v59 = vshrl.u32 %v4237_v52, 16  ;;  %v1668_v63 = vshrl.u32 %v4238_v56, 16  ;;  %v1616_v3 = vpack.i.b16 %v4237_v52, %v4237_v52 }
  0x75   : > { %604 = vmatpush1.bf16.msra.mxu0 %v4585_v10  ;;  %4362 = vmatprep.subr.bf16.mxu1 %v4617_v38  ;;  %v1623_v10 = vpack.i.b16 %v4238_v56, %v4238_v56  ;;  %v4623_v38 = vld [vmem:[#allocation9 + $0x50] sm:$0xff]   ;;  %p5067_p13 = pnand %p5066_p9, %p5060_p11 }
  0x76   : > { %605 = vmatprep.subr.bf16.mxu0 %v4586_v11  ;;  %v1662_v5 = vpack.i.b16 %v1661_v59, %v1661_v59  ;;  %v1669_v11 = vpack.i.b16 %v1668_v63, %v1668_v63 }
  0x77   : > { %v5464_v34 = vrot.slane %v1623_v10, %v5389_v41  ;;  %v5467_v35 = vrot.slane %v1623_v10, %v5395_v43 }
  0x78   : > { %4363 = vmatpush3.bf16.msra.mxu1 %v4618_v40 }
  0x79   : > { %606 = vmatpush1.bf16.msra.mxu0 %v4588_v12  ;;  %4364 = vmatprep.subr.bf16.mxu1 %v4619_v44  ;;  %7677 = vst [vmem:[#allocation20_spill] sm:$0xff] %v5467_v35 }
  0x7a   : > { %607 = vmatprep.subr.bf16.mxu0 %v4589_v13  ;;  %v4622_v13 = vld [vmem:[#allocation9 + $0x18] sm:$0xff]  }
  0x7c   : > { %4365 = vmatpush3.bf16.msra.mxu1 %v4620_v46 }
  0x7d   : > { %608 = vmatpush1.bf16.msra.mxu0 %v4591_v14  ;;  %v5428_v14 = vadd.s32 8, %v5386_v39  ;;  %4366 = vmatprep.subr.bf16.mxu1 %v4621_v9 }
  0x7e   : > { %609 = vmatprep.subr.bf16.mxu0 %v4592_v15 }
  0x7f   : > { %vm1343_vm3 = vcmp.lt.s32.totalorder %v5428_v14, 15 }
  0x80   : > { %4367 = vmatpush3.bf16.msra.mxu1 %v4622_v13 }
  0x81   : > { %610 = vmatpush1.bf16.msra.mxu0 %v4594_v16  ;;  %v5431_v16 = vrot.slane %v1616_v3, %v1620_v4  ;;  %4368 = vmatprep.subr.bf16.mxu1 %v4623_v38 }
  0x84   : > { %628 = vmatmul.mubr.bf16.vlgmr.msra.gmra.mxu0 %v4595_v17  ;;  %v5434_v17 = vrot.slane %v1662_v5, %v5395_v43  ;;  %4369 = vmatpush3.bf16.msra.mxu1 %v4624_v48 }
  0x85   : > { %637 = vmatprep.mubr.bf16.mxu0 %v5155_v0 }
  0x8c   : > { %638 = vmatmul.mubr.bf16.gmra.mxu0 %v4596_v18  ;;  %v5437_v18 = vrot.slane %v1662_v5, %v5389_v41 }
  0x8d   : > { %647 = vmatprep.mubr.bf16.mxu0 %v5155_v0 }
  0x94   : > { %648 = vmatmul.mubr.bf16.gmra.mxu0 %v4597_v19 }
  0x95   : > { %657 = vmatprep.mubr.bf16.mxu0 %v5155_v0 }
  0x9c   : > { %658 = vmatmul.mubr.bf16.gmra.mxu0 %v4598_v20 }
  0x9d   : > { %667 = vmatprep.mubr.bf16.mxu0 %v5155_v0 }
  0xa4   : > { %668 = vmatmul.mubr.bf16.gmra.mxu0 %v4599_v21  ;;  %v5440_v21 = vrot.slane %v1662_v5, %v1620_v4 }
  0xa5   : > { %677 = vmatprep.mubr.bf16.mxu0 %v5155_v0 }
  0xac   : > { %678 = vmatmul.mubr.bf16.gmra.mxu0 %v4600_v22 }
  0xad   : > { %687 = vmatprep.mubr.bf16.mxu0 %v5155_v0 }
  0xb4   : > { %688 = vmatmul.mubr.bf16.gmra.mxu0 %v4601_v23  ;;  %v2491_v23 = vsub.s32 3, %v5386_v39 }
  0xb5   : > { %697 = vmatprep.mubr.bf16.mxu0 %v5155_v0 }
  0xb6   : > { %v5471_v42 = vrot.slane %v1662_v5, %v2491_v23  ;;  %v5473_v44 = vrot.slane %v1669_v11, %v2491_v23  ;;  %v5475_v46 = vrot.slane %v1616_v3, %v2491_v23 }
  0xbc   : > { %698 = vmatmul.mubr.bf16.gmra.mxu0 %v4602_v24 }
  0xbd   : > { %707 = vmatprep.mubr.bf16.mxu0 %v5155_v0 }
  0xc4   : > { %708 = vmatmul.mubr.bf16.gmra.mxu0 %v4603_v25  ;;  %v5445_v25 = vrot.slane %v1616_v3, %v5389_v41 }
  0xc5   : > { %717 = vmatprep.mubr.bf16.mxu0 %v5155_v0 }
  0xcc   : > { %718 = vmatmul.mubr.bf16.gmra.mxu0 %v4604_v26  ;;  %v5448_v26 = vrot.slane %v1616_v3, %v5395_v43 }
  0xcd   : > { %727 = vmatprep.mubr.bf16.mxu0 %v5155_v0 }
  0xce   : > { %7676 = vst [vmem:[#allocation19_spill] sm:$0xff] %v5448_v26 }
  0xd4   : > { %728 = vmatmul.mubr.bf16.gmra.mxu0 %v4605_v27  ;;  %v5450_v27 = vrot.slane %v1623_v10, %v1620_v4 }
  0xd5   : > { %737 = vmatprep.mubr.bf16.mxu0 %v5155_v0 }
  0xdc   : > { %738 = vmatmul.mubr.bf16.gmra.mxu0 %v4606_v28  ;;  %v5453_v28 = vrot.slane %v1669_v11, %v5389_v41 }
  0xdd   : > { %747 = vmatprep.mubr.bf16.mxu0 %v5155_v0 }
  0xe4   : > { %748 = vmatmul.mubr.bf16.gmra.mxu0 %v4607_v29 }
  0xe5   : > { %757 = vmatprep.mubr.bf16.mxu0 %v5155_v0 }
  0xec   : > { %758 = vmatmul.mubr.bf16.gmra.mxu0 %v4608_v30  ;;  %v5456_v30 = vrot.slane %v1669_v11, %v5395_v43 }
  0xed   : > { %767 = vmatprep.mubr.bf16.mxu0 %v5155_v0 }
  0xf4   : > { %768 = vmatmul.mubr.bf16.gmra.mxu0 %v4609_v31  ;;  %v5458_v31 = vrot.slane %v1669_v11, %v1620_v4 }
  0xf5   : > { %777 = vmatprep.mubr.bf16.mxu0 %v5155_v0 }
  0xfc   : > { %778 = vmatmul.mubr.bf16.gmra.mxu0 %v4610_v32 }
 0x144   : > { %v629_v49 = vpop.f32.mrf.mxu0 }
 0x145   : > { %v5404_v50 = vadd.f32 %v629_v49, %v5398_v45 }
 0x146   : > { %v631_v51 = vpop.f32.mrf.mxu0 }
 0x147   : > { %v852_v53 = vmul.f32 0.70710677, %v5404_v50  ;;  %v5408_v54 = vadd.f32 %v631_v51, %v5401_v47  ;;  %v788_v43 = vmul.f32 0.5, %v5404_v50 }
 0x148   : > { %v633_v55 = vpop.f32.mrf.mxu0 }
 0x149   : > { %4631 = verf.f32 %v852_v53  ;;  %v853_v57 = vmul.f32 0.70710677, %v5408_v54  ;;  %v5412_v58 = vadd.f32 %v633_v55, %v5398_v45  ;;  %v789_v51 = vmul.f32 0.5, %v5408_v54 }
 0x14a   : > { %v635_v60 = vpop.f32.mrf.mxu0  ;;  %v5480_v55 = vrot.slane %v1623_v10, %v2491_v23 }
 0x14b   : > { %4633 = verf.f32 %v853_v57  ;;  %v854_v61 = vmul.f32 0.70710677, %v5412_v58  ;;  %v5416_v62 = vadd.f32 %v635_v60, %v5401_v47  ;;  %v790_v57 = vmul.f32 0.5, %v5412_v58 }
 0x14c   : > { %v639_v0 = vpop.f32.mrf.mxu0 }
 0x14d   : > { %4635 = verf.f32 %v854_v61  ;;  %v855_v1 = vmul.f32 0.70710677, %v5416_v62  ;;  %v5420_v2 = vadd.f32 %v639_v0, %v5398_v45  ;;  %v791_v59 = vmul.f32 0.5, %v5416_v62 }
 0x14e   : > { %v641_v6 = vpop.f32.mrf.mxu0 }
 0x14f   : > { %4637 = verf.f32 %v855_v1  ;;  %v856_v7 = vmul.f32 0.70710677, %v5420_v2  ;;  %v5425_v8 = vadd.f32 %v641_v6, %v5401_v47  ;;  %v792_v3 = vmul.f32 0.5, %v5420_v2 }
 0x150   : > { %v643_v12 = vpop.f32.mrf.mxu0 }
 0x151   : > { %4639 = verf.f32 %v856_v7  ;;  %v644_v15 = vadd.f32 %v643_v12, %v5398_v45  ;;  %v857_v19 = vmul.f32 0.70710677, %v5425_v8  ;;  %v5487_v4 = vmul.f32 0.5, %v5425_v8 }
 0x152   : > { %v645_v20 = vpop.f32.mrf.mxu0 }
 0x153   : > { %v858_v22 = vmul.f32 0.70710677, %v644_v15  ;;  %v646_v24 = vadd.f32 %v645_v20, %v5401_v47  ;;  %v5489_v5 = vmul.f32 0.5, %v644_v15 }
 0x154   : > { %v649_v29 = vpop.f32.mrf.mxu0 }
 0x155   : > { %4641 = verf.f32 %v858_v22  ;;  %v650_v32 = vadd.f32 %v649_v29, %v5398_v45  ;;  %v859_v36 = vmul.f32 0.70710677, %v646_v24  ;;  %v5493_v62 = vmul.f32 0.5, %v646_v24 }
 0x156   : > { %v4632_v33 = vpop.eup %4631  ;;  %4643 = verf.f32 %v857_v19  ;;  %v651_v37 = vpop.f32.mrf.mxu0 }
 0x157   : > { %v980_v40 = vadd.f32 1.0, %v4632_v33  ;;  %v652_v52 = vadd.f32 %v651_v37, %v5401_v47  ;;  %v860_v60 = vmul.f32 0.70710677, %v650_v32  ;;  %4645 = verf.f32 %v859_v36 }
 0x158   : > { %v4634_v49 = vpop.eup %4633  ;;  %v653_v53 = vpop.f32.mrf.mxu0  ;;  %v5495_v7 = vmul.f32 0.5, %v650_v32 }
 0x159   : > { %v981_v56 = vadd.f32 1.0, %v4634_v49  ;;  %v1044_v63 = vmul.f32 %v980_v40, %v788_v43  ;;  %v861_v0 = vmul.f32 0.70710677, %v652_v52  ;;  %v654_v50 = vadd.f32 %v653_v53, %v5398_v45  ;;  %v4625_v40 = vld [vmem:[#allocation9 + $0x48] sm:$0xff]  }
 0x15a   : > { %v4636_v61 = vpop.eup %4635  ;;  %v655_v54 = vpop.f32.mrf.mxu0  ;;  %4647 = verf.f32 %v860_v60  ;;  %v5498_v13 = vmul.f32 0.5, %v652_v52  ;;  %v4626_v52 = vld [vmem:[#allocation9 + $0x8] sm:$0xff]   ;;  %4370 = vmatprep.subr.bf16.mxu1 %v4625_v40 }
 0x15b   : > { %v982_v1 = vadd.f32 1.0, %v4636_v61  ;;  %v5491_v6 = vmul.f32 %v981_v56, %v789_v51  ;;  %v656_v9 = vadd.f32 %v655_v54, %v5401_v47  ;;  %v1113_v8 = vrot.slane %v1044_v63, 7  ;;  %4371 = vmatpush3.bf16.msra.mxu1 %v4626_v52 }
 0x15c   : > { %v4638_v58 = vpop.eup %4637  ;;  %v659_v10 = vpop.f32.mrf.mxu0  ;;  %v1344_v19 = vrot.slane %v1044_v63, 1  ;;  %4649 = verf.f32 %v861_v0  ;;  %v862_v15 = vmul.f32 0.70710677, %v654_v50  ;;  %v5502_v29 = vmul.f32 0.5, %v654_v50 }
 0x15d   : > { %v1046_v11 = vmul.f32 %v982_v1, %v790_v57  ;;  %v983_v12 = vadd.f32 1.0, %v4638_v58  ;;  %v1114_v32 = vrot.slane %v5491_v6, 7  ;;  %v1345_v33 = vrot.slane %v5491_v6, 1 }
 0x15e   : > { %v4640_v2 = vpop.eup %4639  ;;  %v5500_v20 = vpop.f32.mrf.mxu0  ;;  %v863_v37 = vmul.f32 0.70710677, %v656_v9  ;;  %4651 = verf.f32 %v862_v15 }
 0x15f   : > { %v1145_v22 = vrot.slane %v1046_v11, 7  ;;  %v1376_v23 = vrot.slane %v1046_v11, 1  ;;  %v1047_v24 = vmul.f32 %v983_v12, %v791_v59  ;;  %v984_v36 = vadd.f32 1.0, %v4640_v2 }
 0x160   : > { %v5506_v38 = vpop.f32.mrf.mxu0  ;;  %v660_v59 = vadd.f32 %v659_v10, %v5398_v45  ;;  %v1573_v50 = vpack.c.bf16 %v1046_v11, %v1044_v63  ;;  %v5528_v2 = vmul.f32 0.5, %v656_v9  ;;  %4653 = verf.f32 %v863_v37 }
 0x161   : > { %v1178_v48 = vsel %vm1177_vm0, %v1113_v8, %v1145_v22  ;;  %v1210_v49 = vsel %vm1177_vm0, %v1145_v22, %v1113_v8  ;;  %v1409_v43 = vsel %vm1408_vm1, %v1344_v19, %v1376_v23  ;;  %v1441_v51 = vsel %vm1408_vm1, %v1376_v23, %v1344_v19 }
 0x162   : > { %v4642_v53 = vpop.eup %4641  ;;  %v1246_v56 = vsel %vm1111_vm2, %v1210_v49, 0.0  ;;  %v1479_v57 = vsel %vm1343_vm3, %v1441_v51, 0.0  ;;  %v5521_v60 = vpop.f32.mrf.mxu0  ;;  %v1146_v54 = vrot.slane %v1047_v24, 7  ;;  %v1377_v1 = vrot.slane %v1047_v24, 1  ;;  %v4628_v49 = vld [vmem:[#allocation9] sm:$0xff]  }
 0x163   : > { %v4644_v61 = vpop.eup %4643  ;;  %v1310_v0 = vpack.c.bf16 %v1178_v48, %v1246_v56  ;;  %v5523_v58 = vpack.c.bf16 %v1479_v57, %v1409_v43  ;;  %v5526_v12 = vpack.c.bf16 %v1047_v24, %v5491_v6  ;;  %v1048_v15 = vmul.f32 %v984_v36, %v792_v3  ;;  %v4627_v24 = vld [vmem:[#allocation9 + $0x40] sm:$0xff]  }
 0x164   : > { %v5530_v8 = vpop.f32.mrf.mxu0  ;;  %v1179_v19 = vsel %vm1177_vm0, %v1114_v32, %v1146_v54  ;;  %v986_v63 = vadd.f32 1.0, %v4642_v53  ;;  %v1211_v22 = vsel %vm1177_vm0, %v1146_v54, %v1114_v32  ;;  %v1442_v6 = vsel %vm1408_vm1, %v1377_v1, %v1345_v33  ;;  %v4646_v37 = vpop.eup %4645  ;;  %4372 = vmatprep.subr.bf16.mxu1 %v4627_v24 }
 0x165   : > { %7678 = vst [vmem:[#allocation21_spill] sm:$0xff] %v5523_v58  ;;  %v1675_v10 = vmul.bf16 %v5434_v17, %v1310_v0  ;;  %v2120_v11 = vmul.bf16 %v5445_v25, %v1310_v0  ;;  %v985_v9 = vadd.f32 1.0, %v4644_v61  ;;  %v1629_v40 = vmul.bf16 %v5431_v16, %v1573_v50  ;;  %4373 = vmatpush3.bf16.msra.mxu1 %v4628_v49 }
 0x166   : > { %v5540_v23 = vpop.f32.mrf.mxu0  ;;  %v1247_v48 = vsel %vm1111_vm2, %v1211_v22, 0.0  ;;  %v5545_v3 = vmul.f32 0.5, %v660_v59  ;;  %v5547_v36 = vmul.f32 0.70710677, %v660_v59  ;;  %v2082_v32 = vmul.bf16 %v5437_v18, %v1573_v50 }
 0x167   : > { %v2188_v43 = vmul.bf16 %v5448_v26, %v5523_v58  ;;  %v1311_v51 = vpack.c.bf16 %v1179_v19, %v1247_v48  ;;  %v1410_v52 = vsel %vm1408_vm1, %v1345_v33, %v1377_v1  ;;  %v5556_v56 = vadd.bf16 %v1675_v10, %v1629_v40  ;;  %v4648_v0 = vpop.eup %4647 }
 0x168   : > { %v5554_v53 = vpop.f32.mrf.mxu0  ;;  %v1480_v57 = vsel %vm1343_vm3, %v1442_v6, 0.0  ;;  %v1630_v59 = vmul.bf16 %v5450_v27, %v5526_v12  ;;  %v1050_v61 = vmul.f32 %v986_v63, %v5489_v5  ;;  %v2150_v50 = vadd.bf16 %v2120_v11, %v2082_v32 }
 0x169   : > { %7679 = vst [vmem:[#allocation22_spill] sm:$0xff] %v5556_v56  ;;  %v1115_v54 = vrot.slane %v1048_v15, 7  ;;  %v1049_v19 = vmul.f32 %v985_v9, %v5487_v4  ;;  %v987_v33 = vadd.f32 1.0, %v4646_v37  ;;  %v4650_v22 = vpop.eup %4649  ;;  %v2121_v10 = vmul.bf16 %v5464_v34, %v1311_v51 }
 0x16a   : > { %v5564_v1 = vpop.f32.mrf.mxu0  ;;  %v1346_v24 = vrot.slane %v1048_v15, 1  ;;  %v1147_v40 = vrot.slane %v1050_v61, 7  ;;  %v1378_v6 = vrot.slane %v1050_v61, 1  ;;  %v5567_v48 = vpack.c.bf16 %v1480_v57, %v1410_v52 }
 0x16b   : > { %7680 = vst [vmem:[#allocation23_spill] sm:$0xff] %v5564_v1  ;;  %v2083_v5 = vmul.bf16 %v5453_v28, %v5526_v12  ;;  %v5571_v63 = vpack.c.bf16 %v1050_v61, %v1048_v15  ;;  %v1051_v11 = vmul.f32 %v987_v33, %v5493_v62  ;;  %v1676_v12 = vmul.bf16 %v5456_v30, %v1311_v51  ;;  %v4652_v57 = vpop.eup %4651 }
 0x16c   : > { %7681 = vst [vmem:[#allocation24_spill] sm:$0xff] %v5567_v48  ;;  %v5574_v49 = vpop.f32.mrf.mxu0  ;;  %v1180_v4 = vsel %vm1177_vm0, %v1115_v54, %v1147_v40  ;;  %v1212_v9 = vsel %vm1177_vm0, %v1147_v40, %v1115_v54  ;;  %v1411_v37 = vsel %vm1408_vm1, %v1346_v24, %v1378_v6  ;;  %v1443_v32 = vsel %vm1408_vm1, %v1378_v6, %v1346_v24 }
 0x16d   : > { %7682 = vst [vmem:[#allocation25_spill] sm:$0xff] %v5571_v63  ;;  %7683 = vst [vmem:[#allocation26_spill] sm:$0xff] %v5574_v49  ;;  %v1116_v15 = vrot.slane %v1049_v19, 7  ;;  %v1250_v62 = vsel %vm1111_vm2, %v1212_v9, 0.0  ;;  %v1483_v52 = vsel %vm1343_vm3, %v1443_v32, 0.0  ;;  %v2151_v61 = vadd.bf16 %v2121_v10, %v2083_v5  ;;  %v4654_v56 = vpop.eup %4653 }
 0x16e   : > { %v1347_v33 = vrot.slane %v1049_v19, 1  ;;  %v5589_v41 = vpack.c.bf16 %v1180_v4, %v1250_v62  ;;  %v1631_v54 = vmul.bf16 %v5431_v16, %v5571_v63  ;;  %v5593_v40 = vpop.f32.mrf.mxu0  ;;  %v5595_v24 = vpack.c.bf16 %v1483_v52, %v1411_v37 }
 0x16f   : > { %7685 = vst [vmem:[#allocation28_spill] sm:$0xff] %v5593_v40  ;;  %v2084_v51 = vmul.bf16 %v5437_v18, %v5571_v63  ;;  %v1148_v6 = vrot.slane %v1051_v11, 7  ;;  %v1379_v9 = vrot.slane %v1051_v11, 1  ;;  %v5603_v5 = vpack.c.bf16 %v1051_v11, %v1049_v19 }
 0x170   : > { %7684 = vst [vmem:[#allocation27_spill] sm:$0xff] %v5589_v41  ;;  %7686 = vst [vmem:[#allocation29_spill] sm:$0xff] %v5595_v24  ;;  %v1677_v32 = vmul.bf16 %v5434_v17, %v5589_v41  ;;  %v2122_v10 = vmul.bf16 %v5445_v25, %v5589_v41  ;;  %v988_v4 = vadd.f32 1.0, %v4648_v0  ;;  %v5613_v40 = vadd.bf16 %v2188_v43, %v2150_v50  ;;  %v5621_v11 = vpop.f32.mrf.mxu0 }
 0x171   : > { %7687 = vst [vmem:[#allocation30_spill] sm:$0xff] %v5603_v5  ;;  %v1181_v62 = vsel %vm1177_vm0, %v1116_v15, %v1148_v6  ;;  %v1213_v37 = vsel %vm1177_vm0, %v1148_v6, %v1116_v15  ;;  %v1412_v52 = vsel %vm1408_vm1, %v1347_v33, %v1379_v9  ;;  %v1444_v58 = vsel %vm1408_vm1, %v1379_v9, %v1347_v33 }
 0x172   : > { %7688 = vst [vmem:[#allocation31_spill] sm:$0xff] %v5613_v40  ;;  %v2189_v41 = vmul.bf16 %v5467_v35, %v5567_v48  ;;  %v1251_v0 = vsel %vm1111_vm2, %v1213_v37, 0.0  ;;  %v1484_v19 = vsel %vm1343_vm3, %v1444_v58, 0.0  ;;  %v5623_v15 = vadd.bf16 %v1676_v12, %v1630_v59 }
 0x173   : > { %v1709_v6 = vadd.bf16 %v1677_v32, %v1631_v54  ;;  %v2152_v49 = vadd.bf16 %v2122_v10, %v2084_v51  ;;  %v5625_v1 = vpack.c.bf16 %v1181_v62, %v1251_v0  ;;  %v1749_v43 = vmul.bf16 %v5440_v21, %v5595_v24  ;;  %v5646_v10 = vpop.f32.mrf.mxu0 }
 0x174   : > { %7689 = vst [vmem:[#allocation32_spill] sm:$0xff] %v5623_v15  ;;  %v5627_v33 = vadd.bf16 %v2189_v41, %v2151_v61  ;;  %v5633_v9 = vpack.c.bf16 %v1484_v19, %v1412_v52  ;;  %v2190_v58 = vmul.bf16 %v5448_v26, %v5595_v24  ;;  %v1632_v59 = vmul.bf16 %v5450_v27, %v5603_v5 }
 0x175   : > { %7690 = vst [vmem:[#allocation33_spill] sm:$0xff] %v5625_v1  ;;  %v2085_v12 = vmul.bf16 %v5453_v28, %v5603_v5  ;;  %v1052_v41 = vmul.f32 %v988_v4, %v5495_v7  ;;  %v1678_v61 = vmul.bf16 %v5456_v30, %v5625_v1  ;;  %v2123_v54 = vmul.bf16 %v5464_v34, %v5625_v1  ;;  %v5662_v50 = vpop.f32.mrf.mxu0 }
 0x176   : > { %7691 = vst [vmem:[#allocation34_spill] sm:$0xff] %v5627_v33  ;;  %7692 = vst [vmem:[#allocation35_spill] sm:$0xff] %v5633_v9  ;;  %v989_v51 = vadd.f32 1.0, %v4650_v22  ;;  %v990_v32 = vadd.f32 1.0, %v4652_v57  ;;  %v5648_v62 = vadd.bf16 %v1749_v43, %v1709_v6  ;;  %v5650_v37 = vadd.bf16 %v2190_v58, %v2152_v49 }
 0x177   : > { %v991_v52 = vadd.f32 1.0, %v4654_v56  ;;  %4655 = verf.f32 %v5547_v36  ;;  %v1750_v7 = vmul.bf16 %v5458_v31, %v5633_v9  ;;  %v2191_v57 = vmul.bf16 %v5467_v35, %v5633_v9 }
 0x178   : > { %7693 = vst [vmem:[#allocation36_spill] sm:$0xff] %v5648_v62  ;;  %7694 = vst [vmem:[#allocation37_spill] sm:$0xff] %v5650_v37  ;;  %v1053_v0 = vmul.f32 %v989_v51, %v5498_v13  ;;  %v1054_v22 = vmul.f32 %v990_v32, %v5502_v29  ;;  %v1117_v19 = vrot.slane %v1052_v41, 7  ;;  %v1348_v6 = vrot.slane %v1052_v41, 1 }
 0x179   : > { %v1055_v49 = vmul.f32 %v991_v52, %v5528_v2  ;;  %v1710_v56 = vadd.bf16 %v1678_v61, %v1632_v59  ;;  %v2153_v43 = vadd.bf16 %v2123_v54, %v2085_v12  ;;  %v662_v13 = vadd.f32 %v5500_v20, %v5401_v47 }
 0x17a   : > { %v1149_v36 = vrot.slane %v1054_v22, 7  ;;  %v1380_v58 = vrot.slane %v1054_v22, 1  ;;  %v1577_v37 = vpack.c.bf16 %v1054_v22, %v1052_v41  ;;  %v1118_v29 = vrot.slane %v1053_v0, 7 }
 0x17b   : > { %v1150_v40 = vrot.slane %v1055_v49, 7  ;;  %v1381_v4 = vrot.slane %v1055_v49, 1  ;;  %v1349_v59 = vrot.slane %v1053_v0, 1  ;;  %v5678_v61 = vadd.bf16 %v1750_v7, %v1710_v56 }
 0x17c   : > { %v1182_v51 = vsel %vm1177_vm0, %v1117_v19, %v1149_v36  ;;  %v1214_v32 = vsel %vm1177_vm0, %v1149_v36, %v1117_v19  ;;  %v1445_v2 = vsel %vm1408_vm1, %v1380_v58, %v1348_v6  ;;  %v1413_v41 = vsel %vm1408_vm1, %v1348_v6, %v1380_v58  ;;  %v5682_v19 = vpop.f32.mrf.mxu0 }
 0x17d   : > { %v1254_v12 = vsel %vm1111_vm2, %v1214_v32, 0.0  ;;  %v1487_v20 = vsel %vm1343_vm3, %v1445_v2, 0.0  ;;  %7695 = vst [vmem:[#allocation38_spill] sm:$0xff] %v5678_v61  ;;  %v1578_v52 = vpack.c.bf16 %v1055_v49, %v1053_v0  ;;  %v664_v22 = vadd.f32 %v5506_v38, %v5398_v45 }
 0x17e   : > { %v1314_v54 = vpack.c.bf16 %v1182_v51, %v1254_v12  ;;  %v1633_v36 = vmul.bf16 %v5431_v16, %v1577_v37  ;;  %v1183_v32 = vsel %vm1177_vm0, %v1118_v29, %v1150_v40  ;;  %v1215_v6 = vsel %vm1177_vm0, %v1150_v40, %v1118_v29  ;;  %v5708_v33 = vpop.f32.mrf.mxu0 }
 0x17f   : > { %v1446_v58 = vsel %vm1408_vm1, %v1381_v4, %v1349_v59  ;;  %v5691_v7 = vpack.c.bf16 %v1487_v20, %v1413_v41  ;;  %v1414_v38 = vsel %vm1408_vm1, %v1349_v59, %v1381_v4  ;;  %v2086_v56 = vmul.bf16 %v5437_v18, %v1577_v37 }
 0x180   : > { %v1679_v0 = vmul.bf16 %v5434_v17, %v1314_v54  ;;  %v2124_v49 = vmul.bf16 %v5445_v25, %v1314_v54  ;;  %v2537_v51 = vmul.bf16 %v5475_v46, %v1314_v54  ;;  %v1255_v2 = vsel %vm1111_vm2, %v1215_v6, 0.0 }
 0x181   : > { %7696 = vst [vmem:[#allocation39_spill] sm:$0xff] %v5691_v7  ;;  %v1488_v40 = vsel %vm1343_vm3, %v1446_v58, 0.0  ;;  %v5703_v29 = vadd.bf16 %v2191_v57, %v2153_v43  ;;  %v2499_v12 = vmul.bf16 %v5471_v42, %v1577_v37  ;;  %v1315_v41 = vpack.c.bf16 %v1183_v32, %v1255_v2 }
 0x182   : > { %v666_v20 = vadd.f32 %v5521_v60, %v5401_v47  ;;  %v1711_v4 = vadd.bf16 %v1679_v0, %v1633_v36  ;;  %v2154_v59 = vadd.bf16 %v2124_v49, %v2086_v56  ;;  %v5710_v61 = vpack.c.bf16 %v1488_v40, %v1414_v38  ;;  %v695_v56 = vpop.f32.mrf.mxu0 }
 0x183   : > { %7697 = vst [vmem:[#allocation40_spill] sm:$0xff] %v5703_v29  ;;  %v865_v54 = vmul.f32 0.70710677, %v662_v13  ;;  %v1751_v6 = vmul.bf16 %v5440_v21, %v5691_v7  ;;  %v2192_v57 = vmul.bf16 %v5448_v26, %v5691_v7  ;;  %v1634_v37 = vmul.bf16 %v5450_v27, %v1578_v52 }
 0x184   : > { %7698 = vst [vmem:[#allocation41_spill] sm:$0xff] %v5710_v61  ;;  %v4656_v62 = vpop.eup %4655  ;;  %v1680_v43 = vmul.bf16 %v5456_v30, %v1315_v41  ;;  %v5718_v32 = vadd.bf16 %v2537_v51, %v2499_v12  ;;  %v2087_v60 = vmul.bf16 %v5453_v28, %v1578_v52  ;;  %v2125_v36 = vmul.bf16 %v5464_v34, %v1315_v41 }
 0x185   : > { %v992_v58 = vadd.f32 1.0, %v4656_v62  ;;  %v2500_v0 = vmul.bf16 %v5473_v44, %v1578_v52  ;;  %v5723_v49 = vmul.f32 0.5, %v662_v13  ;;  %4657 = verf.f32 %v865_v54 }
 0x186   : > { %7699 = vst [vmem:[#allocation42_spill] sm:$0xff] %v5718_v32  ;;  %v866_v38 = vmul.f32 0.70710677, %v664_v22  ;;  %v5725_v2 = vadd.bf16 %v1751_v6, %v1711_v4  ;;  %v5727_v40 = vadd.bf16 %v2192_v57, %v2154_v59  ;;  %v1752_v51 = vmul.bf16 %v5458_v31, %v5710_v61  ;;  %v699_v57 = vpop.f32.mrf.mxu0 }
 0x187   : > { %v2538_v12 = vmul.bf16 %v5480_v55, %v1315_v41  ;;  %v1712_v29 = vadd.bf16 %v1680_v43, %v1634_v37  ;;  %v867_v32 = vmul.f32 0.70710677, %v666_v20  ;;  %v670_v62 = vadd.f32 %v5530_v8, %v5398_v45  ;;  %v7703_v43 = vld [vmem:[#allocation23_spill] sm:$0xff] }
 0x188   : > { %7700 = vst [vmem:[#allocation43_spill] sm:$0xff] %v5725_v2  ;;  %7701 = vst [vmem:[#allocation44_spill] sm:$0xff] %v5727_v40  ;;  %4659 = verf.f32 %v866_v38  ;;  %v2155_v13 = vadd.bf16 %v2125_v36, %v2087_v60  ;;  %v2193_v52 = vmul.bf16 %v5467_v35, %v5710_v61  ;;  %v5737_v4 = vmul.f32 %v992_v58, %v5545_v3  ;;  %v7704_v3 = vld [vmem:[#allocation26_spill] sm:$0xff] }
 0x189   : > { %v672_v59 = vadd.f32 %v5540_v23, %v5401_v47  ;;  %v5741_v54 = vmul.f32 0.5, %v664_v22  ;;  %4661 = verf.f32 %v867_v32  ;;  %v868_v41 = vmul.f32 0.70710677, %v670_v62  ;;  %v7706_v32 = vld [vmem:[#allocation28_spill] sm:$0xff] }
 0x18a   : > { %v674_v6 = vadd.f32 %v5554_v53, %v5398_v45  ;;  %v5745_v37 = vadd.bf16 %v2538_v12, %v2500_v0  ;;  %v676_v60 = vadd.f32 %v7703_v43, %v5401_v47  ;;  %v680_v36 = vadd.f32 %v7704_v3, %v5398_v45 }
 0x18b   : > { %v869_v8 = vmul.f32 0.70710677, %v672_v59  ;;  %v5751_v58 = vadd.bf16 %v1752_v51, %v1712_v29  ;;  %v5753_v23 = vmul.f32 0.5, %v666_v20  ;;  %v682_v38 = vadd.f32 %v7706_v32, %v5401_v47  ;;  %v701_v29 = vpop.f32.mrf.mxu0 }
 0x18c   : > { %7702 = vst [vmem:[#allocation45_spill] sm:$0xff] %v5745_v37  ;;  %v870_v22 = vmul.f32 0.70710677, %v674_v6  ;;  %v5757_v40 = vadd.bf16 %v2193_v52, %v2155_v13  ;;  %4663 = verf.f32 %v868_v41  ;;  %v871_v0 = vmul.f32 0.70710677, %v676_v60 }
 0x18d   : > { %7705 = vst [vmem:[#allocation23_spill] sm:$0xff] %v5751_v58  ;;  %v5761_v43 = vmul.f32 0.5, %v670_v62  ;;  %4665 = verf.f32 %v869_v8  ;;  %v872_v3 = vmul.f32 0.70710677, %v680_v36  ;;  %v873_v51 = vmul.f32 0.70710677, %v682_v38 }
 0x18e   : > { %7707 = vst [vmem:[#allocation26_spill] sm:$0xff] %v5757_v40  ;;  %v684_v20 = vadd.f32 %v5621_v11, %v5398_v45  ;;  %v686_v32 = vadd.f32 %v5646_v10, %v5401_v47  ;;  %v690_v13 = vadd.f32 %v5662_v50, %v5398_v45  ;;  %v5769_v52 = vmul.f32 0.5, %v672_v59  ;;  %v703_v59 = vpop.f32.mrf.mxu0 }
 0x18f   : > { %v5771_v41 = vmul.f32 0.5, %v674_v6  ;;  %4667 = verf.f32 %v870_v22  ;;  %v692_v62 = vadd.f32 %v5682_v19, %v5401_v47  ;;  %v5775_v8 = vmul.f32 0.5, %v676_v60 }
 0x190   : > { %4669 = verf.f32 %v871_v0  ;;  %v874_v12 = vmul.f32 0.70710677, %v684_v20  ;;  %v694_v11 = vadd.f32 %v5708_v33, %v5398_v45  ;;  %v5779_v53 = vmul.f32 0.5, %v680_v36 }
 0x191   : > { %4671 = verf.f32 %v872_v3  ;;  %v5781_v10 = vmul.f32 0.5, %v682_v38  ;;  %v875_v50 = vmul.f32 0.70710677, %v686_v32  ;;  %v5783_v22 = vmul.f32 0.5, %v684_v20 }
 0x192   : > { %v4658_v6 = vpop.eup %4657  ;;  %4673 = verf.f32 %v873_v51  ;;  %v876_v40 = vmul.f32 0.70710677, %v690_v13  ;;  %v696_v19 = vadd.f32 %v695_v56, %v5401_v47  ;;  %v5786_v0 = vmul.f32 0.5, %v686_v32  ;;  %v705_v56 = vpop.f32.mrf.mxu0 }
 0x193   : > { %v993_v60 = vadd.f32 1.0, %v4658_v6  ;;  %v5788_v58 = vmul.f32 0.5, %v690_v13  ;;  %v877_v33 = vmul.f32 0.70710677, %v692_v62  ;;  %4675 = verf.f32 %v874_v12 }
 0x194   : > { %v5790_v3 = vmul.f32 0.5, %v692_v62  ;;  %v878_v38 = vmul.f32 0.70710677, %v694_v11  ;;  %v700_v2 = vadd.f32 %v699_v57, %v5398_v45  ;;  %4677 = verf.f32 %v875_v50 }
 0x195   : > { %v4660_v36 = vpop.eup %4659  ;;  %v5793_v51 = vmul.f32 0.5, %v694_v11  ;;  %v702_v20 = vadd.f32 %v701_v29, %v5401_v47  ;;  %v1057_v32 = vmul.f32 %v993_v60, %v5723_v49  ;;  %4679 = verf.f32 %v876_v40 }
 0x196   : > { %v994_v37 = vadd.f32 1.0, %v4660_v36  ;;  %v4662_v6 = vpop.eup %4661  ;;  %v5797_v13 = vmul.f32 0.5, %v696_v19  ;;  %v879_v61 = vmul.f32 0.70710677, %v696_v19  ;;  %4681 = verf.f32 %v877_v33 }
 0x197   : > { %v995_v62 = vadd.f32 1.0, %v4662_v6  ;;  %v704_v57 = vadd.f32 %v703_v59, %v5398_v45  ;;  %4683 = verf.f32 %v878_v38  ;;  %v5801_v50 = vmul.f32 0.5, %v700_v2 }
 0x198   : > { %7708 = vst [vmem:[#allocation28_spill] sm:$0xff] %v5797_v13  ;;  %v1058_v12 = vmul.f32 %v994_v37, %v5741_v54  ;;  %v880_v11 = vmul.f32 0.70710677, %v700_v2  ;;  %v5804_v29 = vadd.f32 %v705_v56, %v5401_v47  ;;  %v5807_v60 = vmul.f32 0.5, %v702_v20 }
 0x199   : > { %7709 = vst [vmem:[#allocation46_spill] sm:$0xff] %v5801_v50  ;;  %v4664_v36 = vpop.eup %4663  ;;  %v1059_v40 = vmul.f32 %v995_v62, %v5753_v23  ;;  %v1120_v54 = vrot.slane %v1057_v32, 7  ;;  %v1351_v37 = vrot.slane %v1057_v32, 1  ;;  %4685 = verf.f32 %v879_v61 }
 0x19a   : > { %7710 = vst [vmem:[#allocation47_spill] sm:$0xff] %v5804_v29  ;;  %v1151_v7 = vrot.slane %v1058_v12, 7  ;;  %v1382_v49 = vrot.slane %v1058_v12, 1  ;;  %7711 = vst [vmem:[#allocation48_spill] sm:$0xff] %v5807_v60  ;;  %v4666_v19 = vpop.eup %4665  ;;  %v5809_v33 = vmul.f32 0.70710677, %v702_v20  ;;  %v1579_v62 = vpack.c.bf16 %v1058_v12, %v5737_v4 }
 0x19b   : > { %v7712_v59 = vrot.slane %v5737_v4, 7  ;;  %v7714_v23 = vrot.slane %v5737_v4, 1  ;;  %v1152_v63 = vrot.slane %v1059_v40, 7  ;;  %v5834_v1 = vmul.f32 0.70710677, %v704_v57 }
 0x19c   : > { %v4668_v61 = vpop.eup %4667  ;;  %v1383_v15 = vrot.slane %v1059_v40, 1  ;;  %v997_v48 = vadd.f32 1.0, %v4666_v19  ;;  %4687 = verf.f32 %v880_v11  ;;  %v5837_v4 = vmul.f32 0.5, %v5804_v29 }
 0x19d   : > { %v1184_v2 = vsel %vm1177_vm0, %v7712_v59, %v1151_v7  ;;  %v7713_v38 = vmov %v7712_v59  ;;  %v1447_v6 = vsel %vm1408_vm1, %v1382_v49, %v7714_v23  ;;  %v7715_v9 = vmov %v7714_v23  ;;  %7717 = vst [vmem:[#allocation50_spill] sm:$0xff] %v5834_v1 }
 0x19e   : > { %v1216_v56 = vsel %vm1177_vm0, %v1151_v7, %v7713_v38  ;;  %v1415_v59 = vsel %vm1408_vm1, %v7715_v9, %v1382_v49  ;;  %v1491_v24 = vsel %vm1343_vm3, %v1447_v6, 0.0  ;;  %v5832_v7 = vmul.f32 0.5, %v704_v57  ;;  %v4670_v38 = vpop.eup %4669  ;;  %7718 = vst [vmem:[#allocation51_spill] sm:$0xff] %v5837_v4 }
 0x19f   : > { %v1258_v20 = vsel %vm1111_vm2, %v1216_v56, 0.0  ;;  %v996_v23 = vadd.f32 1.0, %v4664_v36  ;;  %v4672_v12 = vpop.eup %4671  ;;  %v5839_v9 = vpack.c.bf16 %v1491_v24, %v1415_v59  ;;  %v1635_v49 = vmul.bf16 %v5431_v16, %v1579_v62 }
 0x1a0   : > { %7716 = vst [vmem:[#allocation49_spill] sm:$0xff] %v5832_v7  ;;  %v1316_v5 = vpack.c.bf16 %v1184_v2, %v1258_v20  ;;  %v4674_v56 = vpop.eup %4673  ;;  %v2088_v36 = vmul.bf16 %v5437_v18, %v1579_v62  ;;  %v1185_v57 = vsel %vm1177_vm0, %v1120_v54, %v1152_v63  ;;  %v1217_v11 = vsel %vm1177_vm0, %v1152_v63, %v1120_v54 }
 0x1a1   : > { %7719 = vst [vmem:[#allocation52_spill] sm:$0xff] %v5839_v9  ;;  %v1580_v19 = vpack.c.bf16 %v1059_v40, %v1057_v32  ;;  %v4676_v20 = vpop.eup %4675  ;;  %v1259_v24 = vsel %vm1111_vm2, %v1217_v11, 0.0  ;;  %v1416_v59 = vsel %vm1408_vm1, %v1351_v37, %v1383_v15  ;;  %v1448_v60 = vsel %vm1408_vm1, %v1383_v15, %v1351_v37 }
 0x1a2   : > { %v1681_v6 = vmul.bf16 %v5434_v17, %v1316_v5  ;;  %v2126_v2 = vmul.bf16 %v5445_v25, %v1316_v5  ;;  %v2539_v4 = vmul.bf16 %v5475_v46, %v1316_v5  ;;  %v4678_v7 = vpop.eup %4677  ;;  %v1317_v29 = vpack.c.bf16 %v1185_v57, %v1259_v24 }
 0x1a3   : > { %v1492_v63 = vsel %vm1343_vm3, %v1448_v60, 0.0  ;;  %v4680_v32 = vpop.eup %4679  ;;  %v1753_v5 = vmul.bf16 %v5440_v21, %v5839_v9  ;;  %v2194_v40 = vmul.bf16 %v5448_v26, %v5839_v9  ;;  %v2501_v54 = vmul.bf16 %v5471_v42, %v1579_v62 }
 0x1a4   : > { %v1713_v47 = vadd.bf16 %v1681_v6, %v1635_v49  ;;  %v2156_v45 = vadd.bf16 %v2126_v2, %v2088_v36  ;;  %v1060_v11 = vmul.f32 %v996_v23, %v5761_v43  ;;  %v4682_v50 = vpop.eup %4681  ;;  %v5864_v15 = vpack.c.bf16 %v1492_v63, %v1416_v59 }
 0x1a5   : > { %v1636_v37 = vmul.bf16 %v5450_v27, %v1580_v19  ;;  %v1682_v49 = vmul.bf16 %v5456_v30, %v1317_v29  ;;  %v2127_v60 = vmul.bf16 %v5464_v34, %v1317_v29  ;;  %v5869_v6 = vpop.eup %4683  ;;  %v5871_v2 = vadd.bf16 %v2539_v4, %v2501_v54 }
 0x1a6   : > { %7720 = vst [vmem:[#allocation53_spill] sm:$0xff] %v5864_v15  ;;  %v2089_v36 = vmul.bf16 %v5453_v28, %v1580_v19  ;;  %v2540_v57 = vmul.bf16 %v5480_v55, %v1317_v29  ;;  %v1061_v62 = vmul.f32 %v997_v48, %v5769_v52  ;;  %v5876_v43 = vadd.bf16 %v1753_v5, %v1713_v47  ;;  %v5881_v63 = vpop.eup %4685 }
 0x1a7   : > { %7721 = vst [vmem:[#allocation54_spill] sm:$0xff] %v5871_v2  ;;  %v5878_v23 = vadd.bf16 %v2194_v40, %v2156_v45  ;;  %v1714_v24 = vadd.bf16 %v1682_v49, %v1636_v37  ;;  %v2502_v59 = vmul.bf16 %v5473_v44, %v1580_v19  ;;  %v998_v1 = vadd.f32 1.0, %v4668_v61 }
 0x1a8   : > { %7722 = vst [vmem:[#allocation55_spill] sm:$0xff] %v5876_v43  ;;  %v2157_v9 = vadd.bf16 %v2127_v60, %v2089_v36  ;;  %v999_v13 = vadd.f32 1.0, %v4670_v38  ;;  %v1000_v4 = vadd.f32 1.0, %v4672_v12  ;;  %v1754_v54 = vmul.bf16 %v5458_v31, %v5864_v15 }
 0x1a9   : > { %7723 = vst [vmem:[#allocation56_spill] sm:$0xff] %v5878_v23  ;;  %v2195_v29 = vmul.bf16 %v5467_v35, %v5864_v15  ;;  %v1121_v48 = vrot.slane %v1060_v11, 7  ;;  %v1352_v47 = vrot.slane %v1060_v11, 1  ;;  %v5887_v52 = vadd.bf16 %v2540_v57, %v2502_v59  ;;  %v5893_v37 = vpop.eup %4687 }
 0x1aa   : > { %v1122_v45 = vrot.slane %v1061_v62, 7  ;;  %v1062_v5 = vmul.f32 %v998_v1, %v5771_v41  ;;  %v1063_v19 = vmul.f32 %v999_v13, %v5775_v8  ;;  %v5891_v40 = vadd.bf16 %v1754_v54, %v1714_v24 }
 0x1ab   : > { %7724 = vst [vmem:[#allocation57_spill] sm:$0xff] %v5887_v52  ;;  %v1353_v61 = vrot.slane %v1061_v62, 1  ;;  %v1001_v38 = vadd.f32 1.0, %v4674_v56  ;;  %v1002_v12 = vadd.f32 1.0, %v4676_v20  ;;  %v5895_v49 = vadd.bf16 %v2195_v29, %v2157_v9 }
 0x1ac   : > { %7725 = vst [vmem:[#allocation58_spill] sm:$0xff] %v5891_v40  ;;  %v1153_v60 = vrot.slane %v1062_v5, 7  ;;  %v1384_v36 = vrot.slane %v1062_v5, 1  ;;  %v1064_v23 = vmul.f32 %v1000_v4, %v5779_v53  ;;  %v1581_v57 = vpack.c.bf16 %v1062_v5, %v1060_v11 }
 0x1ad   : > { %7726 = vst [vmem:[#allocation59_spill] sm:$0xff] %v5895_v49  ;;  %v1154_v59 = vrot.slane %v1063_v19, 7  ;;  %v1385_v43 = vrot.slane %v1063_v19, 1  ;;  %v1003_v52 = vadd.f32 1.0, %v4678_v7  ;;  %v5911_v7 = vmul.f32 %v1001_v38, %v5781_v10 }
 0x1ae   : > { %v1186_v1 = vsel %vm1177_vm0, %v1121_v48, %v1153_v60  ;;  %v1218_v41 = vsel %vm1177_vm0, %v1153_v60, %v1121_v48  ;;  %v1417_v8 = vsel %vm1408_vm1, %v1352_v47, %v1384_v36  ;;  %v1449_v13 = vsel %vm1408_vm1, %v1384_v36, %v1352_v47 }
 0x1af   : > { %v1262_v56 = vsel %vm1111_vm2, %v1218_v41, 0.0  ;;  %v1495_v53 = vsel %vm1343_vm3, %v1449_v13, 0.0  ;;  %v1066_v9 = vmul.f32 %v1002_v12, %v5783_v22  ;;  %v1582_v11 = vpack.c.bf16 %v1063_v19, %v1061_v62 }
 0x1b0   : > { %v1318_v20 = vpack.c.bf16 %v1186_v1, %v1262_v56  ;;  %v5914_v24 = vadd.f32 1.0, %v4680_v32  ;;  %v5916_v4 = vadd.f32 1.0, %v4682_v50  ;;  %v5918_v54 = vpack.c.bf16 %v1495_v53, %v1417_v8 }
 0x1b1   : > { %v1187_v29 = vsel %vm1177_vm0, %v1122_v45, %v1154_v59  ;;  %v1219_v48 = vsel %vm1177_vm0, %v1154_v59, %v1122_v45  ;;  %v1450_v10 = vsel %vm1408_vm1, %v1385_v43, %v1353_v61  ;;  %v1637_v47 = vmul.bf16 %v5431_v16, %v1581_v57 }
 0x1b2   : > { %7727 = vst [vmem:[#allocation60_spill] sm:$0xff] %v5918_v54  ;;  %v1683_v22 = vmul.bf16 %v5434_v17, %v1318_v20  ;;  %v2128_v32 = vmul.bf16 %v5445_v25, %v1318_v20  ;;  %v1123_v62 = vrot.slane %v1064_v23, 7  ;;  %v2541_v50 = vmul.bf16 %v5475_v46, %v1318_v20 }
 0x1b3   : > { %v1263_v5 = vsel %vm1111_vm2, %v1219_v48, 0.0  ;;  %v1418_v19 = vsel %vm1408_vm1, %v1353_v61, %v1385_v43  ;;  %v1496_v45 = vsel %vm1343_vm3, %v1450_v10, 0.0  ;;  %v2090_v38 = vmul.bf16 %v5437_v18, %v1581_v57 }
 0x1b4   : > { %v2503_v12 = vmul.bf16 %v5471_v42, %v1581_v57  ;;  %v1319_v60 = vpack.c.bf16 %v1187_v29, %v1263_v5  ;;  %v1354_v36 = vrot.slane %v1064_v23, 1  ;;  %v1715_v59 = vadd.bf16 %v1683_v22, %v1637_v47 }
 0x1b5   : > { %v1755_v1 = vmul.bf16 %v5440_v21, %v5918_v54  ;;  %v2196_v41 = vmul.bf16 %v5448_v26, %v5918_v54  ;;  %v1638_v8 = vmul.bf16 %v5450_v27, %v1582_v11  ;;  %v2158_v13 = vadd.bf16 %v2128_v32, %v2090_v38 }
 0x1b6   : > { %v5943_v43 = vadd.bf16 %v2541_v50, %v2503_v12  ;;  %v5945_v61 = vpack.c.bf16 %v1496_v45, %v1418_v19  ;;  %v2091_v56 = vmul.bf16 %v5453_v28, %v1582_v11  ;;  %v2504_v57 = vmul.bf16 %v5473_v44, %v1582_v11 }
 0x1b7   : > { %v1124_v53 = vrot.slane %v5911_v7, 7  ;;  %v1355_v20 = vrot.slane %v5911_v7, 1  ;;  %v1155_v29 = vrot.slane %v1066_v9, 7  ;;  %v1684_v48 = vmul.bf16 %v5456_v30, %v1319_v60 }
 0x1b8   : > { %7728 = vst [vmem:[#allocation61_spill] sm:$0xff] %v5943_v43  ;;  %7729 = vst [vmem:[#allocation62_spill] sm:$0xff] %v5945_v61  ;;  %v2129_v10 = vmul.bf16 %v5464_v34, %v1319_v60  ;;  %v1386_v47 = vrot.slane %v1066_v9, 1  ;;  %v1067_v22 = vmul.f32 %v1003_v52, %v5786_v0  ;;  %v5954_v32 = vadd.bf16 %v1755_v1, %v1715_v59 }
 0x1b9   : > { %v1188_v50 = vsel %vm1177_vm0, %v1123_v62, %v1155_v29  ;;  %v1220_v11 = vsel %vm1177_vm0, %v1155_v29, %v1123_v62  ;;  %v1583_v5 = vpack.c.bf16 %v1066_v9, %v1064_v23  ;;  %v5960_v19 = vadd.bf16 %v2196_v41, %v2158_v13 }
 0x1ba   : > { %7730 = vst [vmem:[#allocation63_spill] sm:$0xff] %v5954_v32  ;;  %v2542_v45 = vmul.bf16 %v5480_v55, %v1319_v60  ;;  %v1266_v38 = vsel %vm1111_vm2, %v1220_v11, 0.0  ;;  %v1451_v12 = vsel %vm1408_vm1, %v1386_v47, %v1354_v36  ;;  %v1756_v0 = vmul.bf16 %v5458_v31, %v5945_v61 }
 0x1bb   : > { %7731 = vst [vmem:[#allocation64_spill] sm:$0xff] %v5960_v19  ;;  %v1320_v52 = vpack.c.bf16 %v1188_v50, %v1266_v38  ;;  %v1419_v59 = vsel %vm1408_vm1, %v1354_v36, %v1386_v47  ;;  %v1499_v23 = vsel %vm1343_vm3, %v1451_v12, 0.0  ;;  %v1716_v9 = vadd.bf16 %v1684_v48, %v1638_v8 }
 0x1bc   : > { %v2159_v62 = vadd.bf16 %v2129_v10, %v2091_v56  ;;  %v2197_v60 = vmul.bf16 %v5467_v35, %v5945_v61  ;;  %v1156_v1 = vrot.slane %v1067_v22, 7  ;;  %v1639_v41 = vmul.bf16 %v5431_v16, %v1583_v5 }
 0x1bd   : > { %v1685_v13 = vmul.bf16 %v5434_v17, %v1320_v52  ;;  %v2130_v29 = vmul.bf16 %v5445_v25, %v1320_v52  ;;  %v1387_v11 = vrot.slane %v1067_v22, 1  ;;  %v5978_v50 = vadd.bf16 %v2542_v45, %v2504_v57 }
 0x1be   : > { %v5980_v38 = vpack.c.bf16 %v1499_v23, %v1419_v59  ;;  %v1189_v36 = vsel %vm1177_vm0, %v1124_v53, %v1156_v1  ;;  %v1221_v8 = vsel %vm1177_vm0, %v1156_v1, %v1124_v53  ;;  %v2092_v48 = vmul.bf16 %v5437_v18, %v1583_v5 }
 0x1bf   : > { %7732 = vst [vmem:[#allocation65_spill] sm:$0xff] %v5978_v50  ;;  %v1717_v56 = vadd.bf16 %v1685_v13, %v1639_v41  ;;  %v2543_v10 = vmul.bf16 %v5475_v46, %v1320_v52  ;;  %v1267_v47 = vsel %vm1111_vm2, %v1221_v8, 0.0  ;;  %v1420_v57 = vsel %vm1408_vm1, %v1355_v20, %v1387_v11 }
 0x1c0   : > { %7733 = vst [vmem:[#allocation66_spill] sm:$0xff] %v5980_v38  ;;  %v1321_v12 = vpack.c.bf16 %v1189_v36, %v1267_v47  ;;  %v1452_v45 = vsel %vm1408_vm1, %v1387_v11, %v1355_v20  ;;  %v1584_v59 = vpack.c.bf16 %v1067_v22, %v5911_v7  ;;  %v5995_v23 = vadd.bf16 %v1756_v0, %v1716_v9 }
 0x1c1   : > { %v5997_v53 = vadd.bf16 %v2197_v60, %v2159_v62  ;;  %v2160_v1 = vadd.bf16 %v2130_v29, %v2092_v48  ;;  %v1500_v52 = vsel %vm1343_vm3, %v1452_v45, 0.0  ;;  %v1757_v41 = vmul.bf16 %v5440_v21, %v5980_v38 }
 0x1c2   : > { %7734 = vst [vmem:[#allocation67_spill] sm:$0xff] %v5995_v23  ;;  %v2505_v13 = vmul.bf16 %v5471_v42, %v1583_v5  ;;  %v1686_v36 = vmul.bf16 %v5456_v30, %v1321_v12  ;;  %v1068_v20 = vmul.f32 %v5914_v24, %v5788_v58  ;;  %v2198_v7 = vmul.bf16 %v5448_v26, %v5980_v38 }
 0x1c3   : > { %7735 = vst [vmem:[#allocation68_spill] sm:$0xff] %v5997_v53  ;;  %v6009_v22 = vpack.c.bf16 %v1500_v52, %v1420_v57  ;;  %v1640_v0 = vmul.bf16 %v5450_v27, %v1584_v59  ;;  %v2131_v9 = vmul.bf16 %v5464_v34, %v1321_v12  ;;  %v6013_v62 = vadd.bf16 %v1757_v41, %v1717_v56 }
 0x1c4   : > { %v6015_v60 = vadd.bf16 %v2543_v10, %v2505_v13  ;;  %v2093_v5 = vmul.bf16 %v5453_v28, %v1584_v59  ;;  %v2544_v29 = vmul.bf16 %v5480_v55, %v1321_v12  ;;  %v6019_v11 = vadd.bf16 %v2198_v7, %v2160_v1  ;;  %v709_v1 = vpop.f32.mrf.mxu0 }
 0x1c5   : > { %7736 = vst [vmem:[#allocation69_spill] sm:$0xff] %v6009_v22  ;;  %7737 = vst [vmem:[#allocation70_spill] sm:$0xff] %v6013_v62  ;;  %v1718_v58 = vadd.bf16 %v1686_v36, %v1640_v0  ;;  %v2506_v24 = vmul.bf16 %v5473_v44, %v1584_v59  ;;  %v1006_v8 = vadd.f32 1.0, %v5869_v6  ;;  %v1125_v47 = vrot.slane %v1068_v20, 7  ;;  %v7741_v59 = vld [vmem:[#allocation28_spill] sm:$0xff] }
 0x1c6   : > { %7738 = vst [vmem:[#allocation71_spill] sm:$0xff] %v6015_v60  ;;  %7739 = vst [vmem:[#allocation72_spill] sm:$0xff] %v6019_v11  ;;  %v2161_v48 = vadd.bf16 %v2131_v9, %v2093_v5  ;;  %v1007_v57 = vadd.f32 1.0, %v5881_v63  ;;  %4689 = verf.f32 %v5809_v33  ;;  %v1758_v56 = vmul.bf16 %v5458_v31, %v6009_v22  ;;  %v7742_v63 = vld [vmem:[#allocation50_spill] sm:$0xff] }
 0x1c7   : > { %v2199_v10 = vmul.bf16 %v5467_v35, %v6009_v22  ;;  %v1356_v12 = vrot.slane %v1068_v20, 1  ;;  %v1070_v45 = vmul.f32 %v1006_v8, %v5793_v51  ;;  %v6030_v52 = vadd.bf16 %v2544_v29, %v2506_v24  ;;  %v711_v24 = vpop.f32.mrf.mxu0 }
 0x1c8   : > { %v1069_v6 = vmul.f32 %v5916_v4, %v5790_v3  ;;  %v1071_v41 = vmul.f32 %v1007_v57, %v7741_v59  ;;  %4691 = verf.f32 %v7742_v63  ;;  %v6036_v33 = vadd.bf16 %v1758_v56, %v1718_v58 }
 0x1c9   : > { %7740 = vst [vmem:[#allocation73_spill] sm:$0xff] %v6030_v52  ;;  %v1157_v13 = vrot.slane %v1070_v45, 7  ;;  %v1388_v36 = vrot.slane %v1070_v45, 1  ;;  %v1008_v7 = vadd.f32 1.0, %v5893_v37  ;;  %v6039_v0 = vadd.bf16 %v2199_v10, %v2161_v48  ;;  %v7745_v10 = vld [vmem:[#allocation46_spill] sm:$0xff] }
 0x1ca   : > { %7743 = vst [vmem:[#allocation28_spill] sm:$0xff] %v6036_v33  ;;  %v1585_v9 = vpack.c.bf16 %v1070_v45, %v1068_v20  ;;  %v1158_v51 = vrot.slane %v1071_v41, 7  ;;  %v1389_v5 = vrot.slane %v1071_v41, 1  ;;  %v1126_v8 = vrot.slane %v1069_v6, 7  ;;  %v7751_v33 = vld [vmem:[#allocation18_spill] sm:$0xff] }
 0x1cb   : > { %7744 = vst [vmem:[#allocation50_spill] sm:$0xff] %v6039_v0  ;;  %v1190_v29 = vsel %vm1177_vm0, %v1125_v47, %v1157_v13  ;;  %v1222_v3 = vsel %vm1177_vm0, %v1157_v13, %v1125_v47  ;;  %v1421_v4 = vsel %vm1408_vm1, %v1356_v12, %v1388_v36  ;;  %v1453_v58 = vsel %vm1408_vm1, %v1388_v36, %v1356_v12  ;;  %v7746_v47 = vld [vmem:[#allocation47_spill] sm:$0xff] }
 0x1cc   : > { %v1357_v37 = vrot.slane %v1069_v6, 1  ;;  %v1270_v20 = vsel %vm1111_vm2, %v1222_v3, 0.0  ;;  %v1503_v48 = vsel %vm1343_vm3, %v1453_v58, 0.0  ;;  %v1586_v56 = vpack.c.bf16 %v1071_v41, %v1069_v6  ;;  %v713_v58 = vpop.f32.mrf.mxu0 }
 0x1cd   : > { %v1322_v57 = vpack.c.bf16 %v1190_v29, %v1270_v20  ;;  %v6054_v45 = vmul.f32 %v1008_v7, %v7745_v10  ;;  %v883_v59 = vmul.f32 0.70710677, %v7746_v47  ;;  %v6057_v63 = vpack.c.bf16 %v1503_v48, %v1421_v4  ;;  %v7748_v7 = vld [vmem:[#allocation17_spill] sm:$0xff] }
 0x1ce   : > { %v1191_v12 = vsel %vm1177_vm0, %v1126_v8, %v1158_v51  ;;  %v1223_v13 = vsel %vm1177_vm0, %v1158_v51, %v1126_v8  ;;  %v1454_v36 = vsel %vm1408_vm1, %v1389_v5, %v1357_v37  ;;  %v1641_v3 = vmul.bf16 %v5431_v16, %v1585_v9 }
 0x1cf   : > { %7747 = vst [vmem:[#allocation46_spill] sm:$0xff] %v6057_v63  ;;  %v1687_v6 = vmul.bf16 %v5434_v17, %v1322_v57  ;;  %v2132_v41 = vmul.bf16 %v5445_v25, %v1322_v57  ;;  %v710_v29 = vadd.f32 %v709_v1, %v7748_v7  ;;  %v2545_v4 = vmul.bf16 %v5475_v46, %v1322_v57 }
 0x1d0   : > { %v1271_v20 = vsel %vm1111_vm2, %v1223_v13, 0.0  ;;  %v1422_v51 = vsel %vm1408_vm1, %v1357_v37, %v1389_v5  ;;  %v1504_v8 = vsel %vm1343_vm3, %v1454_v36, 0.0  ;;  %v2094_v48 = vmul.bf16 %v5437_v18, %v1585_v9 }
 0x1d1   : > { %v2507_v10 = vmul.bf16 %v5471_v42, %v1585_v9  ;;  %v1323_v47 = vpack.c.bf16 %v1191_v12, %v1271_v20  ;;  %v1127_v11 = vrot.slane %v6054_v45, 7  ;;  %v1719_v1 = vadd.bf16 %v1687_v6, %v1641_v3  ;;  %v715_v9 = vpop.f32.mrf.mxu0 }
 0x1d2   : > { %v1759_v57 = vmul.bf16 %v5440_v21, %v6057_v63  ;;  %v1642_v0 = vmul.bf16 %v5450_v27, %v1586_v56  ;;  %4693 = verf.f32 %v883_v59  ;;  %v2162_v19 = vadd.bf16 %v2132_v41, %v2094_v48 }
 0x1d3   : > { %v4690_v13 = vpop.eup %4689  ;;  %v2200_v5 = vmul.bf16 %v5448_v26, %v6057_v63  ;;  %v6084_v37 = vpack.c.bf16 %v1504_v8, %v1422_v51  ;;  %v1688_v36 = vmul.bf16 %v5456_v30, %v1323_v47  ;;  %v6087_v12 = vadd.bf16 %v2545_v4, %v2507_v10  ;;  %v719_v52 = vpop.f32.mrf.mxu0 }
 0x1d4   : > { %v2095_v3 = vmul.bf16 %v5453_v28, %v1586_v56  ;;  %v2133_v6 = vmul.bf16 %v5464_v34, %v1323_v47  ;;  %v2508_v20 = vmul.bf16 %v5473_v44, %v1586_v56  ;;  %v2546_v59 = vmul.bf16 %v5480_v55, %v1323_v47 }
 0x1d5   : > { %7749 = vst [vmem:[#allocation47_spill] sm:$0xff] %v6084_v37  ;;  %7750 = vst [vmem:[#allocation74_spill] sm:$0xff] %v6087_v12  ;;  %v4692_v53 = vpop.eup %4691  ;;  %v1009_v41 = vadd.f32 1.0, %v4690_v13  ;;  %v884_v48 = vmul.f32 0.70710677, %v710_v29  ;;  %v712_v63 = vadd.f32 %v711_v24, %v7751_v33  ;;  %v6094_v51 = vadd.bf16 %v1759_v57, %v1719_v1  ;;  %v7754_v13 = vld [vmem:[#allocation49_spill] sm:$0xff] }
 0x1d6   : > { %v1720_v8 = vadd.bf16 %v1688_v36, %v1642_v0  ;;  %v1358_v62 = vrot.slane %v6054_v45, 1  ;;  %v1010_v4 = vadd.f32 1.0, %v4692_v53  ;;  %v6097_v10 = vadd.bf16 %v2200_v5, %v2162_v19  ;;  %v7756_v57 = vld [vmem:[#allocation48_spill] sm:$0xff] }
 0x1d7   : > { %7752 = vst [vmem:[#allocation75_spill] sm:$0xff] %v6094_v51  ;;  %v1760_v12 = vmul.bf16 %v5458_v31, %v6084_v37  ;;  %4695 = verf.f32 %v884_v48  ;;  %v885_v56 = vmul.f32 0.70710677, %v712_v63  ;;  %v2163_v60 = vadd.bf16 %v2133_v6, %v2095_v3 }
 0x1d8   : > { %7753 = vst [vmem:[#allocation76_spill] sm:$0xff] %v6097_v10  ;;  %v2201_v47 = vmul.bf16 %v5467_v35, %v6084_v37  ;;  %v1074_v24 = vmul.f32 %v1010_v4, %v7754_v13  ;;  %v6104_v1 = vmul.f32 0.5, %v710_v29  ;;  %v6106_v0 = vadd.bf16 %v2546_v59, %v2508_v20  ;;  %v721_v20 = vpop.f32.mrf.mxu0 }
 0x1d9   : > { %v6109_v53 = vmul.f32 %v1009_v41, %v7756_v57  ;;  %v714_v19 = vadd.f32 %v713_v58, %v7748_v7  ;;  %v716_v5 = vadd.f32 %v715_v9, %v7751_v33  ;;  %v6113_v36 = vadd.bf16 %v1760_v12, %v1720_v8 }
 0x1da   : > { %7755 = vst [vmem:[#allocation49_spill] sm:$0xff] %v6106_v0  ;;  %v1159_v48 = vrot.slane %v1074_v24, 7  ;;  %v1390_v3 = vrot.slane %v1074_v24, 1  ;;  %4697 = verf.f32 %v885_v56  ;;  %v6115_v6 = vmul.f32 0.5, %v712_v63  ;;  %v7761_v0 = vld [vmem:[#allocation21_spill] sm:$0xff] }
 0x1db   : > { %7757 = vst [vmem:[#allocation48_spill] sm:$0xff] %v6113_v36  ;;  %v886_v10 = vmul.f32 0.70710677, %v714_v19  ;;  %v887_v4 = vmul.f32 0.70710677, %v716_v5  ;;  %v720_v29 = vadd.f32 %v719_v52, %v7748_v7  ;;  %v6126_v41 = vadd.bf16 %v2201_v47, %v2163_v60  ;;  %v723_v47 = vpop.f32.mrf.mxu0 }
 0x1dc   : > { %v1192_v59 = vsel %vm1177_vm0, %v1127_v11, %v1159_v48  ;;  %v1224_v58 = vsel %vm1177_vm0, %v1159_v48, %v1127_v11  ;;  %v1423_v9 = vsel %vm1408_vm1, %v1358_v62, %v1390_v3  ;;  %v1455_v12 = vsel %vm1408_vm1, %v1390_v3, %v1358_v62 }
 0x1dd   : > { %7758 = vst [vmem:[#allocation77_spill] sm:$0xff] %v6126_v41  ;;  %v1274_v63 = vsel %vm1111_vm2, %v1224_v58, 0.0  ;;  %v1507_v52 = vsel %vm1343_vm3, %v1455_v12, 0.0  ;;  %v1587_v8 = vpack.c.bf16 %v1074_v24, %v6054_v45  ;;  %v1128_v56 = vrot.slane %v6109_v53, 7 }
 0x1de   : > { %v1324_v13 = vpack.c.bf16 %v1192_v59, %v1274_v63  ;;  %4699 = verf.f32 %v886_v10  ;;  %v722_v11 = vadd.f32 %v721_v20, %v7751_v33  ;;  %v1359_v48 = vrot.slane %v6109_v53, 1 }
 0x1df   : > { %v4694_v57 = vpop.eup %4693  ;;  %v6136_v62 = vpack.c.bf16 %v1507_v52, %v1423_v9  ;;  %4701 = verf.f32 %v887_v4  ;;  %v888_v60 = vmul.f32 0.70710677, %v720_v29  ;;  %v6140_v12 = vmul.f32 0.5, %v714_v19  ;;  %v7760_v19 = vld [vmem:[#allocation51_spill] sm:$0xff] }
 0x1e0   : > { %v1689_v3 = vmul.bf16 %v5434_v17, %v1324_v13  ;;  %v2134_v58 = vmul.bf16 %v5445_v25, %v1324_v13  ;;  %v6142_v45 = vmul.f32 0.5, %v716_v5  ;;  %v1643_v10 = vmul.bf16 %v5431_v16, %v1587_v8 }
 0x1e1   : > { %7759 = vst [vmem:[#allocation78_spill] sm:$0xff] %v6136_v62  ;;  %v2547_v24 = vmul.bf16 %v5475_v46, %v1324_v13  ;;  %v1011_v20 = vadd.f32 1.0, %v4694_v57  ;;  %4703 = verf.f32 %v888_v60  ;;  %v2096_v59 = vmul.bf16 %v5437_v18, %v1587_v8 }
 0x1e2   : > { %v2509_v4 = vmul.bf16 %v5471_v42, %v1587_v8  ;;  %v889_v9 = vmul.f32 0.70710677, %v722_v11  ;;  %v724_v63 = vadd.f32 %v723_v47, %v7748_v7  ;;  %v1761_v52 = vmul.bf16 %v5440_v21, %v6136_v62 }
 0x1e3   : > { %v1075_v41 = vmul.f32 %v1011_v20, %v7760_v19  ;;  %v6152_v5 = vmul.f32 0.5, %v720_v29  ;;  %v6154_v36 = vmul.f32 0.5, %v722_v11  ;;  %v1721_v13 = vadd.bf16 %v1689_v3, %v1643_v10  ;;  %v7763_v11 = vld [vmem:[#allocation24_spill] sm:$0xff] }
 0x1e4   : > { %v4696_v51 = vpop.eup %4695  ;;  %v2164_v57 = vadd.bf16 %v2134_v58, %v2096_v59  ;;  %v2202_v60 = vmul.bf16 %v5448_v26, %v6136_v62  ;;  %v1747_v8 = vmul.bf16 %v5440_v21, %v7761_v0  ;;  %v6160_v37 = vadd.bf16 %v2547_v24, %v2509_v4 }
 0x1e5   : > { %v1160_v47 = vrot.slane %v1075_v41, 7  ;;  %v1391_v49 = vrot.slane %v1075_v41, 1  ;;  %v890_v22 = vmul.f32 0.70710677, %v724_v63  ;;  %v1588_v20 = vpack.c.bf16 %v1075_v41, %v6109_v53 }
 0x1e6   : > { %7762 = vst [vmem:[#allocation51_spill] sm:$0xff] %v6160_v37  ;;  %v1012_v29 = vadd.f32 1.0, %v4696_v51  ;;  %4705 = verf.f32 %v889_v9  ;;  %v1748_v19 = vmul.bf16 %v5458_v31, %v7763_v11  ;;  %v6176_v51 = vld.sshfl [vmem:[%s7560_s4] sm:$0x11 pattern:$0x75316420]  ;;  %v6178_v53 = vadd.bf16 %v1761_v52, %v1721_v13 }
 0x1e7   : > { %v4698_v3 = vpop.eup %4697  ;;  %v1193_v58 = vsel %vm1177_vm0, %v1128_v56, %v1160_v47  ;;  %v1225_v10 = vsel %vm1177_vm0, %v1160_v47, %v1128_v56  ;;  %v1424_v0 = vsel %vm1408_vm1, %v1359_v48, %v1391_v49  ;;  %v1456_v24 = vsel %vm1408_vm1, %v1391_v49, %v1359_v48  ;;  %v7766_v49 = vld [vmem:[#allocation22_spill] sm:$0xff]  ;;  %v7768_v52 = vld [vmem:[#allocation32_spill] sm:$0xff] }
 0x1e8   : > { %7764 = vst [vmem:[#allocation21_spill] sm:$0xff] %v6178_v53  ;;  %v6180_v41 = vadd.bf16 %v2202_v60, %v2164_v57  ;;  %v1275_v59 = vsel %vm1111_vm2, %v1225_v10, 0.0  ;;  %v1508_v56 = vsel %vm1343_vm3, %v1456_v24, 0.0  ;;  %v6186_v9 = vmul.f32 0.5, %v724_v63 }
 0x1e9   : > { %v1325_v4 = vpack.c.bf16 %v1193_v58, %v1275_v59  ;;  %4707 = verf.f32 %v890_v22  ;;  %v6189_v48 = vadd.bf16 %v1747_v8, %v7766_v49  ;;  %v6191_v47 = vpack.c.bf16 %v1508_v56, %v1424_v0  ;;  %v7769_v49 = vld [vmem:[#allocation27_spill] sm:$0xff] }
 0x1ea   : > { %7765 = vst [vmem:[#allocation24_spill] sm:$0xff] %v6180_v41  ;;  %v1013_v11 = vadd.f32 1.0, %v4698_v3  ;;  %v6194_v13 = vadd.bf16 %v1748_v19, %v7768_v52  ;;  %v1644_v10 = vmul.bf16 %v5450_v27, %v1588_v20  ;;  %v1076_v22 = vmul.f32 %v1012_v29, %v6104_v1  ;;  %v7770_v29 = vld [vmem:[#allocation33_spill] sm:$0xff] }
 0x1eb   : > { %7767 = vst [vmem:[#allocation22_spill] sm:$0xff] %v6191_v47  ;;  %v4700_v60 = vpop.eup %4699  ;;  %v1690_v58 = vmul.bf16 %v5456_v30, %v1325_v4  ;;  %v2135_v63 = vmul.bf16 %v5464_v34, %v1325_v4  ;;  %v2097_v0 = vmul.bf16 %v5453_v28, %v1588_v20  ;;  %v2510_v3 = vmul.bf16 %v5473_v44, %v1588_v20 }
 0x1ec   : > { %v4702_v8 = vpop.eup %4701  ;;  %v2548_v19 = vmul.bf16 %v5480_v55, %v1325_v4  ;;  %v1077_v24 = vmul.f32 %v1013_v11, %v6115_v6  ;;  %v1014_v59 = vadd.f32 1.0, %v4700_v60  ;;  %v2535_v52 = vmul.bf16 %v5475_v46, %v7769_v49 }
 0x1ed   : > { %v1015_v56 = vadd.f32 1.0, %v4702_v8  ;;  %v1722_v41 = vadd.bf16 %v1690_v58, %v1644_v10  ;;  %v1762_v53 = vmul.bf16 %v5458_v31, %v6191_v47  ;;  %v2203_v1 = vmul.bf16 %v5467_v35, %v6191_v47 }
 0x1ee   : > { %v4704_v57 = vpop.eup %4703  ;;  %v2536_v20 = vmul.bf16 %v5480_v55, %v7770_v29  ;;  %v2165_v37 = vadd.bf16 %v2135_v63, %v2097_v0  ;;  %v1129_v4 = vrot.slane %v1076_v22, 7  ;;  %v1078_v6 = vmul.f32 %v1014_v59, %v6140_v12 }
 0x1ef   : > { %v1079_v11 = vmul.f32 %v1015_v56, %v6142_v45  ;;  %v6216_v60 = vadd.bf16 %v2548_v19, %v2510_v3  ;;  %v1360_v8 = vrot.slane %v1076_v22, 1  ;;  %v1130_v49 = vrot.slane %v1077_v24, 7 }
 0x1f0   : > { %v5156_v10 = vmov 1966171168   ;;  %v1361_v62 = vrot.slane %v1077_v24, 1  ;;  %v1161_v38 = vrot.slane %v1078_v6, 7  ;;  %v1392_v23 = vrot.slane %v1078_v6, 1 }
 0x1f1   : > { %7771 = vst [vmem:[#allocation32_spill] sm:$0xff] %v6216_v60  ;;  %v1823_v58 = vunpack.c.l.s4 %v5156_v10  ;;  %v1016_v32 = vadd.f32 1.0, %v4704_v57  ;;  %v6218_v47 = vadd.bf16 %v1762_v53, %v1722_v41  ;;  %v1589_v43 = vpack.c.bf16 %v1078_v6, %v1076_v22 }
 0x1f2   : > { %v1162_v29 = vrot.slane %v1079_v11, 7  ;;  %v1393_v63 = vrot.slane %v1079_v11, 1  ;;  %v6220_v50 = vadd.bf16 %v2203_v1, %v2165_v37  ;;  %v1194_v12 = vsel %vm1177_vm0, %v1129_v4, %v1161_v38 }
 0x1f3   : > { %7772 = vst [vmem:[#allocation27_spill] sm:$0xff] %v6218_v47  ;;  %v4706_v0 = vpop.eup %4705  ;;  %v1226_v45 = vsel %vm1177_vm0, %v1161_v38, %v1129_v4  ;;  %v1457_v3 = vsel %vm1408_vm1, %v1392_v23, %v1360_v8  ;;  %v1425_v53 = vsel %vm1408_vm1, %v1360_v8, %v1392_v23  ;;  %v1824_v37 = vunpack.c.0.s8 %v1823_v58  ;;  %v7774_v38 = vld [vmem:[#allocation25_spill] sm:$0xff] }
 0x1f4   : > { %7773 = vst [vmem:[#allocation33_spill] sm:$0xff] %v6220_v50  ;;  %v1278_v57 = vsel %vm1111_vm2, %v1226_v45, 0.0  ;;  %v1511_v41 = vsel %vm1343_vm3, %v1457_v3, 0.0  ;;  %v1590_v19 = vpack.c.bf16 %v1079_v11, %v1077_v24  ;;  %v6235_v59 = vmul.f32 %v1016_v32, %v6152_v5 }
 0x1f5   : > { %v1326_v22 = vpack.c.bf16 %v1194_v12, %v1278_v57  ;;  %v7775_v56 = vmul.bf16 %v5471_v42, %v7774_v38  ;;  %v1645_v6 = vmul.bf16 %v5431_v16, %v1589_v43  ;;  %v1195_v23 = vsel %vm1177_vm0, %v1130_v49, %v1162_v29  ;;  %v7777_v57 = vld [vmem:[#allocation30_spill] sm:$0xff] }
 0x1f6   : > { %v4708_v4 = vpop.eup %4707  ;;  %v1227_v8 = vsel %vm1177_vm0, %v1162_v29, %v1130_v49  ;;  %v1458_v24 = vsel %vm1408_vm1, %v1393_v63, %v1361_v62  ;;  %v6249_v11 = vpack.c.bf16 %v1511_v41, %v1425_v53  ;;  %v2098_v10 = vmul.bf16 %v5437_v18, %v1589_v43 }
 0x1f7   : > { %v6240_v1 = vadd.bf16 %v2535_v52, %v7775_v56  ;;  %v1691_v32 = vmul.bf16 %v5434_v17, %v1326_v22  ;;  %v2136_v5 = vmul.bf16 %v5445_v25, %v1326_v22  ;;  %v1426_v52 = vsel %vm1408_vm1, %v1361_v62, %v1393_v63  ;;  %v1609_v56 = vld [vmem:[#allocation8 + $0x8] sm:$0x11] }
 0x1f8   : > { %7776 = vst [vmem:[#allocation25_spill] sm:$0xff] %v6249_v11  ;;  %v2549_v58 = vmul.bf16 %v5475_v46, %v1326_v22  ;;  %v1279_v12 = vsel %vm1111_vm2, %v1227_v8, 0.0  ;;  %v1512_v49 = vsel %vm1343_vm3, %v1458_v24, 0.0  ;;  %v2511_v29 = vmul.bf16 %v5471_v42, %v1589_v43  ;;  %v725_v24 = vpop.f32.mrf.mxu0 }
 0x1f9   : > { %v1327_v45 = vpack.c.bf16 %v1195_v23, %v1279_v12  ;;  %v1017_v3 = vadd.f32 1.0, %v4706_v0  ;;  %v7778_v53 = vmul.bf16 %v5473_v44, %v7777_v57  ;;  %v1723_v62 = vadd.bf16 %v1691_v32, %v1645_v6 }
 0x1fa   : > { %v2166_v63 = vadd.bf16 %v2136_v5, %v2098_v10  ;;  %v6267_v38 = vpack.c.bf16 %v1512_v49, %v1426_v52  ;;  %v1646_v22 = vmul.bf16 %v5450_v27, %v1590_v19  ;;  %v1763_v8 = vmul.bf16 %v5440_v21, %v6249_v11 }
 0x1fb   : > { %v6265_v41 = vadd.bf16 %v2536_v20, %v7778_v53  ;;  %v2204_v43 = vmul.bf16 %v5448_v26, %v6249_v11  ;;  %v6274_v23 = vadd.bf16 %v2549_v58, %v2511_v29  ;;  %v2099_v0 = vmul.bf16 %v5453_v28, %v1590_v19 }
 0x1fc   : > { %7779 = vst [vmem:[#allocation30_spill] sm:$0xff] %v6267_v38  ;;  %v1692_v20 = vmul.bf16 %v5456_v30, %v1327_v45  ;;  %v2137_v6 = vmul.bf16 %v5464_v34, %v1327_v45  ;;  %v2512_v32 = vmul.bf16 %v5473_v44, %v1590_v19  ;;  %v1131_v5 = vrot.slane %v6235_v59, 7 }
 0x1fd   : > { %7780 = vst [vmem:[#allocation79_spill] sm:$0xff] %v6274_v23  ;;  %v2550_v52 = vmul.bf16 %v5480_v55, %v1327_v45  ;;  %v1018_v10 = vadd.f32 1.0, %v4708_v4  ;;  %v1827_v12 = vsub.s32 %v1824_v37, %v5386_v39  ;;  %v4302_v49 = vcombine.low %v1609_v56, %v1609_v56 }
 0x1fe   : > { %v6283_v57 = vadd.bf16 %v1763_v8, %v1723_v62  ;;  %v6285_v58 = vadd.bf16 %v2204_v43, %v2166_v63  ;;  %v1764_v29 = vmul.bf16 %v5458_v31, %v6267_v38  ;;  %v1362_v53 = vrot.slane %v6235_v59, 1  ;;  %v729_v62 = vpop.f32.mrf.mxu0 }
 0x1ff   : > { %v2205_v19 = vmul.bf16 %v5467_v35, %v6267_v38  ;;  %v1082_v50 = vmul.f32 %v1018_v10, %v6186_v9  ;;  %v1828_v45 = vrot.slane %v6176_v51, %v1827_v12  ;;  %v7783_v37 = vcombine.high %v6176_v51, %v6176_v51 }
 0x200   : > { %7781 = vst [vmem:[#allocation80_spill] sm:$0xff] %v6283_v57  ;;  %7782 = vst [vmem:[#allocation81_spill] sm:$0xff] %v6285_v58  ;;  %v1724_v8 = vadd.bf16 %v1692_v20, %v1646_v22  ;;  %v6298_v63 = vmul.f32 %v1017_v3, %v6154_v36  ;;  %v4303_v43 = vcombine.high %v1609_v56, %v1609_v56  ;;  %v731_v56 = vpop.f32.mrf.mxu0 }
 0x201   : > { %v1835_v4 = vrot.slane %v7783_v37, %v1827_v12  ;;  %v2601_v58 = vpack.i.b16 %v4302_v49, %v4302_v49  ;;  %v2167_v57 = vadd.bf16 %v2137_v6, %v2099_v0  ;;  %v6300_v23 = vadd.bf16 %v2550_v52, %v2512_v32  ;;  %v7785_v6 = vld [vmem:[#allocation16_spill] sm:$0xff] }
 0x202   : > { %v1163_v11 = vrot.slane %v1082_v50, 7  ;;  %v1394_v38 = vrot.slane %v1082_v50, 1  ;;  %v1837_v47 = vpack.i.b16 %v1828_v45, %v1828_v45  ;;  %v2608_v10 = vpack.i.b16 %v4303_v43, %v4303_v43  ;;  %v733_v37 = vpop.f32.mrf.mxu0 }
 0x203   : > { %7784 = vst [vmem:[#allocation82_spill] sm:$0xff] %v6300_v23  ;;  %v1844_v9 = vpack.i.b16 %v1835_v4, %v1835_v4  ;;  %v726_v60 = vadd.f32 %v725_v24, %v7751_v33  ;;  %v1591_v3 = vpack.c.bf16 %v1082_v50, %v6235_v59  ;;  %v6317_v32 = vrot.slane %v2601_v58, %v7785_v6  ;;  %v7805_v23 = vld [vmem:[#allocation45_spill] sm:$0xff] }
 0x204   : > { %v1196_v51 = vsel %vm1177_vm0, %v1131_v5, %v1163_v11  ;;  %v1228_v22 = vsel %vm1177_vm0, %v1163_v11, %v1131_v5  ;;  %v1459_v36 = vsel %vm1408_vm1, %v1394_v38, %v1362_v53  ;;  %v1427_v20 = vsel %vm1408_vm1, %v1362_v53, %v1394_v38 }
 0x205   : > { %v1282_v0 = vsel %vm1111_vm2, %v1228_v22, 0.0  ;;  %v1515_v24 = vsel %vm1343_vm3, %v1459_v36, 0.0  ;;  %7786 = vst [vmem:[#allocation16_spill] sm:$0xff] %v6317_v32  ;;  %v6319_v52 = vadd.bf16 %v1764_v29, %v1724_v8  ;;  %v6324_v59 = vrot.slane %v1837_v47, %v7785_v6  ;;  %v7793_v8 = vld [vmem:[#allocation29_spill] sm:$0xff] }
 0x206   : > { %v1328_v50 = vpack.c.bf16 %v1196_v51, %v1282_v0  ;;  %v6327_v12 = vrot.slane %v1844_v9, %v7785_v6  ;;  %v6330_v38 = vrot.slane %v2608_v10, %v7785_v6  ;;  %v891_v49 = vmul.f32 0.70710677, %v726_v60  ;;  %v7794_v9 = vld [vmem:[#allocation35_spill] sm:$0xff] }
 0x207   : > { %7787 = vst [vmem:[#allocation83_spill] sm:$0xff] %v6319_v52  ;;  %7788 = vst [vmem:[#allocation84_spill] sm:$0xff] %v6324_v59  ;;  %v6332_v53 = vadd.bf16 %v2205_v19, %v2167_v57  ;;  %v6334_v58 = vpack.c.bf16 %v1515_v24, %v1427_v20  ;;  %v6337_v45 = vmul.f32 0.5, %v726_v60  ;;  %v1647_v4 = vmul.bf16 %v5431_v16, %v1591_v3  ;;  %v7804_v52 = vld [vmem:[#allocation42_spill] sm:$0xff] }
 0x208   : > { %7789 = vst [vmem:[#allocation85_spill] sm:$0xff] %v6327_v12  ;;  %7790 = vst [vmem:[#allocation86_spill] sm:$0xff] %v6330_v38  ;;  %v1693_v29 = vmul.bf16 %v5434_v17, %v1328_v50  ;;  %v1851_v47 = vadd.bf16 %v6327_v12, %v6194_v13  ;;  %v2614_v43 = vmul.bf16 %v6317_v32, %v7793_v8  ;;  %4709 = verf.f32 %v891_v49  ;;  %v735_v8 = vpop.f32.mrf.mxu0 }
 0x209   : > { %7791 = vst [vmem:[#allocation87_spill] sm:$0xff] %v6332_v53  ;;  %7792 = vst [vmem:[#allocation88_spill] sm:$0xff] %v6334_v58  ;;  %v2615_v10 = vmul.bf16 %v6330_v38, %v7794_v9  ;;  %v2100_v57 = vmul.bf16 %v5437_v18, %v1591_v3  ;;  %v2138_v19 = vmul.bf16 %v5445_v25, %v1328_v50 }
 0x20a   : > { %v2513_v51 = vmul.bf16 %v5471_v42, %v1591_v3  ;;  %v2551_v60 = vmul.bf16 %v5475_v46, %v1328_v50  ;;  %v1850_v22 = vadd.bf16 %v6324_v59, %v6189_v48  ;;  %v2644_v13 = vadd.bf16 %v2614_v43, %v6240_v1 }
 0x20b   : > { %v2645_v36 = vadd.bf16 %v2615_v10, %v6265_v41  ;;  %v1725_v0 = vadd.bf16 %v1693_v29, %v1647_v4  ;;  %v1765_v20 = vmul.bf16 %v5440_v21, %v6334_v58  ;;  %v730_v24 = vadd.f32 %v729_v62, %v7748_v7 }
 0x20c   : > { %v732_v6 = vadd.f32 %v731_v56, %v7751_v33  ;;  %v4240_v3 = vcombine.low %v1850_v22, %v1851_v47  ;;  %v4241_v49 = vcombine.high %v1850_v22, %v1851_v47  ;;  %v2168_v5 = vadd.bf16 %v2138_v19, %v2100_v57  ;;  %v7797_v56 = vld [vmem:[#allocation36_spill] sm:$0xff]  ;;  %v7798_v22 = vld [vmem:[#allocation38_spill] sm:$0xff]  ;;  %v739_v19 = vpop.f32.mrf.mxu0 }
 0x20d   : > { %v4304_v9 = vcombine.low %v2644_v13, %v2645_v36  ;;  %v4305_v50 = vcombine.high %v2644_v13, %v2645_v36  ;;  %v2206_v48 = vmul.bf16 %v5448_v26, %v6334_v58  ;;  %v892_v1 = vmul.f32 0.70710677, %v730_v24 }
 0x20e   : > { %v893_v43 = vmul.f32 0.70710677, %v732_v6  ;;  %v6360_v41 = vadd.bf16 %v2551_v60, %v2513_v51  ;;  %v734_v10 = vadd.f32 %v733_v37, %v7748_v7  ;;  %v6363_v62 = vadd.bf16 %v1765_v20, %v1725_v0 }
 0x20f   : > { %v2854_v29 = vadd.bf16 %v4304_v9, %v4240_v3  ;;  %v2855_v4 = vadd.bf16 %v4305_v50, %v4241_v49  ;;  %4711 = verf.f32 %v892_v1  ;;  %v1852_v47 = vadd.bf16 %v6324_v59, %v7797_v56  ;;  %v7800_v56 = vld [vmem:[#allocation34_spill] sm:$0xff] }
 0x210   : > { %7795 = vst [vmem:[#allocation29_spill] sm:$0xff] %v6360_v41  ;;  %7796 = vst [vmem:[#allocation35_spill] sm:$0xff] %v6363_v62  ;;  %v1853_v57 = vadd.bf16 %v6327_v12, %v7798_v22  ;;  %v6369_v51 = vadd.bf16 %v2206_v48, %v2168_v5  ;;  %v6371_v60 = vmul.f32 0.5, %v730_v24  ;;  %v6373_v3 = vmul.f32 0.5, %v732_v6  ;;  %v7801_v22 = vld [vmem:[#allocation31_spill] sm:$0xff]  ;;  %v7803_v48 = vld [vmem:[#allocation41_spill] sm:$0xff] }
 0x211   : > { %v2947_v13 = vunpack.c.h.bf16 %v2854_v29  ;;  %v2949_v36 = vunpack.c.h.bf16 %v2855_v4  ;;  %v2946_v11 = vunpack.c.l.bf16 %v2854_v29  ;;  %v2948_v53 = vunpack.c.l.bf16 %v2855_v4  ;;  %v741_v29 = vpop.f32.mrf.mxu0  ;;  %v7802_v24 = vld [vmem:[#allocation39_spill] sm:$0xff] }
 0x212   : > { %7799 = vst [vmem:[#allocation36_spill] sm:$0xff] %v6369_v51  ;;  %4713 = verf.f32 %v893_v43  ;;  %v6375_v20 = vmul.f32 0.5, %v734_v10  ;;  %v4242_v49 = vcombine.low %v1852_v47, %v1853_v57  ;;  %v894_v1 = vmul.f32 0.70710677, %v734_v10 }
 0x213   : > { %v3075_v37 = vmul.f32 0.70710677, %v2947_v13  ;;  %v3077_v0 = vmul.f32 0.70710677, %v2949_v36  ;;  %v3074_v9 = vmul.f32 0.70710677, %v2946_v11  ;;  %v4272_v41 = vcombine.low %v7801_v22, %v7800_v56  ;;  %v743_v61 = vpop.f32.mrf.mxu0 }
 0x214   : > { %v3076_v50 = vmul.f32 0.70710677, %v2948_v53  ;;  %v4273_v5 = vcombine.high %v7801_v22, %v7800_v56  ;;  %v2616_v6 = vmul.bf16 %v6317_v32, %v7802_v24  ;;  %v2617_v43 = vmul.bf16 %v6330_v38, %v7803_v48 }
 0x215   : > { %4715 = verf.f32 %v3075_v37  ;;  %v6385_v4 = vmul.f32 0.5, %v2947_v13  ;;  %v4243_v51 = vcombine.high %v1852_v47, %v1853_v57  ;;  %v736_v10 = vadd.f32 %v735_v8, %v7751_v33  ;;  %v4710_v62 = vpop.eup %4709 }
 0x216   : > { %4717 = verf.f32 %v3077_v0  ;;  %v2429_v58 = vadd.bf16 %v4272_v41, %v4242_v49  ;;  %v2646_v37 = vadd.bf16 %v2616_v6, %v7804_v52  ;;  %v2647_v54 = vadd.bf16 %v2617_v43, %v7805_v23 }
 0x217   : > { %4719 = verf.f32 %v3074_v9  ;;  %v1019_v56 = vadd.f32 1.0, %v4710_v62  ;;  %v895_v22 = vmul.f32 0.70710677, %v736_v10  ;;  %v740_v24 = vadd.f32 %v739_v19, %v7748_v7 }
 0x218   : > { %4721 = verf.f32 %v3076_v50  ;;  %v4306_v13 = vcombine.low %v2646_v37, %v2647_v54  ;;  %v4307_v48 = vcombine.high %v2646_v37, %v2647_v54  ;;  %v742_v47 = vadd.f32 %v741_v29, %v7751_v33 }
 0x219   : > { %4723 = verf.f32 %v894_v1  ;;  %v3013_v57 = vmul.f32 0.5, %v2949_v36  ;;  %v1083_v8 = vmul.f32 %v1019_v56, %v6337_v45  ;;  %v2430_v0 = vadd.bf16 %v4273_v5, %v4243_v51 }
 0x21a   : > { %4725 = verf.f32 %v895_v22  ;;  %v3010_v41 = vmul.f32 0.5, %v2946_v11  ;;  %v3012_v52 = vmul.f32 0.5, %v2948_v53  ;;  %v6393_v49 = vadd.bf16 %v4306_v13, %v2429_v58 }
 0x21b   : > { %v6396_v23 = vadd.f32 %v743_v61, %v7748_v7  ;;  %v1164_v62 = vrot.slane %v1083_v8, 7  ;;  %v1395_v19 = vrot.slane %v1083_v8, 1  ;;  %v6398_v9 = vadd.bf16 %v4307_v48, %v2430_v0 }
 0x21c   : > { %v896_v50 = vmul.f32 0.70710677, %v740_v24  ;;  %v4712_v54 = vpop.eup %4711  ;;  %v1592_v1 = vpack.c.bf16 %v1083_v8, %v6298_v63  ;;  %v6401_v36 = vmul.f32 0.5, %v736_v10  ;;  %v6403_v45 = vmul.f32 0.5, %v740_v24 }
 0x21d   : > { %v6405_v51 = vmul.f32 0.5, %v742_v47  ;;  %v7807_v11 = vrot.slane %v6298_v63, 7  ;;  %v7809_v29 = vrot.slane %v6298_v63, 1  ;;  %v897_v6 = vmul.f32 0.70710677, %v742_v47 }
 0x21e   : > { %v2951_v24 = vunpack.c.h.bf16 %v6393_v49  ;;  %v2953_v48 = vunpack.c.h.bf16 %v6398_v9  ;;  %4727 = verf.f32 %v896_v50  ;;  %v6430_v47 = vmul.f32 0.5, %v6396_v23 }
 0x21f   : > { %7806 = vst [vmem:[#allocation38_spill] sm:$0xff] %v6405_v51  ;;  %v1197_v61 = vsel %vm1177_vm0, %v7807_v11, %v1164_v62  ;;  %v7808_v53 = vmov %v7807_v11  ;;  %v1460_v5 = vsel %vm1408_vm1, %v1395_v19, %v7809_v29  ;;  %v4714_v43 = vpop.eup %4713  ;;  %v7810_v37 = vmov %v7809_v29 }
 0x220   : > { %v1229_v58 = vsel %vm1177_vm0, %v1164_v62, %v7808_v53  ;;  %v1428_v56 = vsel %vm1408_vm1, %v7810_v37, %v1395_v19  ;;  %v1516_v22 = vsel %vm1343_vm3, %v1460_v5, 0.0  ;;  %7811 = vst [vmem:[#allocation34_spill] sm:$0xff] %v6430_v47  ;;  %v1648_v8 = vmul.bf16 %v5450_v27, %v1592_v1 }
 0x221   : > { %v1283_v10 = vsel %vm1111_vm2, %v1229_v58, 0.0  ;;  %v1020_v0 = vadd.f32 1.0, %v4712_v54  ;;  %v6435_v11 = vpack.c.bf16 %v1516_v22, %v1428_v56  ;;  %v2101_v53 = vmul.bf16 %v5453_v28, %v1592_v1 }
 0x222   : > { %v1329_v13 = vpack.c.bf16 %v1197_v61, %v1283_v10  ;;  %v4716_v19 = vpop.eup %4715  ;;  %v2514_v61 = vmul.bf16 %v5473_v44, %v1592_v1  ;;  %v1021_v58 = vadd.f32 1.0, %v4714_v43  ;;  %v6441_v37 = vmul.f32 0.5, %v2951_v24 }
 0x223   : > { %7812 = vst [vmem:[#allocation31_spill] sm:$0xff] %v6435_v11  ;;  %v4718_v29 = vpop.eup %4717  ;;  %v3203_v50 = vadd.f32 1.0, %v4716_v19  ;;  %v6444_v40 = vmul.f32 0.5, %v2953_v48  ;;  %v3079_v56 = vmul.f32 0.70710677, %v2951_v24  ;;  %v1084_v43 = vmul.f32 %v1020_v0, %v6371_v60 }
 0x224   : > { %v1694_v5 = vmul.bf16 %v5456_v30, %v1329_v13  ;;  %v2139_v10 = vmul.bf16 %v5464_v34, %v1329_v13  ;;  %v4720_v54 = vpop.eup %4719  ;;  %v3205_v63 = vadd.f32 1.0, %v4718_v29  ;;  %v2552_v62 = vmul.bf16 %v5480_v55, %v1329_v13 }
 0x225   : > { %v4722_v22 = vpop.eup %4721  ;;  %v3267_v47 = vmul.f32 %v3203_v50, %v6385_v4  ;;  %v3202_v1 = vadd.f32 1.0, %v4720_v54  ;;  %v3081_v19 = vmul.f32 0.70710677, %v2953_v48  ;;  %v1766_v7 = vmul.bf16 %v5458_v31, %v6435_v11 }
 0x226   : > { %v4724_v2 = vpop.eup %4723  ;;  %v3269_v51 = vmul.f32 %v3205_v63, %v3013_v57  ;;  %v2207_v29 = vmul.bf16 %v5467_v35, %v6435_v11  ;;  %v3204_v33 = vadd.f32 1.0, %v4722_v22  ;;  %v1726_v38 = vadd.bf16 %v1694_v5, %v1648_v8 }
 0x227   : > { %v4726_v13 = vpop.eup %4725  ;;  %v2169_v15 = vadd.bf16 %v2139_v10, %v2101_v53  ;;  %v3266_v24 = vmul.f32 %v3202_v1, %v3010_v41  ;;  %v1085_v32 = vmul.f32 %v1021_v58, %v6373_v3  ;;  %v1022_v54 = vadd.f32 1.0, %v4724_v2 }
 0x228   : > { %v3331_v4 = vpack.c.bf16 %v3269_v51, %v3267_v47  ;;  %v3268_v50 = vmul.f32 %v3204_v33, %v3012_v52  ;;  %4729 = verf.f32 %v3079_v56  ;;  %v6453_v60 = vadd.bf16 %v2552_v62, %v2514_v61 }
 0x229   : > { %v1133_v57 = vrot.slane %v1084_v43, 7  ;;  %4731 = verf.f32 %v3081_v19  ;;  %v1023_v48 = vadd.f32 1.0, %v4726_v13  ;;  %v1086_v63 = vmul.f32 %v1022_v54, %v6375_v20 }
 0x22a   : > { %7813 = vst [vmem:[#allocation39_spill] sm:$0xff] %v6453_v60  ;;  %3524 = vmatprep.mubr.bf16.mxu1 %v3331_v4  ;;  %v3330_v0 = vpack.c.bf16 %v3268_v50, %v3266_v24  ;;  %v7814_v22 = vunpack.c.l.bf16 %v6393_v49  ;;  %v7815_v41 = vunpack.c.l.bf16 %v6398_v9  ;;  %v6460_v3 = vadd.bf16 %v1766_v7, %v1726_v38 }
 0x22b   : > { %v6462_v33 = vadd.bf16 %v2207_v29, %v2169_v15  ;;  %v1087_v2 = vmul.f32 %v1023_v48, %v6401_v36  ;;  %4733 = verf.f32 %v897_v6  ;;  %v1364_v52 = vrot.slane %v1084_v43, 1  ;;  %v4728_v62 = vpop.eup %4727 }
 0x22c   : > { %v3078_v8 = vmul.f32 0.70710677, %v7814_v22  ;;  %v3080_v53 = vmul.f32 0.70710677, %v7815_v41  ;;  %7816 = vst [vmem:[#allocation41_spill] sm:$0xff] %v6460_v3  ;;  %3525 = vmatmul.mubr.bf16.vlgmr.msra.gmra.mxu1 %v3330_v0  ;;  %v1165_v51 = vrot.slane %v1086_v63, 7  ;;  %v1593_v56 = vpack.c.bf16 %v1086_v63, %v1084_v43 }
 0x22d   : > { %7817 = vst [vmem:[#allocation42_spill] sm:$0xff] %v6462_v33  ;;  %v1396_v47 = vrot.slane %v1086_v63, 1  ;;  %v1134_v20 = vrot.slane %v1085_v32, 7  ;;  %v1166_v61 = vrot.slane %v1087_v2, 7  ;;  %v1397_v58 = vrot.slane %v1087_v2, 1  ;;  %v7853_v3 = vld [vmem:[#allocation61_spill] sm:$0xff] }
 0x22e   : > { %4735 = verf.f32 %v3078_v8  ;;  %v1365_v5 = vrot.slane %v1085_v32, 1  ;;  %v1198_v7 = vsel %vm1177_vm0, %v1133_v57, %v1165_v51  ;;  %v1230_v15 = vsel %vm1177_vm0, %v1165_v51, %v1133_v57  ;;  %v745_v8 = vpop.f32.mrf.mxu0 }
 0x22f   : > { %4737 = verf.f32 %v3080_v53  ;;  %v1461_v38 = vsel %vm1408_vm1, %v1396_v47, %v1364_v52  ;;  %v1286_v36 = vsel %vm1111_vm2, %v1230_v15, 0.0  ;;  %v1429_v6 = vsel %vm1408_vm1, %v1364_v52, %v1396_v47 }
 0x230   : > { %v1519_v10 = vsel %vm1343_vm3, %v1461_v38, 0.0  ;;  %v1330_v1 = vpack.c.bf16 %v1198_v7, %v1286_v36  ;;  %v7818_v19 = vmov %v7814_v22  ;;  %v1024_v13 = vadd.f32 1.0, %v4728_v62 }
 0x231   : > { %v3014_v29 = vmul.f32 0.5, %v7818_v19  ;;  %v898_v24 = vmul.f32 0.70710677, %v6396_v23  ;;  %v1199_v4 = vsel %vm1177_vm0, %v1134_v20, %v1166_v61  ;;  %v1231_v50 = vsel %vm1177_vm0, %v1166_v61, %v1134_v20 }
 0x232   : > { %v1462_v54 = vsel %vm1408_vm1, %v1397_v58, %v1365_v5  ;;  %v6486_v57 = vpack.c.bf16 %v1087_v2, %v1085_v32  ;;  %v6488_v48 = vpack.c.bf16 %v1519_v10, %v1429_v6  ;;  %v1695_v43 = vmul.bf16 %v5434_v17, %v1330_v1 }
 0x233   : > { %v2140_v49 = vmul.bf16 %v5445_v25, %v1330_v1  ;;  %v1430_v23 = vsel %vm1408_vm1, %v1365_v5, %v1397_v58  ;;  %v1649_v0 = vmul.bf16 %v5431_v16, %v1593_v56  ;;  %v2102_v63 = vmul.bf16 %v5437_v18, %v1593_v56 }
 0x234   : > { %7819 = vst [vmem:[#allocation45_spill] sm:$0xff] %v6488_v48  ;;  %v1287_v22 = vsel %vm1111_vm2, %v1231_v50, 0.0  ;;  %v1520_v32 = vsel %vm1343_vm3, %v1462_v54, 0.0  ;;  %v2515_v41 = vmul.bf16 %v5471_v42, %v1593_v56  ;;  %v2553_v53 = vmul.bf16 %v5475_v46, %v1330_v1  ;;  %v749_v56 = vpop.f32.mrf.mxu0 }
 0x235   : > { %v6502_v2 = vpack.c.bf16 %v1199_v4, %v1287_v22  ;;  %v7820_v52 = vunpack.c.l.bf16 %v6398_v9  ;;  %v4730_v47 = vpop.eup %4729  ;;  %v1727_v62 = vadd.bf16 %v1695_v43, %v1649_v0  ;;  %v2170_v20 = vadd.bf16 %v2140_v49, %v2102_v63 }
 0x236   : > { %v6506_v61 = vpack.c.bf16 %v1520_v32, %v1430_v23  ;;  %4739 = verf.f32 %v898_v24  ;;  %v4732_v58 = vpop.eup %4731  ;;  %v1767_v5 = vmul.bf16 %v5440_v21, %v6488_v48  ;;  %v3207_v7 = vadd.f32 1.0, %v4730_v47 }
 0x237   : > { %v3016_v51 = vmul.f32 0.5, %v7820_v52  ;;  %v1650_v15 = vmul.bf16 %v5450_v27, %v6486_v57  ;;  %v1696_v38 = vmul.bf16 %v5456_v30, %v6502_v2  ;;  %v2208_v9 = vmul.bf16 %v5448_v26, %v6488_v48  ;;  %v751_v52 = vpop.f32.mrf.mxu0 }
 0x238   : > { %7821 = vst [vmem:[#allocation89_spill] sm:$0xff] %v6506_v61  ;;  %v3209_v36 = vadd.f32 1.0, %v4732_v58  ;;  %v2141_v6 = vmul.bf16 %v5464_v34, %v6502_v2  ;;  %v6519_v10 = vmul.f32 %v1024_v13, %v6403_v45  ;;  %v4734_v1 = vpop.eup %4733  ;;  %v6521_v19 = vadd.bf16 %v2553_v53, %v2515_v41  ;;  %v7826_v58 = vld [vmem:[#allocation23_spill] sm:$0xff] }
 0x239   : > { %v3271_v24 = vmul.f32 %v3207_v7, %v6441_v37  ;;  %v2103_v4 = vmul.bf16 %v5453_v28, %v6486_v57  ;;  %v2516_v50 = vmul.bf16 %v5473_v44, %v6486_v57  ;;  %v6528_v43 = vadd.bf16 %v1767_v5, %v1727_v62  ;;  %v7825_v62 = vld [vmem:[#allocation43_spill] sm:$0xff] }
 0x23a   : > { %7822 = vst [vmem:[#allocation90_spill] sm:$0xff] %v6521_v19  ;;  %v6530_v49 = vadd.bf16 %v2208_v9, %v2170_v20  ;;  %v3273_v45 = vmul.f32 %v3209_v36, %v6444_v40  ;;  %v1768_v13 = vmul.bf16 %v5458_v31, %v6506_v61  ;;  %v1728_v0 = vadd.bf16 %v1696_v38, %v1650_v15  ;;  %v7828_v38 = vld [vmem:[#allocation37_spill] sm:$0xff]  ;;  %v7829_v36 = vld [vmem:[#allocation52_spill] sm:$0xff] }
 0x23b   : > { %v4736_v54 = vpop.eup %4735  ;;  %7823 = vst [vmem:[#allocation91_spill] sm:$0xff] %v6528_v43  ;;  %v2209_v37 = vmul.bf16 %v5467_v35, %v6506_v61  ;;  %v2554_v63 = vmul.bf16 %v5480_v55, %v6502_v2  ;;  %v2171_v32 = vadd.bf16 %v2141_v6, %v2103_v4  ;;  %v1135_v53 = vrot.slane %v6519_v10, 7  ;;  %v7827_v2 = vld [vmem:[#allocation40_spill] sm:$0xff]  ;;  %v7836_v43 = vld [vmem:[#allocation38_spill] sm:$0xff]  ;;  %v7838_v19 = vld [vmem:[#allocation57_spill] sm:$0xff] }
 0x23c   : > { %7824 = vst [vmem:[#allocation92_spill] sm:$0xff] %v6530_v49  ;;  %v4738_v23 = vpop.eup %4737  ;;  %v3206_v22 = vadd.f32 1.0, %v4736_v54  ;;  %v3333_v57 = vpack.c.bf16 %v3273_v45, %v3271_v24  ;;  %v1025_v40 = vadd.f32 1.0, %v4734_v1  ;;  %v1854_v20 = vadd.bf16 %v6324_v59, %v7825_v62  ;;  %v7830_v6 = vld [vmem:[#allocation16_spill] sm:$0xff]  ;;  %v7832_v1 = vld [vmem:[#allocation86_spill] sm:$0xff]  ;;  %v753_v49 = vpop.f32.mrf.mxu0 }
 0x23d   : > { %v3208_v41 = vadd.f32 1.0, %v4738_v23  ;;  %v1855_v5 = vadd.bf16 %v6327_v12, %v7826_v58  ;;  %v1366_v15 = vrot.slane %v6519_v10, 1  ;;  %v4274_v9 = vcombine.low %v7828_v38, %v7827_v2  ;;  %v7833_v23 = vld [vmem:[#allocation18_spill] sm:$0xff] }
 0x23e   : > { %v3270_v47 = vmul.f32 %v3206_v22, %v3014_v29  ;;  %3532 = vmatprep.mubr.bf16.mxu1 %v3333_v57  ;;  %v2618_v24 = vmul.bf16 %v7830_v6, %v7829_v36  ;;  %v7831_v29 = vld [vmem:[#allocation53_spill] sm:$0xff]  ;;  %v746_v22 = vadd.f32 %v745_v8, %v7833_v23  ;;  %v4275_v57 = vcombine.high %v7828_v38, %v7827_v2 }
 0x23f   : > { %v3272_v7 = vmul.f32 %v3208_v41, %v3016_v51  ;;  %v4244_v4 = vcombine.low %v1854_v20, %v1855_v5  ;;  %v4245_v54 = vcombine.high %v1854_v20, %v1855_v5  ;;  %v2619_v45 = vmul.bf16 %v7832_v1, %v7831_v29  ;;  %v7834_v51 = vld [vmem:[#allocation17_spill] sm:$0xff]  ;;  %v7837_v20 = vld [vmem:[#allocation54_spill] sm:$0xff] }
 0x240   : > { %v750_v41 = vadd.f32 %v749_v56, %v7834_v51  ;;  %v752_v58 = vadd.f32 %v751_v52, %v7833_v23  ;;  %v6556_v33 = vadd.bf16 %v1768_v13, %v1728_v0  ;;  %v6559_v36 = vmul.f32 %v1025_v40, %v7836_v43 }
 0x241   : > { %v3332_v62 = vpack.c.bf16 %v3272_v7, %v3270_v47  ;;  %v2648_v5 = vadd.bf16 %v2618_v24, %v7837_v20  ;;  %v2649_v29 = vadd.bf16 %v2619_v45, %v7838_v19  ;;  %v2431_v8 = vadd.bf16 %v4274_v9, %v4244_v4  ;;  %v7841_v4 = vld [vmem:[#allocation34_spill] sm:$0xff] }
 0x242   : > { %7835 = vst [vmem:[#allocation43_spill] sm:$0xff] %v6556_v33  ;;  %v2432_v47 = vadd.bf16 %v4275_v57, %v4245_v54  ;;  %v899_v7 = vmul.f32 0.70710677, %v746_v22  ;;  %v900_v61 = vmul.f32 0.70710677, %v750_v41  ;;  %v754_v52 = vadd.f32 %v753_v49, %v7834_v51 }
 0x243   : > { %3533 = vmatmul.mubr.bf16.gmra.mxu1 %v3332_v62  ;;  %v4740_v2 = vpop.eup %4739  ;;  %v4308_v38 = vcombine.low %v2648_v5, %v2649_v29  ;;  %v4309_v56 = vcombine.high %v2648_v5, %v2649_v29  ;;  %v901_v48 = vmul.f32 0.70710677, %v752_v58  ;;  %v6564_v13 = vadd.bf16 %v2209_v37, %v2171_v32  ;;  %v7842_v32 = vld [vmem:[#allocation55_spill] sm:$0xff] }
 0x244   : > { %v6566_v0 = vadd.bf16 %v2554_v63, %v2516_v50  ;;  %v1026_v43 = vadd.f32 1.0, %v4740_v2  ;;  %4741 = verf.f32 %v899_v7  ;;  %v902_v45 = vmul.f32 0.70710677, %v754_v52 }
 0x245   : > { %7839 = vst [vmem:[#allocation23_spill] sm:$0xff] %v6564_v13  ;;  %v2858_v19 = vadd.bf16 %v4308_v38, %v2431_v8  ;;  %v2859_v24 = vadd.bf16 %v4309_v56, %v2432_v47  ;;  %4743 = verf.f32 %v900_v61  ;;  %v835_v49 = vmul.f32 0.5, %v746_v22  ;;  %v7843_v8 = vld [vmem:[#allocation58_spill] sm:$0xff] }
 0x246   : > { %7840 = vst [vmem:[#allocation40_spill] sm:$0xff] %v6566_v0  ;;  %v1090_v54 = vmul.f32 %v1026_v43, %v7841_v4  ;;  %4745 = verf.f32 %v901_v48  ;;  %v6571_v37 = vmul.f32 0.5, %v750_v41  ;;  %v6575_v20 = vadd.bf16 %v6324_v59, %v7842_v32 }
 0x247   : > { %v2955_v62 = vunpack.c.h.bf16 %v2858_v19  ;;  %v2957_v57 = vunpack.c.h.bf16 %v2859_v24  ;;  %4747 = verf.f32 %v902_v45  ;;  %v2954_v29 = vunpack.c.l.bf16 %v2858_v19 }
 0x248   : > { %v1167_v50 = vrot.slane %v1090_v54, 7  ;;  %v1398_v63 = vrot.slane %v1090_v54, 1  ;;  %v1857_v47 = vadd.bf16 %v6327_v12, %v7843_v8  ;;  %v1595_v7 = vpack.c.bf16 %v1090_v54, %v6519_v10 }
 0x249   : > { %v3083_v5 = vmul.f32 0.70710677, %v2955_v62  ;;  %v3085_v61 = vmul.f32 0.70710677, %v2957_v57  ;;  %v2956_v43 = vunpack.c.l.bf16 %v2859_v24  ;;  %v837_v4 = vmul.f32 0.5, %v752_v58  ;;  %v755_v24 = vpop.f32.mrf.mxu0 }
 0x24a   : > { %v1200_v48 = vsel %vm1177_vm0, %v1135_v53, %v1167_v50  ;;  %v1232_v22 = vsel %vm1177_vm0, %v1167_v50, %v1135_v53  ;;  %v1463_v41 = vsel %vm1408_vm1, %v1398_v63, %v1366_v15  ;;  %v1431_v38 = vsel %vm1408_vm1, %v1366_v15, %v1398_v63 }
 0x24b   : > { %v1290_v2 = vsel %vm1111_vm2, %v1232_v22, 0.0  ;;  %v1523_v56 = vsel %vm1343_vm3, %v1463_v41, 0.0  ;;  %4749 = verf.f32 %v3083_v5  ;;  %v6592_v45 = vmul.f32 0.5, %v754_v52 }
 0x24c   : > { %v1332_v19 = vpack.c.bf16 %v1200_v48, %v1290_v2  ;;  %v6594_v53 = vmul.f32 0.5, %v2955_v62  ;;  %4751 = verf.f32 %v3085_v61  ;;  %v3082_v50 = vmul.f32 0.70710677, %v2954_v29 }
 0x24d   : > { %v4246_v10 = vcombine.low %v6575_v20, %v1857_v47  ;;  %v6597_v54 = vpack.c.bf16 %v1523_v56, %v1431_v38  ;;  %v1651_v32 = vmul.bf16 %v5431_v16, %v1595_v7  ;;  %v2104_v5 = vmul.bf16 %v5437_v18, %v1595_v7  ;;  %v7845_v38 = vld [vmem:[#allocation62_spill] sm:$0xff] }
 0x24e   : > { %v1697_v15 = vmul.bf16 %v5434_v17, %v1332_v19  ;;  %v2142_v63 = vmul.bf16 %v5445_v25, %v1332_v19  ;;  %v6603_v58 = vmul.f32 0.5, %v2957_v57  ;;  %v3084_v52 = vmul.f32 0.70710677, %v2956_v43 }
 0x24f   : > { %7844 = vst [vmem:[#allocation37_spill] sm:$0xff] %v6597_v54  ;;  %4753 = verf.f32 %v3082_v50  ;;  %v2517_v61 = vmul.bf16 %v5471_v42, %v1595_v7  ;;  %v2555_v8 = vmul.bf16 %v5475_v46, %v1332_v19  ;;  %v6607_v48 = vmul.f32 0.5, %v2954_v29  ;;  %v759_v29 = vpop.f32.mrf.mxu0 }
 0x250   : > { %v1729_v62 = vadd.bf16 %v1697_v15, %v1651_v32  ;;  %v2172_v41 = vadd.bf16 %v2142_v63, %v2104_v5  ;;  %v6609_v2 = vmul.f32 0.5, %v2956_v43  ;;  %4755 = verf.f32 %v3084_v52  ;;  %v7846_v63 = vld [vmem:[#allocation26_spill] sm:$0xff]  ;;  %v7847_v43 = vld [vmem:[#allocation44_spill] sm:$0xff] }
 0x251   : > { %v4742_v22 = vpop.eup %4741  ;;  %v2621_v56 = vmul.bf16 %v7832_v1, %v7845_v38  ;;  %v1769_v57 = vmul.bf16 %v5440_v21, %v6597_v54  ;;  %v2210_v50 = vmul.bf16 %v5448_v26, %v6597_v54  ;;  %v4247_v19 = vcombine.high %v6575_v20, %v1857_v47  ;;  %v7848_v52 = vld [vmem:[#allocation60_spill] sm:$0xff]  ;;  %v7849_v38 = vld [vmem:[#allocation65_spill] sm:$0xff] }
 0x252   : > { %v4744_v9 = vpop.eup %4743  ;;  %v1027_v7 = vadd.f32 1.0, %v4742_v22  ;;  %v4276_v5 = vcombine.low %v7847_v43, %v7846_v63  ;;  %v2620_v40 = vmul.bf16 %v7830_v6, %v7848_v52  ;;  %v6627_v33 = vadd.bf16 %v2555_v8, %v2517_v61 }
 0x253   : > { %v4746_v32 = vpop.eup %4745  ;;  %v1028_v15 = vadd.f32 1.0, %v4744_v9  ;;  %v6623_v13 = vadd.bf16 %v2621_v56, %v7849_v38  ;;  %v6625_v0 = vadd.bf16 %v1769_v57, %v1729_v62  ;;  %v4277_v20 = vcombine.high %v7847_v43, %v7846_v63  ;;  %v761_v62 = vpop.f32.mrf.mxu0 }
 0x254   : > { %7851 = vst [vmem:[#allocation16_spill] sm:$0xff] %v6627_v33  ;;  %v1091_v54 = vmul.f32 %v1027_v7, %v835_v49  ;;  %v4748_v47 = vpop.eup %4747  ;;  %v6631_v22 = vadd.bf16 %v2210_v50, %v2172_v41  ;;  %v1029_v9 = vadd.f32 1.0, %v4746_v32  ;;  %v2433_v60 = vadd.bf16 %v4276_v5, %v4246_v10  ;;  %v7879_v33 = vld [vmem:[#allocation46_spill] sm:$0xff] }
 0x255   : > { %7850 = vst [vmem:[#allocation52_spill] sm:$0xff] %v6625_v0  ;;  %v2650_v11 = vadd.bf16 %v2620_v40, %v7853_v3  ;;  %v1092_v56 = vmul.f32 %v1028_v15, %v6571_v37  ;;  %v2434_v38 = vadd.bf16 %v4277_v20, %v4247_v19  ;;  %v1030_v57 = vadd.f32 1.0, %v4748_v47 }
 0x256   : > { %7852 = vst [vmem:[#allocation53_spill] sm:$0xff] %v6631_v22  ;;  %v1168_v1 = vrot.slane %v1091_v54, 7  ;;  %v1399_v52 = vrot.slane %v1091_v54, 1  ;;  %v6637_v49 = vadd.f32 %v755_v24, %v7833_v23  ;;  %v6640_v8 = vadd.f32 %v759_v29, %v7834_v51  ;;  %v7870_v22 = vld [vmem:[#allocation86_spill] sm:$0xff] }
 0x257   : > { %v4310_v61 = vcombine.low %v2650_v11, %v6623_v13  ;;  %v7854_v41 = vrot.slane %v6559_v36, 7  ;;  %v7856_v10 = vrot.slane %v6559_v36, 1  ;;  %v4311_v24 = vcombine.high %v2650_v11, %v6623_v13 }
 0x258   : > { %v4750_v7 = vpop.eup %4749  ;;  %v1596_v29 = vpack.c.bf16 %v1091_v54, %v6559_v36  ;;  %v6658_v32 = vmul.f32 %v1029_v9, %v837_v4  ;;  %v6661_v15 = vadd.f32 %v761_v62, %v7833_v23  ;;  %v1137_v5 = vrot.slane %v1092_v56, 7 }
 0x259   : > { %v1201_v3 = vsel %vm1177_vm0, %v7854_v41, %v1168_v1  ;;  %v7855_v40 = vmov %v7854_v41  ;;  %v1464_v50 = vsel %vm1408_vm1, %v1399_v52, %v7856_v10  ;;  %v4752_v63 = vpop.eup %4751  ;;  %v1368_v20 = vrot.slane %v1092_v56, 1 }
 0x25a   : > { %v1233_v37 = vsel %vm1177_vm0, %v1168_v1, %v7855_v40  ;;  %v3211_v1 = vadd.f32 1.0, %v4750_v7  ;;  %v3213_v47 = vadd.f32 1.0, %v4752_v63  ;;  %v7857_v41 = vmov %v7856_v10 }
 0x25b   : > { %v1291_v19 = vsel %vm1111_vm2, %v1233_v37, 0.0  ;;  %v1432_v11 = vsel %vm1408_vm1, %v7857_v41, %v1399_v52  ;;  %v1524_v13 = vsel %vm1343_vm3, %v1464_v50, 0.0  ;;  %v1094_v4 = vmul.f32 %v1030_v57, %v6592_v45 }
 0x25c   : > { %v1333_v43 = vpack.c.bf16 %v1201_v3, %v1291_v19  ;;  %v4754_v54 = vpop.eup %4753  ;;  %v3275_v9 = vmul.f32 %v3211_v1, %v6594_v53  ;;  %v6673_v40 = vadd.bf16 %v4310_v61, %v2433_v60  ;;  %v3277_v37 = vmul.f32 %v3213_v47, %v6603_v58  ;;  %v763_v61 = vpop.f32.mrf.mxu0 }
 0x25d   : > { %v1652_v36 = vmul.bf16 %v5450_v27, %v1596_v29  ;;  %v2105_v52 = vmul.bf16 %v5453_v28, %v1596_v29  ;;  %v3210_v10 = vadd.f32 1.0, %v4754_v54  ;;  %v4756_v7 = vpop.eup %4755  ;;  %v6678_v50 = vpack.c.bf16 %v1524_v13, %v1432_v11 }
 0x25e   : > { %v1698_v62 = vmul.bf16 %v5456_v30, %v1333_v43  ;;  %v2143_v3 = vmul.bf16 %v5464_v34, %v1333_v43  ;;  %v2518_v45 = vmul.bf16 %v5473_v44, %v1596_v29  ;;  %v1169_v57 = vrot.slane %v1094_v4, 7 }
 0x25f   : > { %7858 = vst [vmem:[#allocation18_spill] sm:$0xff] %v6678_v50  ;;  %v1400_v53 = vrot.slane %v1094_v4, 1  ;;  %v3335_v19 = vpack.c.bf16 %v3277_v37, %v3275_v9  ;;  %v2556_v63 = vmul.bf16 %v5480_v55, %v1333_v43  ;;  %v3212_v1 = vadd.f32 1.0, %v4756_v7 }
 0x260   : > { %v3274_v60 = vmul.f32 %v3210_v10, %v6607_v48  ;;  %v1730_v58 = vadd.bf16 %v1698_v62, %v1652_v36  ;;  %v2173_v47 = vadd.bf16 %v2143_v3, %v2105_v52  ;;  %v1202_v41 = vsel %vm1177_vm0, %v1137_v5, %v1169_v57  ;;  %v765_v52 = vpop.f32.mrf.mxu0 }
 0x261   : > { %v1234_v11 = vsel %vm1177_vm0, %v1169_v57, %v1137_v5  ;;  %3540 = vmatprep.mubr.bf16.mxu1 %v3335_v19  ;;  %v3276_v29 = vmul.f32 %v3212_v1, %v6609_v2  ;;  %v1433_v43 = vsel %vm1408_vm1, %v1368_v20, %v1400_v53  ;;  %v1465_v48 = vsel %vm1408_vm1, %v1400_v53, %v1368_v20 }
 0x262   : > { %v1294_v13 = vsel %vm1111_vm2, %v1234_v11, 0.0  ;;  %v1527_v9 = vsel %vm1343_vm3, %v1465_v48, 0.0  ;;  %v1597_v62 = vpack.c.bf16 %v1094_v4, %v1092_v56  ;;  %v6696_v3 = vadd.bf16 %v4311_v24, %v2434_v38 }
 0x263   : > { %v1334_v54 = vpack.c.bf16 %v1202_v41, %v1294_v13  ;;  %v1770_v5 = vmul.bf16 %v5458_v31, %v6678_v50  ;;  %v2211_v2 = vmul.bf16 %v5467_v35, %v6678_v50  ;;  %v3334_v37 = vpack.c.bf16 %v3276_v29, %v3274_v60 }
 0x264   : > { %v2959_v36 = vunpack.c.h.bf16 %v6673_v40  ;;  %v6705_v7 = vpack.c.bf16 %v1527_v9, %v1433_v43  ;;  %v6712_v4 = vadd.bf16 %v2556_v63, %v2518_v45  ;;  %v1653_v53 = vmul.bf16 %v5431_v16, %v1597_v62  ;;  %v769_v63 = vpop.f32.mrf.mxu0 }
 0x265   : > { %v1699_v56 = vmul.bf16 %v5434_v17, %v1334_v54  ;;  %v6708_v38 = vadd.bf16 %v1770_v5, %v1730_v58  ;;  %v6710_v24 = vadd.bf16 %v2211_v2, %v2173_v47  ;;  %3541 = vmatmul.mubr.bf16.gmra.mxu1 %v3334_v37  ;;  %v2144_v57 = vmul.bf16 %v5445_v25, %v1334_v54 }
 0x266   : > { %7859 = vst [vmem:[#allocation17_spill] sm:$0xff] %v6705_v7  ;;  %7862 = vst [vmem:[#allocation57_spill] sm:$0xff] %v6712_v4  ;;  %v2106_v19 = vmul.bf16 %v5437_v18, %v1597_v62  ;;  %v2961_v1 = vunpack.c.h.bf16 %v6696_v3  ;;  %v6719_v60 = vmul.f32 0.5, %v6637_v49  ;;  %v2557_v41 = vmul.bf16 %v5475_v46, %v1334_v54 }
 0x267   : > { %7860 = vst [vmem:[#allocation38_spill] sm:$0xff] %v6708_v38  ;;  %7861 = vst [vmem:[#allocation54_spill] sm:$0xff] %v6710_v24  ;;  %v3087_v58 = vmul.f32 0.70710677, %v2959_v36  ;;  %v903_v47 = vmul.f32 0.70710677, %v6637_v49  ;;  %v2958_v45 = vunpack.c.l.bf16 %v6673_v40  ;;  %v1731_v11 = vadd.bf16 %v1699_v56, %v1653_v53  ;;  %v771_v56 = vpop.f32.mrf.mxu0 }
 0x268   : > { %v1771_v29 = vmul.bf16 %v5440_v21, %v6705_v7  ;;  %v2519_v13 = vmul.bf16 %v5471_v42, %v1597_v62  ;;  %v3089_v43 = vmul.f32 0.70710677, %v2961_v1  ;;  %v2174_v48 = vadd.bf16 %v2144_v57, %v2106_v19  ;;  %v7865_v19 = vld [vmem:[#allocation67_spill] sm:$0xff] }
 0x269   : > { %4757 = verf.f32 %v3087_v58  ;;  %v2960_v9 = vunpack.c.l.bf16 %v6696_v3  ;;  %v3086_v5 = vmul.f32 0.70710677, %v2958_v45  ;;  %v2212_v54 = vmul.bf16 %v5448_v26, %v6705_v7  ;;  %v7864_v3 = vld [vmem:[#allocation63_spill] sm:$0xff] }
 0x26a   : > { %v6730_v2 = vmul.f32 0.5, %v2959_v36  ;;  %4759 = verf.f32 %v3089_v43  ;;  %v904_v49 = vmul.f32 0.70710677, %v6640_v8  ;;  %v6733_v40 = vadd.bf16 %v2557_v41, %v2519_v13 }
 0x26b   : > { %4761 = verf.f32 %v903_v47  ;;  %v3088_v37 = vmul.f32 0.70710677, %v2960_v9  ;;  %v905_v62 = vmul.f32 0.70710677, %v6661_v15  ;;  %v764_v57 = vadd.f32 %v763_v61, %v7834_v51  ;;  %v7868_v61 = vld [vmem:[#allocation66_spill] sm:$0xff] }
 0x26c   : > { %7863 = vst [vmem:[#allocation34_spill] sm:$0xff] %v6733_v40  ;;  %4763 = verf.f32 %v3086_v5  ;;  %v1858_v53 = vadd.bf16 %v6324_v59, %v7864_v3  ;;  %v1859_v36 = vadd.bf16 %v6327_v12, %v7865_v19  ;;  %v6741_v58 = vadd.bf16 %v1771_v29, %v1731_v11  ;;  %v7869_v3 = vld [vmem:[#allocation69_spill] sm:$0xff]  ;;  %v773_v19 = vpop.f32.mrf.mxu0  ;;  %v7871_v11 = vld [vmem:[#allocation59_spill] sm:$0xff]  ;;  %v7872_v29 = vld [vmem:[#allocation56_spill] sm:$0xff] }
 0x26d   : > { %v6743_v43 = vadd.bf16 %v2212_v54, %v2174_v48  ;;  %v3025_v41 = vmul.f32 0.5, %v2961_v1  ;;  %4765 = verf.f32 %v3088_v37  ;;  %v6745_v47 = vmul.f32 0.5, %v2958_v45 }
 0x26e   : > { %7866 = vst [vmem:[#allocation55_spill] sm:$0xff] %v6741_v58  ;;  %4767 = verf.f32 %v904_v49  ;;  %v906_v13 = vmul.f32 0.70710677, %v764_v57  ;;  %v4248_v20 = vcombine.low %v1858_v53, %v1859_v36  ;;  %v4249_v5 = vcombine.high %v1858_v53, %v1859_v36  ;;  %v7873_v49 = vld [vmem:[#allocation71_spill] sm:$0xff] }
 0x26f   : > { %7867 = vst [vmem:[#allocation58_spill] sm:$0xff] %v6743_v43  ;;  %4769 = verf.f32 %v905_v62  ;;  %v2622_v10 = vmul.bf16 %v7830_v6, %v7868_v61  ;;  %v2623_v24 = vmul.bf16 %v7870_v22, %v7869_v3  ;;  %v4278_v48 = vcombine.low %v7872_v29, %v7871_v11  ;;  %v7874_v62 = vld [vmem:[#allocation73_spill] sm:$0xff] }
 0x270   : > { %4771 = verf.f32 %v906_v13  ;;  %v766_v1 = vadd.f32 %v765_v52, %v7833_v23  ;;  %v770_v45 = vadd.f32 %v769_v63, %v7834_v51  ;;  %v4279_v54 = vcombine.high %v7872_v29, %v7871_v11 }
 0x271   : > { %v2652_v37 = vadd.bf16 %v2622_v10, %v7873_v49  ;;  %v2653_v53 = vadd.bf16 %v2623_v24, %v7874_v62  ;;  %v772_v36 = vadd.f32 %v771_v56, %v7833_v23  ;;  %v6761_v61 = vmul.f32 0.5, %v6640_v8 }
 0x272   : > { %v2435_v13 = vadd.bf16 %v4278_v48, %v4248_v20  ;;  %v907_v3 = vmul.f32 0.70710677, %v766_v1  ;;  %v774_v43 = vadd.f32 %v773_v19, %v7834_v51  ;;  %v2436_v58 = vadd.bf16 %v4279_v54, %v4249_v5 }
 0x273   : > { %v4312_v52 = vcombine.low %v2652_v37, %v2653_v53  ;;  %v4313_v40 = vcombine.high %v2652_v37, %v2653_v53  ;;  %v908_v63 = vmul.f32 0.70710677, %v770_v45  ;;  %v3024_v7 = vmul.f32 0.5, %v2960_v9  ;;  %v7876_v37 = vld [vmem:[#allocation28_spill] sm:$0xff] }
 0x274   : > { %v6765_v11 = vmul.f32 0.5, %v6661_v15  ;;  %v6767_v10 = vmul.f32 0.5, %v764_v57  ;;  %v909_v24 = vmul.f32 0.70710677, %v772_v36  ;;  %v6773_v8 = vmul.f32 0.5, %v766_v1  ;;  %v7875_v1 = vld [vmem:[#allocation70_spill] sm:$0xff] }
 0x275   : > { %v6769_v29 = vadd.bf16 %v4312_v52, %v2435_v13  ;;  %v6771_v56 = vadd.bf16 %v4313_v40, %v2436_v58  ;;  %v6775_v20 = vmul.f32 0.5, %v770_v45  ;;  %4773 = verf.f32 %v907_v3  ;;  %v7877_v13 = vld [vmem:[#allocation68_spill] sm:$0xff] }
 0x276   : > { %v4758_v19 = vpop.eup %4757  ;;  %v6777_v5 = vmul.f32 0.5, %v772_v36  ;;  %v6779_v48 = vmul.f32 0.5, %v774_v43  ;;  %v910_v9 = vmul.f32 0.70710677, %v774_v43  ;;  %4775 = verf.f32 %v908_v63  ;;  %v7878_v3 = vld [vmem:[#allocation64_spill] sm:$0xff] }
 0x277   : > { %v4760_v15 = vpop.eup %4759  ;;  %v3215_v54 = vadd.f32 1.0, %v4758_v19  ;;  %v2963_v57 = vunpack.c.h.bf16 %v6769_v29  ;;  %v2965_v49 = vunpack.c.h.bf16 %v6771_v56  ;;  %4777 = verf.f32 %v909_v24 }
 0x278   : > { %v4762_v40 = vpop.eup %4761  ;;  %v3217_v58 = vadd.f32 1.0, %v4760_v15  ;;  %v6785_v45 = vadd.bf16 %v6324_v59, %v7875_v1  ;;  %v6789_v62 = vadd.bf16 %v6327_v12, %v7876_v37  ;;  %4779 = verf.f32 %v910_v9 }
 0x279   : > { %v4764_v53 = vpop.eup %4763  ;;  %v3279_v43 = vmul.f32 %v3215_v54, %v6730_v2  ;;  %v1031_v36 = vadd.f32 1.0, %v4762_v40  ;;  %v3091_v0 = vmul.f32 0.70710677, %v2963_v57  ;;  %v3093_v1 = vmul.f32 0.70710677, %v2965_v49 }
 0x27a   : > { %v4766_v19 = vpop.eup %4765  ;;  %v3281_v24 = vmul.f32 %v3217_v58, %v3025_v41  ;;  %v3214_v15 = vadd.f32 1.0, %v4764_v53  ;;  %v7643_v52 = vunpack.c.l.bf16 %v6769_v29  ;;  %v7642_v9 = vunpack.c.l.bf16 %v6771_v56 }
 0x27b   : > { %v4768_v38 = vpop.eup %4767  ;;  %v1095_v4 = vmul.f32 %v1031_v36, %v6719_v60  ;;  %v3216_v37 = vadd.f32 1.0, %v4766_v19  ;;  %4781 = verf.f32 %v3091_v0  ;;  %v7880_v19 = vrot.slane %v6658_v32, 7 }
 0x27c   : > { %v4770_v54 = vpop.eup %4769  ;;  %v3337_v40 = vpack.c.bf16 %v3281_v24, %v3279_v43  ;;  %v1032_v50 = vadd.f32 1.0, %v4768_v38  ;;  %v3278_v58 = vmul.f32 %v3214_v15, %v6745_v47  ;;  %4783 = verf.f32 %v3093_v1 }
 0x27d   : > { %v4772_v63 = vpop.eup %4771  ;;  %v1170_v12 = vrot.slane %v1095_v4, 7  ;;  %v1401_v41 = vrot.slane %v1095_v4, 1  ;;  %v3280_v53 = vmul.f32 %v3216_v37, %v3024_v7  ;;  %v1598_v60 = vpack.c.bf16 %v1095_v4, %v6658_v32 }
 0x27e   : > { %3548 = vmatprep.mubr.bf16.mxu1 %v3337_v40  ;;  %v1034_v36 = vadd.f32 1.0, %v4772_v63  ;;  %v7881_v38 = vmov %v7880_v19  ;;  %v7882_v47 = vrot.slane %v6658_v32, 1  ;;  %v1096_v4 = vmul.f32 %v1032_v50, %v6761_v61 }
 0x27f   : > { %v1203_v0 = vsel %vm1177_vm0, %v7880_v19, %v1170_v12  ;;  %v1235_v43 = vsel %vm1177_vm0, %v1170_v12, %v7881_v38  ;;  %v1033_v37 = vadd.f32 1.0, %v4770_v54  ;;  %v3336_v40 = vpack.c.bf16 %v3280_v53, %v3278_v58 }
 0x280   : > { %v1466_v7 = vsel %vm1408_vm1, %v1401_v41, %v7882_v47  ;;  %v1295_v63 = vsel %vm1111_vm2, %v1235_v43, 0.0  ;;  %v7883_v24 = vmov %v7882_v47  ;;  %v3027_v19 = vmul.f32 0.5, %v2963_v57 }
 0x281   : > { %v1434_v15 = vsel %vm1408_vm1, %v7883_v24, %v1401_v41  ;;  %v1528_v1 = vsel %vm1343_vm3, %v1466_v7, 0.0  ;;  %v1335_v12 = vpack.c.bf16 %v1203_v0, %v1295_v63  ;;  %v1098_v50 = vmul.f32 %v1034_v36, %v6767_v10  ;;  %3549 = vmatmul.mubr.bf16.gmra.mxu1 %v3336_v40 }
 0x282   : > { %v3029_v61 = vmul.f32 0.5, %v2965_v49  ;;  %v6829_v43 = vmul.f32 0.5, %v7643_v52  ;;  %v6833_v32 = vmul.f32 0.5, %v7642_v9  ;;  %v4774_v41 = vpop.eup %4773  ;;  %v6835_v47 = vpack.c.bf16 %v1528_v1, %v1434_v15 }
 0x283   : > { %v1654_v54 = vmul.bf16 %v5450_v27, %v1598_v60  ;;  %v1700_v57 = vmul.bf16 %v5456_v30, %v1335_v12  ;;  %v2145_v58 = vmul.bf16 %v5464_v34, %v1335_v12  ;;  %v6840_v10 = vpop.eup %4775  ;;  %v2107_v49 = vmul.bf16 %v5453_v28, %v1598_v60 }
 0x284   : > { %7884 = vst [vmem:[#allocation62_spill] sm:$0xff] %v6829_v43  ;;  %7885 = vst [vmem:[#allocation26_spill] sm:$0xff] %v6833_v32  ;;  %v1139_v53 = vrot.slane %v1096_v4, 7  ;;  %v1097_v36 = vmul.f32 %v1033_v37, %v6765_v11  ;;  %v1171_v0 = vrot.slane %v1098_v50, 7  ;;  %v6844_v7 = vpop.eup %4777  ;;  %v2558_v24 = vmul.bf16 %v5480_v55, %v1335_v12 }
 0x285   : > { %7886 = vst [vmem:[#allocation44_spill] sm:$0xff] %v6835_v47  ;;  %v1732_v63 = vadd.bf16 %v1700_v57, %v1654_v54  ;;  %v1370_v15 = vrot.slane %v1096_v4, 1  ;;  %v1402_v1 = vrot.slane %v1098_v50, 1  ;;  %v2175_v2 = vadd.bf16 %v2145_v58, %v2107_v49  ;;  %v4780_v54 = vpop.eup %4779 }
 0x286   : > { %v1204_v38 = vsel %vm1177_vm0, %v1139_v53, %v1171_v0  ;;  %v1236_v40 = vsel %vm1177_vm0, %v1171_v0, %v1139_v53  ;;  %v1035_v9 = vadd.f32 1.0, %v4774_v41  ;;  %v1772_v52 = vmul.bf16 %v5458_v31, %v6835_v47 }
 0x287   : > { %v2213_v11 = vmul.bf16 %v5467_v35, %v6835_v47  ;;  %v2520_v37 = vmul.bf16 %v5473_v44, %v1598_v60  ;;  %v1298_v12 = vsel %vm1111_vm2, %v1236_v40, 0.0  ;;  %v1140_v57 = vrot.slane %v1097_v36, 7 }
 0x288   : > { %v1336_v58 = vpack.c.bf16 %v1204_v38, %v1298_v12  ;;  %v1467_v49 = vsel %vm1408_vm1, %v1402_v1, %v1370_v15  ;;  %v1599_v59 = vpack.c.bf16 %v1098_v50, %v1096_v4  ;;  %v4782_v53 = vpop.eup %4781  ;;  %v6860_v41 = vadd.bf16 %v1772_v52, %v1732_v63 }
 0x289   : > { %v6862_v0 = vadd.bf16 %v2558_v24, %v2520_v37  ;;  %v1371_v32 = vrot.slane %v1097_v36, 1  ;;  %v1099_v47 = vmul.f32 %v1035_v9, %v6773_v8  ;;  %v6865_v43 = vadd.bf16 %v2213_v11, %v2175_v2  ;;  %v4784_v12 = vpop.eup %4783 }
 0x28a   : > { %7887 = vst [vmem:[#allocation60_spill] sm:$0xff] %v6860_v41  ;;  %v1435_v60 = vsel %vm1408_vm1, %v1370_v15, %v1402_v1  ;;  %v1531_v38 = vsel %vm1343_vm3, %v1467_v49, 0.0  ;;  %v1701_v40 = vmul.bf16 %v5434_v17, %v1336_v58  ;;  %v2146_v4 = vmul.bf16 %v5445_v25, %v1336_v58 }
 0x28b   : > { %7888 = vst [vmem:[#allocation65_spill] sm:$0xff] %v6862_v0  ;;  %7889 = vst [vmem:[#allocation61_spill] sm:$0xff] %v6865_v43  ;;  %v3219_v52 = vadd.f32 1.0, %v4782_v53  ;;  %v1172_v50 = vrot.slane %v1099_v47, 7  ;;  %v1403_v63 = vrot.slane %v1099_v47, 1  ;;  %v1655_v24 = vmul.bf16 %v5431_v16, %v1599_v59 }
 0x28c   : > { %v2108_v8 = vmul.bf16 %v5437_v18, %v1599_v59  ;;  %v1600_v2 = vpack.c.bf16 %v1099_v47, %v1097_v36  ;;  %v7890_v9 = vunpack.c.l.bf16 %v6769_v29  ;;  %v6877_v15 = vpack.c.bf16 %v1531_v38, %v1435_v60 }
 0x28d   : > { %v3221_v1 = vadd.f32 1.0, %v4784_v12  ;;  %v3283_v37 = vmul.f32 %v3219_v52, %v3027_v19  ;;  %v1205_v49 = vsel %vm1177_vm0, %v1140_v57, %v1172_v50  ;;  %v1733_v43 = vadd.bf16 %v1701_v40, %v1655_v24 }
 0x28e   : > { %v3090_v11 = vmul.f32 0.70710677, %v7890_v9  ;;  %v2559_v53 = vmul.bf16 %v5475_v46, %v1336_v58  ;;  %v1237_v41 = vsel %vm1177_vm0, %v1172_v50, %v1140_v57  ;;  %v1436_v0 = vsel %vm1408_vm1, %v1371_v32, %v1403_v63 }
 0x28f   : > { %v2176_v47 = vadd.bf16 %v2146_v4, %v2108_v8  ;;  %v3285_v36 = vmul.f32 %v3221_v1, %v3029_v61  ;;  %v1299_v29 = vsel %vm1111_vm2, %v1237_v41, 0.0  ;;  %v1468_v19 = vsel %vm1408_vm1, %v1403_v63, %v1371_v32  ;;  %v775_v63 = vpop.f32.mrf.mxu0 }
 0x290   : > { %v1337_v60 = vpack.c.bf16 %v1205_v49, %v1299_v29  ;;  %v1532_v38 = vsel %vm1343_vm3, %v1468_v19, 0.0  ;;  %v1656_v58 = vmul.bf16 %v5450_v27, %v1600_v2  ;;  %v2109_v40 = vmul.bf16 %v5453_v28, %v1600_v2 }
 0x291   : > { %v3339_v57 = vpack.c.bf16 %v3285_v36, %v3283_v37  ;;  %v6894_v12 = vpack.c.bf16 %v1532_v38, %v1436_v0  ;;  %v7891_v4 = vunpack.c.l.bf16 %v6771_v56  ;;  %4785 = verf.f32 %v3090_v11 }
 0x292   : > { %v1702_v41 = vmul.bf16 %v5456_v30, %v1337_v60  ;;  %v2147_v52 = vmul.bf16 %v5464_v34, %v1337_v60  ;;  %v2560_v32 = vmul.bf16 %v5480_v55, %v1337_v60  ;;  %v1036_v50 = vadd.f32 1.0, %v6840_v10  ;;  %v779_v60 = vpop.f32.mrf.mxu0 }
 0x293   : > { %v3092_v61 = vmul.f32 0.70710677, %v7891_v4  ;;  %v1773_v24 = vmul.bf16 %v5440_v21, %v6877_v15  ;;  %v2521_v8 = vmul.bf16 %v5471_v42, %v1599_v59  ;;  %3556 = vmatprep.mubr.bf16.mxu1 %v3339_v57  ;;  %v1037_v56 = vadd.f32 1.0, %v6844_v7 }
 0x294   : > { %v2214_v0 = vmul.bf16 %v5448_v26, %v6877_v15  ;;  %v1734_v9 = vadd.bf16 %v1702_v41, %v1656_v58  ;;  %v2177_v11 = vadd.bf16 %v2147_v52, %v2109_v40  ;;  %v2522_v1 = vmul.bf16 %v5473_v44, %v1600_v2  ;;  %v7898_v40 = vld [vmem:[#allocation47_spill] sm:$0xff]  ;;  %v7899_v52 = vld [vmem:[#allocation74_spill] sm:$0xff] }
 0x295   : > { %4787 = verf.f32 %v3092_v61  ;;  %v6909_v37 = vadd.bf16 %v1773_v24, %v1733_v43  ;;  %v6911_v10 = vadd.bf16 %v2559_v53, %v2521_v8  ;;  %v1100_v49 = vmul.f32 %v1036_v50, %v6775_v20 }
 0x296   : > { %v1038_v36 = vadd.f32 1.0, %v4780_v54  ;;  %v6914_v29 = vadd.bf16 %v2214_v0, %v2176_v47  ;;  %v1774_v59 = vmul.bf16 %v5458_v31, %v6894_v12  ;;  %v2215_v7 = vmul.bf16 %v5467_v35, %v6894_v12 }
 0x297   : > { %7892 = vst [vmem:[#allocation63_spill] sm:$0xff] %v6911_v10  ;;  %v6920_v19 = vadd.bf16 %v2560_v32, %v2522_v1  ;;  %v6923_v2 = vmul.f32 %v1037_v56, %v6777_v5  ;;  %v4251_v20 = vcombine.high %v6785_v45, %v6789_v62  ;;  %v7895_v54 = vcombine.low %v6785_v45, %v6789_v62  ;;  %v7901_v32 = vld [vmem:[#allocation49_spill] sm:$0xff]  ;;  %v781_v56 = vpop.f32.mrf.mxu0 }
 0x298   : > { %7893 = vst [vmem:[#allocation67_spill] sm:$0xff] %v6914_v29  ;;  %v1102_v43 = vmul.f32 %v1038_v36, %v6779_v48  ;;  %v7896_v53 = vcombine.low %v7878_v3, %v7877_v13  ;;  %v6934_v38 = vadd.bf16 %v1774_v59, %v1734_v9  ;;  %v6936_v58 = vadd.bf16 %v2215_v7, %v2177_v11  ;;  %v7919_v29 = vld [vmem:[#allocation27_spill] sm:$0xff] }
 0x299   : > { %7894 = vst [vmem:[#allocation66_spill] sm:$0xff] %v6920_v19  ;;  %v2625_v5 = vmul.bf16 %v7870_v22, %v7898_v40  ;;  %v776_v57 = vadd.f32 %v775_v63, %v7833_v23  ;;  %v1141_v48 = vrot.slane %v1100_v49, 7  ;;  %v1372_v4 = vrot.slane %v1100_v49, 1 }
 0x29a   : > { %v2437_v47 = vadd.bf16 %v7896_v53, %v7895_v54  ;;  %7897 = vst [vmem:[#allocation69_spill] sm:$0xff] %v6936_v58  ;;  %v1173_v61 = vrot.slane %v1102_v43, 7  ;;  %v1404_v41 = vrot.slane %v1102_v43, 1  ;;  %v7900_v45 = vmul.bf16 %v7830_v6, %v7879_v33 }
 0x29b   : > { %v2655_v50 = vadd.bf16 %v2625_v5, %v7901_v32  ;;  %v911_v24 = vmul.f32 0.70710677, %v776_v57  ;;  %v780_v8 = vadd.f32 %v779_v60, %v7834_v51  ;;  %v1601_v11 = vpack.c.bf16 %v1102_v43, %v1100_v49 }
 0x29c   : > { %v2654_v62 = vadd.bf16 %v7900_v45, %v7899_v52  ;;  %v1206_v0 = vsel %vm1177_vm0, %v1141_v48, %v1173_v61  ;;  %v1238_v63 = vsel %vm1177_vm0, %v1173_v61, %v1141_v48  ;;  %v1469_v9 = vsel %vm1408_vm1, %v1404_v41, %v1372_v4 }
 0x29d   : > { %v1302_v36 = vsel %vm1111_vm2, %v1238_v63, 0.0  ;;  %v7902_v59 = vcombine.high %v7878_v3, %v7877_v13  ;;  %v1437_v54 = vsel %vm1408_vm1, %v1372_v4, %v1404_v41  ;;  %v782_v40 = vadd.f32 %v781_v56, %v7833_v23  ;;  %v7903_v56 = vld [vmem:[#allocation62_spill] sm:$0xff] }
 0x29e   : > { %v1338_v60 = vpack.c.bf16 %v1206_v0, %v1302_v36  ;;  %v4314_v53 = vcombine.low %v2654_v62, %v2655_v50  ;;  %v4786_v5 = vpop.eup %4785  ;;  %v1535_v49 = vsel %vm1343_vm3, %v1469_v9, 0.0  ;;  %v4315_v43 = vcombine.high %v2654_v62, %v2655_v50 }
 0x29f   : > { %v2438_v7 = vadd.bf16 %v7902_v59, %v4251_v20  ;;  %4789 = verf.f32 %v911_v24  ;;  %v912_v48 = vmul.f32 0.70710677, %v780_v8  ;;  %v3218_v61 = vadd.f32 1.0, %v4786_v5 }
 0x2a0   : > { %v1657_v52 = vmul.bf16 %v5431_v16, %v1601_v11  ;;  %v6966_v45 = vmul.f32 0.5, %v776_v57  ;;  %v6968_v13 = vmul.f32 0.5, %v780_v8  ;;  %v1703_v20 = vmul.bf16 %v5434_v17, %v1338_v60  ;;  %v7905_v8 = vld [vmem:[#allocation26_spill] sm:$0xff] }
 0x2a1   : > { %v2864_v4 = vadd.bf16 %v4314_v53, %v2437_v47  ;;  %v2865_v41 = vadd.bf16 %v4315_v43, %v2438_v7  ;;  %4791 = verf.f32 %v912_v48  ;;  %v3282_v0 = vmul.f32 %v3218_v61, %v7903_v56  ;;  %v783_v53 = vpop.f32.mrf.mxu0  ;;  %v7911_v56 = vld [vmem:[#allocation85_spill] sm:$0xff] }
 0x2a2   : > { %v4788_v3 = vpop.eup %4787  ;;  %v6972_v63 = vpack.c.bf16 %v1535_v49, %v1437_v54  ;;  %v2148_v62 = vmul.bf16 %v5445_v25, %v1338_v60  ;;  %v2110_v50 = vmul.bf16 %v5437_v18, %v1601_v11  ;;  %v2523_v59 = vmul.bf16 %v5471_v42, %v1601_v11 }
 0x2a3   : > { %v3220_v32 = vadd.f32 1.0, %v4788_v3  ;;  %v2967_v24 = vunpack.c.h.bf16 %v2864_v4  ;;  %v2969_v57 = vunpack.c.h.bf16 %v2865_v41  ;;  %v2966_v9 = vunpack.c.l.bf16 %v2864_v4 }
 0x2a4   : > { %7904 = vst [vmem:[#allocation86_spill] sm:$0xff] %v6972_v63  ;;  %v2561_v47 = vmul.bf16 %v5475_v46, %v1338_v60  ;;  %v2968_v7 = vunpack.c.l.bf16 %v2865_v41  ;;  %v1735_v5 = vadd.bf16 %v1703_v20, %v1657_v52  ;;  %v6979_v54 = vmul.f32 0.5, %v782_v40  ;;  %v7908_v52 = vld [vmem:[#allocation75_spill] sm:$0xff]  ;;  %v7909_v20 = vld [vmem:[#allocation84_spill] sm:$0xff] }
 0x2a5   : > { %v3284_v36 = vmul.f32 %v3220_v32, %v7905_v8  ;;  %v3095_v43 = vmul.f32 0.70710677, %v2967_v24  ;;  %v3097_v48 = vmul.f32 0.70710677, %v2969_v57  ;;  %v1775_v18 = vmul.bf16 %v5440_v21, %v6972_v63  ;;  %v7910_v32 = vld [vmem:[#allocation48_spill] sm:$0xff]  ;;  %v785_v8 = vpop.f32.mrf.mxu0 }
 0x2a6   : > { %v6983_v25 = vadd.bf16 %v2148_v62, %v2110_v50  ;;  %v3094_v61 = vmul.f32 0.70710677, %v2966_v9  ;;  %v3096_v3 = vmul.f32 0.70710677, %v2968_v7  ;;  %v913_v4 = vmul.f32 0.70710677, %v782_v40 }
 0x2a7   : > { %v3338_v49 = vpack.c.bf16 %v3284_v36, %v3282_v0  ;;  %4793 = verf.f32 %v3095_v43  ;;  %v784_v11 = vadd.f32 %v783_v53, %v7834_v51  ;;  %v6986_v60 = vadd.bf16 %v2561_v47, %v2523_v59  ;;  %v7913_v43 = vld [vmem:[#allocation78_spill] sm:$0xff] }
 0x2a8   : > { %7906 = vst [vmem:[#allocation59_spill] sm:$0xff] %v6983_v25  ;;  %4795 = verf.f32 %v3097_v48  ;;  %v1862_v41 = vadd.bf16 %v7909_v20, %v7908_v52  ;;  %v1863_v0 = vadd.bf16 %v7911_v56, %v7910_v32  ;;  %v6992_v36 = vadd.bf16 %v1775_v18, %v1735_v5  ;;  %v7914_v59 = vld [vmem:[#allocation22_spill] sm:$0xff]  ;;  %v7917_v18 = vld [vmem:[#allocation51_spill] sm:$0xff] }
 0x2a9   : > { %3557 = vmatmul.mubr.bf16.gmra.mxu1 %v3338_v49  ;;  %7907 = vst [vmem:[#allocation56_spill] sm:$0xff] %v6986_v60  ;;  %v3031_v62 = vmul.f32 0.5, %v2967_v24  ;;  %4797 = verf.f32 %v3094_v61  ;;  %v914_v50 = vmul.f32 0.70710677, %v784_v11  ;;  %v2626_v51 = vmul.bf16 %v7830_v6, %v7913_v43  ;;  %v7915_v48 = vld [vmem:[#allocation50_spill] sm:$0xff]  ;;  %v7916_v49 = vld [vmem:[#allocation72_spill] sm:$0xff] }
 0x2aa   : > { %7912 = vst [vmem:[#allocation71_spill] sm:$0xff] %v6992_v36  ;;  %4799 = verf.f32 %v3096_v3  ;;  %v4252_v40 = vcombine.low %v1862_v41, %v1863_v0  ;;  %v2627_v47 = vmul.bf16 %v7870_v22, %v7914_v59  ;;  %v3033_v53 = vmul.f32 0.5, %v2969_v57  ;;  %v7918_v3 = vld [vmem:[#allocation32_spill] sm:$0xff] }
 0x2ab   : > { %4801 = verf.f32 %v913_v4  ;;  %v4282_v52 = vcombine.low %v7916_v49, %v7915_v48  ;;  %v786_v32 = vadd.f32 %v785_v8, %v7833_v23  ;;  %v4253_v24 = vcombine.high %v1862_v41, %v1863_v0 }
 0x2ac   : > { %v4790_v5 = vpop.eup %4789  ;;  %4803 = verf.f32 %v914_v50  ;;  %v2656_v61 = vadd.bf16 %v2626_v51, %v7917_v18  ;;  %v2657_v33 = vadd.bf16 %v2627_v47, %v7918_v3  ;;  %v3030_v25 = vmul.f32 0.5, %v2966_v9  ;;  %v7920_v47 = vld [vmem:[#allocation21_spill] sm:$0xff] }
 0x2ad   : > { %v1039_v1 = vadd.f32 1.0, %v4790_v5  ;;  %v4283_v43 = vcombine.high %v7916_v49, %v7915_v48  ;;  %v915_v59 = vmul.f32 0.70710677, %v786_v32  ;;  %v2439_v4 = vadd.bf16 %v4282_v52, %v4252_v40  ;;  %v7922_v52 = vld [vmem:[#allocation76_spill] sm:$0xff] }
 0x2ae   : > { %v4792_v57 = vpop.eup %4791  ;;  %v4316_v35 = vcombine.low %v2656_v61, %v2657_v33  ;;  %v4317_v26 = vcombine.high %v2656_v61, %v2657_v33  ;;  %v7007_v23 = vadd.bf16 %v7911_v56, %v7919_v29  ;;  %v3032_v0 = vmul.f32 0.5, %v2968_v7  ;;  %v7921_v29 = vld [vmem:[#allocation77_spill] sm:$0xff] }
 0x2af   : > { %v1103_v41 = vmul.f32 %v1039_v1, %v6966_v45  ;;  %v7010_v8 = vmul.f32 0.5, %v784_v11  ;;  %4805 = verf.f32 %v915_v59  ;;  %v1040_v50 = vadd.f32 1.0, %v4792_v57 }
 0x2b0   : > { %v2440_v9 = vadd.bf16 %v4283_v43, %v4253_v24  ;;  %v7012_v51 = vadd.bf16 %v4316_v35, %v2439_v4  ;;  %v7016_v48 = vadd.bf16 %v7909_v20, %v7920_v47  ;;  %v7018_v49 = vmul.f32 0.5, %v786_v32 }
 0x2b1   : > { %v1174_v40 = vrot.slane %v1103_v41, 7  ;;  %v1405_v33 = vrot.slane %v1103_v41, 1  ;;  %v7923_v11 = vrot.slane %v6923_v2, 7  ;;  %v7925_v18 = vrot.slane %v6923_v2, 1 }
 0x2b2   : > { %v7022_v1 = vadd.bf16 %v4317_v26, %v2440_v9  ;;  %v1602_v3 = vpack.c.bf16 %v1103_v41, %v6923_v2  ;;  %v7046_v57 = vmul.f32 %v1040_v50, %v6968_v13  ;;  %v2971_v4 = vunpack.c.h.bf16 %v7012_v51  ;;  %v7926_v9 = vld [vmem:[#allocation25_spill] sm:$0xff] }
 0x2b3   : > { %v1207_v32 = vsel %vm1177_vm0, %v7923_v11, %v1174_v40  ;;  %v7924_v24 = vmov %v7923_v11  ;;  %v1470_v61 = vsel %vm1408_vm1, %v1405_v33, %v7925_v18  ;;  %v7927_v7 = vmov %v7925_v18 }
 0x2b4   : > { %v1239_v26 = vsel %vm1177_vm0, %v1174_v40, %v7924_v24  ;;  %v4794_v43 = vpop.eup %4793  ;;  %v1438_v41 = vsel %vm1408_vm1, %v7927_v7, %v1405_v33  ;;  %v1536_v18 = vsel %vm1343_vm3, %v1470_v61, 0.0  ;;  %v2973_v13 = vunpack.c.h.bf16 %v7022_v1 }
 0x2b5   : > { %v1303_v59 = vsel %vm1111_vm2, %v1239_v26, 0.0  ;;  %v4796_v40 = vpop.eup %4795  ;;  %v3223_v11 = vadd.f32 1.0, %v4794_v43  ;;  %v2970_v50 = vunpack.c.l.bf16 %v7012_v51  ;;  %v2972_v5 = vunpack.c.l.bf16 %v7022_v1 }
 0x2b6   : > { %v1339_v24 = vpack.c.bf16 %v1207_v32, %v1303_v59  ;;  %v4798_v26 = vpop.eup %4797  ;;  %v3225_v35 = vadd.f32 1.0, %v4796_v40  ;;  %v1658_v32 = vmul.bf16 %v5450_v27, %v1602_v3  ;;  %v2111_v43 = vmul.bf16 %v5453_v28, %v1602_v3 }
 0x2b7   : > { %v4800_v47 = vpop.eup %4799  ;;  %v3287_v45 = vmul.f32 %v3223_v11, %v3031_v62  ;;  %v7063_v59 = vpack.c.bf16 %v1536_v18, %v1438_v41  ;;  %v3222_v61 = vadd.f32 1.0, %v4798_v26  ;;  %v2524_v51 = vmul.bf16 %v5473_v44, %v1602_v3 }
 0x2b8   : > { %v1704_v2 = vmul.bf16 %v5456_v30, %v1339_v24  ;;  %v4802_v33 = vpop.eup %4801  ;;  %v3289_v7 = vmul.f32 %v3225_v35, %v3033_v53  ;;  %v3224_v40 = vadd.f32 1.0, %v4800_v47  ;;  %v2149_v36 = vmul.bf16 %v5464_v34, %v1339_v24 }
 0x2b9   : > { %v4804_v58 = vpop.eup %4803  ;;  %v1143_v1 = vrot.slane %v7046_v57, 7  ;;  %v1374_v62 = vrot.slane %v7046_v57, 1  ;;  %v3286_v60 = vmul.f32 %v3222_v61, %v3030_v25  ;;  %v1041_v19 = vadd.f32 1.0, %v4802_v33 }
 0x2ba   : > { %v3341_v11 = vpack.c.bf16 %v3289_v7, %v3287_v45  ;;  %v3288_v63 = vmul.f32 %v3224_v40, %v3032_v0  ;;  %v1736_v28 = vadd.bf16 %v1704_v2, %v1658_v32  ;;  %v2562_v53 = vmul.bf16 %v5480_v55, %v1339_v24 }
 0x2bb   : > { %v1042_v35 = vadd.f32 1.0, %v4804_v58  ;;  %v3099_v41 = vmul.f32 0.70710677, %v2971_v4  ;;  %v1776_v34 = vmul.bf16 %v5458_v31, %v7063_v59  ;;  %v7072_v3 = vmul.f32 0.5, %v2971_v4 }
 0x2bc   : > { %v4806_v18 = vpop.eup %4805  ;;  %3564 = vmatprep.mubr.bf16.mxu1 %v3341_v11  ;;  %v3340_v47 = vpack.c.bf16 %v3288_v63, %v3286_v60  ;;  %v3101_v26 = vmul.f32 0.70710677, %v2973_v13  ;;  %v7074_v10 = vadd.bf16 %v2149_v36, %v2111_v43  ;;  %v7077_v0 = vmul.f32 0.5, %v2973_v13  ;;  %v7928_v11 = vld [vmem:[#allocation30_spill] sm:$0xff] }
 0x2bd   : > { %v1106_v25 = vmul.f32 %v1042_v35, %v7010_v8  ;;  %4807 = verf.f32 %v3099_v41  ;;  %v1105_v58 = vmul.f32 %v1041_v19, %v6979_v54  ;;  %v1043_v45 = vadd.f32 1.0, %v4806_v18 }
 0x2be   : > { %3565 = vmatmul.mubr.bf16.gmra.mxu1 %v3340_v47  ;;  %4809 = verf.f32 %v3101_v26  ;;  %v3098_v24 = vmul.f32 0.70710677, %v2970_v50  ;;  %v7080_v32 = vadd.bf16 %v1776_v34, %v1736_v28  ;;  %v7082_v2 = vadd.bf16 %v2562_v53, %v2524_v51  ;;  %v7931_v47 = vld [vmem:[#allocation82_spill] sm:$0xff] }
 0x2bf   : > { %v1175_v63 = vrot.slane %v1106_v25, 7  ;;  %v1406_v60 = vrot.slane %v1106_v25, 1  ;;  %v1107_v36 = vmul.f32 %v1043_v45, %v7018_v49  ;;  %v7085_v4 = vmul.f32 0.5, %v2970_v50 }
 0x2c0   : > { %v3100_v8 = vmul.f32 0.70710677, %v2972_v5  ;;  %4811 = verf.f32 %v3098_v24  ;;  %v7093_v43 = vmul.f32 0.5, %v2972_v5  ;;  %v1144_v33 = vrot.slane %v1105_v58, 7 }
 0x2c1   : > { %v1208_v13 = vsel %vm1177_vm0, %v1143_v1, %v1175_v63  ;;  %v1240_v19 = vsel %vm1177_vm0, %v1175_v63, %v1143_v1  ;;  %v1471_v54 = vsel %vm1408_vm1, %v1406_v60, %v1374_v62  ;;  %v1439_v49 = vsel %vm1408_vm1, %v1374_v62, %v1406_v60  ;;  %v7932_v60 = vld [vmem:[#allocation79_spill] sm:$0xff] }
 0x2c2   : > { %v1306_v7 = vsel %vm1111_vm2, %v1240_v19, 0.0  ;;  %v1539_v50 = vsel %vm1343_vm3, %v1471_v54, 0.0  ;;  %v1176_v40 = vrot.slane %v1107_v36, 7  ;;  %v1407_v51 = vrot.slane %v1107_v36, 1 }
 0x2c3   : > { %v1340_v61 = vpack.c.bf16 %v1208_v13, %v1306_v7  ;;  %v2629_v1 = vmul.bf16 %v7870_v22, %v7928_v11  ;;  %v1375_v28 = vrot.slane %v1105_v58, 1  ;;  %v1603_v5 = vpack.c.bf16 %v1106_v25, %v7046_v57 }
 0x2c4   : > { %4813 = verf.f32 %v3100_v8  ;;  %v7929_v53 = vcombine.low %v7016_v48, %v7007_v23  ;;  %v7930_v35 = vcombine.low %v7922_v52, %v7921_v29  ;;  %v7110_v41 = vpack.c.bf16 %v1539_v50, %v1439_v49 }
 0x2c5   : > { %v1705_v18 = vmul.bf16 %v5434_v17, %v1340_v61  ;;  %v1604_v34 = vpack.c.bf16 %v1107_v36, %v1105_v58  ;;  %v2659_v26 = vadd.bf16 %v2629_v1, %v7931_v47  ;;  %v2563_v45 = vmul.bf16 %v5475_v46, %v1340_v61 }
 0x2c6   : > { %v2441_v62 = vadd.bf16 %v7930_v35, %v7929_v53  ;;  %v1209_v57 = vsel %vm1177_vm0, %v1144_v33, %v1176_v40  ;;  %v1241_v25 = vsel %vm1177_vm0, %v1176_v40, %v1144_v33  ;;  %v1472_v24 = vsel %vm1408_vm1, %v1407_v51, %v1375_v28 }
 0x2c7   : > { %v1307_v63 = vsel %vm1111_vm2, %v1241_v25, 0.0  ;;  %v1440_v17 = vsel %vm1408_vm1, %v1375_v28, %v1407_v51  ;;  %v1540_v58 = vsel %vm1343_vm3, %v1472_v24, 0.0  ;;  %v7933_v46 = vmul.bf16 %v7830_v6, %v7926_v9  ;;  %v7936_v28 = vld [vmem:[#allocation83_spill] sm:$0xff] }
 0x2c8   : > { %v1659_v8 = vmul.bf16 %v5431_v16, %v1603_v5  ;;  %v2525_v13 = vmul.bf16 %v5471_v42, %v1603_v5  ;;  %v1341_v19 = vpack.c.bf16 %v1209_v57, %v1307_v63  ;;  %v7934_v54 = vcombine.high %v7016_v48, %v7007_v23  ;;  %v7937_v57 = vld [vmem:[#allocation80_spill] sm:$0xff] }
 0x2c9   : > { %v2658_v36 = vadd.bf16 %v7933_v46, %v7932_v60  ;;  %v7935_v39 = vcombine.high %v7922_v52, %v7921_v29  ;;  %v1777_v14 = vmul.bf16 %v5440_v21, %v7110_v41  ;;  %v2642_v7 = vmul.bf16 %v7830_v6, %v7110_v41 }
 0x2ca   : > { %v4808_v50 = vpop.eup %4807  ;;  %v1737_v16 = vadd.bf16 %v1705_v18, %v1659_v8  ;;  %v7143_v61 = vadd.bf16 %v2563_v45, %v2525_v13  ;;  %v7145_v42 = vpack.c.bf16 %v1540_v58, %v1440_v17  ;;  %v1660_v23 = vmul.bf16 %v5450_v27, %v1604_v34 }
 0x2cb   : > { %v2442_v33 = vadd.bf16 %v7935_v39, %v7934_v54  ;;  %v4318_v9 = vcombine.low %v2658_v36, %v2659_v26  ;;  %v4319_v49 = vcombine.high %v2658_v36, %v2659_v26  ;;  %v4810_v48 = vpop.eup %4809  ;;  %v3227_v40 = vadd.f32 1.0, %v4808_v50  ;;  %v7938_v54 = vld [vmem:[#allocation33_spill] sm:$0xff]  ;;  %v7939_v39 = vld [vmem:[#allocation24_spill] sm:$0xff]  ;;  %v7941_v50 = vld [vmem:[#allocation31_spill] sm:$0xff] }
 0x2cc   : > { %v2564_v29 = vmul.bf16 %v5480_v55, %v1341_v19  ;;  %v3229_v51 = vadd.f32 1.0, %v4810_v48  ;;  %v1706_v11 = vmul.bf16 %v5456_v30, %v1341_v19  ;;  %v2526_v1 = vmul.bf16 %v5473_v44, %v1604_v34 }
 0x2cd   : > { %v7149_v52 = vadd.bf16 %v4318_v9, %v2441_v62  ;;  %v7151_v21 = vadd.bf16 %v4319_v49, %v2442_v33  ;;  %v1867_v5 = vadd.bf16 %v7911_v56, %v7936_v28  ;;  %v4812_v53 = vpop.eup %4811  ;;  %v3291_v35 = vmul.f32 %v3227_v40, %v7072_v3  ;;  %v7940_v9 = vld [vmem:[#allocation88_spill] sm:$0xff]  ;;  %v7942_v40 = vld [vmem:[#allocation35_spill] sm:$0xff]  ;;  %v7944_v28 = vld [vmem:[#allocation29_spill] sm:$0xff] }
 0x2ce   : > { %v7161_v62 = vadd.bf16 %v1777_v14, %v1737_v16  ;;  %v3293_v47 = vmul.f32 %v3229_v51, %v7077_v0  ;;  %v1778_v30 = vmul.bf16 %v5458_v31, %v7145_v42  ;;  %v3226_v44 = vadd.f32 1.0, %v4812_v53 }
 0x2cf   : > { %v2975_v27 = vunpack.c.h.bf16 %v7149_v52  ;;  %v2977_v18 = vunpack.c.h.bf16 %v7151_v21  ;;  %v2974_v55 = vunpack.c.l.bf16 %v7149_v52  ;;  %v2594_v34 = vadd.bf16 %v2564_v29, %v2526_v1 }
 0x2d0   : > { %v1866_v3 = vadd.bf16 %v7909_v20, %v7937_v57  ;;  %v3343_v25 = vpack.c.bf16 %v3293_v47, %v3291_v35  ;;  %v7168_v24 = vadd.bf16 %v1706_v11, %v1660_v23  ;;  %v2643_v63 = vmul.bf16 %v7870_v22, %v7145_v42 }
 0x2d1   : > { %v3103_v26 = vmul.f32 0.70710677, %v2975_v27  ;;  %v3105_v45 = vmul.f32 0.70710677, %v2977_v18  ;;  %v2976_v17 = vunpack.c.l.bf16 %v7151_v21  ;;  %v4814_v58 = vpop.eup %4813  ;;  %v3290_v0 = vmul.f32 %v3226_v44, %v7085_v4  ;;  %v7943_v21 = vld [vmem:[#allocation41_spill] sm:$0xff] }
 0x2d2   : > { %v3102_v60 = vmul.f32 0.70710677, %v2974_v55  ;;  %v4256_v46 = vcombine.low %v1866_v3, %v1867_v5  ;;  %3572 = vmatprep.mubr.bf16.mxu1 %v3343_v25  ;;  %v3228_v36 = vadd.f32 1.0, %v4814_v58  ;;  %v4257_v13 = vcombine.high %v1866_v3, %v1867_v5  ;;  %v7946_v44 = vld [vmem:[#allocation45_spill] sm:$0xff]  ;;  %v7948_v3 = vld [vmem:[#allocation87_spill] sm:$0xff] }
 0x2d3   : > { %4815 = verf.f32 %v3103_v26  ;;  %v3104_v8 = vmul.f32 0.70710677, %v2976_v17  ;;  %v7176_v19 = vadd.bf16 %v2643_v63, %v2594_v34  ;;  %v4286_v33 = vcombine.low %v7939_v39, %v7938_v54  ;;  %v7947_v26 = vld [vmem:[#allocation89_spill] sm:$0xff]  ;;  %v7950_v58 = vld [vmem:[#allocation43_spill] sm:$0xff] }
 0x2d4   : > { %4817 = verf.f32 %v3105_v45  ;;  %v4287_v14 = vcombine.high %v7939_v39, %v7938_v54  ;;  %v3292_v4 = vmul.f32 %v3228_v36, %v7093_v43  ;;  %v2630_v49 = vmul.bf16 %v7830_v6, %v7940_v9  ;;  %v7945_v43 = vld [vmem:[#allocation39_spill] sm:$0xff]  ;;  %v7949_v25 = vld [vmem:[#allocation81_spill] sm:$0xff] }
 0x2d5   : > { %4819 = verf.f32 %v3102_v60  ;;  %v2631_v16 = vmul.bf16 %v7870_v22, %v7941_v50  ;;  %v3039_v23 = vmul.f32 0.5, %v2975_v27  ;;  %v2443_v48 = vadd.bf16 %v4286_v33, %v4256_v46  ;;  %v7951_v46 = vld [vmem:[#allocation90_spill] sm:$0xff]  ;;  %v7953_v54 = vld [vmem:[#allocation91_spill] sm:$0xff] }
 0x2d6   : > { %4821 = verf.f32 %v3104_v8  ;;  %v1868_v29 = vadd.bf16 %v7909_v20, %v7942_v40  ;;  %v1869_v51 = vadd.bf16 %v7911_v56, %v7943_v21  ;;  %v3342_v11 = vpack.c.bf16 %v3292_v4, %v3290_v0  ;;  %v7952_v8 = vld [vmem:[#allocation40_spill] sm:$0xff] }
 0x2d7   : > { %v2444_v1 = vadd.bf16 %v4287_v14, %v4257_v13  ;;  %v2660_v5 = vadd.bf16 %v2630_v49, %v7944_v28  ;;  %v2661_v53 = vadd.bf16 %v2631_v16, %v7945_v43  ;;  %v2632_v34 = vmul.bf16 %v7830_v6, %v7946_v44  ;;  %v7955_v44 = vld [vmem:[#allocation36_spill] sm:$0xff] }
 0x2d8   : > { %v4258_v35 = vcombine.low %v1868_v29, %v1869_v51  ;;  %v4259_v47 = vcombine.high %v1868_v29, %v1869_v51  ;;  %v2633_v27 = vmul.bf16 %v7870_v22, %v7947_v26  ;;  %3573 = vmatmul.mubr.bf16.gmra.mxu1 %v3342_v11  ;;  %v4288_v63 = vcombine.low %v7949_v25, %v7948_v3 }
 0x2d9   : > { %v4320_v45 = vcombine.low %v2660_v5, %v2661_v53  ;;  %v4321_v57 = vcombine.high %v2660_v5, %v2661_v53  ;;  %v1871_v0 = vadd.bf16 %v7911_v56, %v7950_v58  ;;  %v4289_v60 = vcombine.high %v7949_v25, %v7948_v3  ;;  %v7954_v53 = vld [vmem:[#allocation42_spill] sm:$0xff] }
 0x2da   : > { %v2662_v36 = vadd.bf16 %v2632_v34, %v7951_v46  ;;  %v2663_v13 = vadd.bf16 %v2633_v27, %v7952_v8  ;;  %v1870_v39 = vadd.bf16 %v7909_v20, %v7953_v54  ;;  %v3041_v33 = vmul.f32 0.5, %v2977_v18 }
 0x2db   : > { %v2870_v14 = vadd.bf16 %v4320_v45, %v2443_v48  ;;  %v2871_v4 = vadd.bf16 %v4321_v57, %v2444_v1  ;;  %v2445_v9 = vadd.bf16 %v4288_v63, %v4258_v35  ;;  %v2446_v49 = vadd.bf16 %v4289_v60, %v4259_v47 }
 0x2dc   : > { %v4322_v50 = vcombine.low %v2662_v36, %v2663_v13  ;;  %v4323_v16 = vcombine.high %v2662_v36, %v2663_v13  ;;  %v4260_v40 = vcombine.low %v1870_v39, %v1871_v0  ;;  %v3038_v28 = vmul.f32 0.5, %v2974_v55 }
 0x2dd   : > { %v2979_v29 = vunpack.c.h.bf16 %v2870_v14  ;;  %v2981_v21 = vunpack.c.h.bf16 %v2871_v4  ;;  %v2978_v51 = vunpack.c.l.bf16 %v2870_v14  ;;  %v2980_v11 = vunpack.c.l.bf16 %v2871_v4 }
 0x2de   : > { %v2872_v5 = vadd.bf16 %v4322_v50, %v2445_v9  ;;  %v2873_v43 = vadd.bf16 %v4323_v16, %v2446_v49  ;;  %v4290_v34 = vcombine.low %v7955_v44, %v7954_v53  ;;  %v3040_v48 = vmul.f32 0.5, %v2976_v17  ;;  %v7956_v16 = vld [vmem:[#allocation37_spill] sm:$0xff] }
 0x2df   : > { %v3107_v1 = vmul.f32 0.70710677, %v2979_v29  ;;  %v3109_v35 = vmul.f32 0.70710677, %v2981_v21  ;;  %v4261_v47 = vcombine.high %v1870_v39, %v1871_v0  ;;  %v3106_v45 = vmul.f32 0.70710677, %v2978_v51 }
 0x2e0   : > { %v4816_v18 = vpop.eup %4815  ;;  %v4291_v57 = vcombine.high %v7955_v44, %v7954_v53  ;;  %v2447_v3 = vadd.bf16 %v4290_v34, %v4260_v40  ;;  %v3108_v55 = vmul.f32 0.70710677, %v2980_v11  ;;  %v2983_v63 = vunpack.c.h.bf16 %v2872_v5  ;;  %v7957_v40 = vld [vmem:[#allocation18_spill] sm:$0xff] }
 0x2e1   : > { %v4818_v26 = vpop.eup %4817  ;;  %v3231_v27 = vadd.f32 1.0, %v4816_v18  ;;  %4823 = verf.f32 %v3107_v1  ;;  %v2985_v17 = vunpack.c.h.bf16 %v2873_v43  ;;  %v3043_v54 = vmul.f32 0.5, %v2979_v29  ;;  %v7958_v18 = vld [vmem:[#allocation16_spill] sm:$0xff] }
 0x2e2   : > { %v4820_v25 = vpop.eup %4819  ;;  %v3233_v52 = vadd.f32 1.0, %v4818_v26  ;;  %4825 = verf.f32 %v3109_v35  ;;  %v2448_v0 = vadd.bf16 %v4291_v57, %v4261_v47  ;;  %v3111_v39 = vmul.f32 0.70710677, %v2983_v63  ;;  %v7960_v47 = vld [vmem:[#allocation38_spill] sm:$0xff]  ;;  %v7961_v57 = vld [vmem:[#allocation52_spill] sm:$0xff] }
 0x2e3   : > { %v4822_v58 = vpop.eup %4821  ;;  %v3295_v60 = vmul.f32 %v3231_v27, %v3039_v23  ;;  %v3230_v46 = vadd.f32 1.0, %v4820_v25  ;;  %4827 = verf.f32 %v3106_v45  ;;  %v3113_v9 = vmul.f32 0.70710677, %v2985_v17 }
 0x2e4   : > { %v3297_v36 = vmul.f32 %v3233_v52, %v3041_v33  ;;  %v3232_v8 = vadd.f32 1.0, %v4822_v58  ;;  %4829 = verf.f32 %v3108_v55  ;;  %v2982_v49 = vunpack.c.l.bf16 %v2872_v5  ;;  %v7962_v55 = vld [vmem:[#allocation44_spill] sm:$0xff] }
 0x2e5   : > { %v3294_v13 = vmul.f32 %v3230_v46, %v3038_v28  ;;  %4831 = verf.f32 %v3111_v39  ;;  %v2984_v50 = vunpack.c.l.bf16 %v2873_v43  ;;  %v2634_v23 = vmul.bf16 %v7830_v6, %v7956_v16  ;;  %v7963_v46 = vld [vmem:[#allocation17_spill] sm:$0xff]  ;;  %v7965_v39 = vld [vmem:[#allocation92_spill] sm:$0xff] }
 0x2e6   : > { %v3345_v14 = vpack.c.bf16 %v3297_v36, %v3295_v60  ;;  %v3296_v4 = vmul.f32 %v3232_v8, %v3040_v48  ;;  %v2635_v53 = vmul.bf16 %v7870_v22, %v7957_v40  ;;  %v3045_v44 = vmul.f32 0.5, %v2981_v21  ;;  %v7959_v48 = vld [vmem:[#allocation57_spill] sm:$0xff] }
 0x2e7   : > { %4833 = verf.f32 %v3113_v9  ;;  %v3110_v28 = vmul.f32 0.70710677, %v2982_v49  ;;  %v3042_v29 = vmul.f32 0.5, %v2978_v51  ;;  %v3112_v34 = vmul.f32 0.70710677, %v2984_v50 }
 0x2e8   : > { %3580 = vmatprep.mubr.bf16.mxu1 %v3345_v14  ;;  %v3344_v33 = vpack.c.bf16 %v3296_v4, %v3294_v13  ;;  %v2664_v1 = vadd.bf16 %v2634_v23, %v7958_v18  ;;  %v2665_v35 = vadd.bf16 %v2635_v53, %v7959_v48  ;;  %v3044_v5 = vmul.f32 0.5, %v2980_v11  ;;  %v7964_v13 = vld [vmem:[#allocation23_spill] sm:$0xff]  ;;  %v7966_v4 = vld [vmem:[#allocation65_spill] sm:$0xff]  ;;  %v7969_v18 = vld [vmem:[#allocation60_spill] sm:$0xff] }
 0x2e9   : > { %v3047_v43 = vmul.f32 0.5, %v2983_v63  ;;  %4835 = verf.f32 %v3110_v28  ;;  %v1873_v26 = vadd.bf16 %v7911_v56, %v7960_v47  ;;  %v1872_v21 = vadd.bf16 %v7909_v20, %v7961_v57  ;;  %v7968_v23 = vld [vmem:[#allocation55_spill] sm:$0xff] }
 0x2ea   : > { %3581 = vmatmul.mubr.bf16.gmra.mxu1 %v3344_v33  ;;  %4837 = verf.f32 %v3112_v34  ;;  %v4324_v27 = vcombine.low %v2664_v1, %v2665_v35  ;;  %v4325_v45 = vcombine.high %v2664_v1, %v2665_v35  ;;  %v3049_v25 = vmul.f32 0.5, %v2985_v17 }
 0x2eb   : > { %v7223_v51 = vmul.f32 0.5, %v2982_v49  ;;  %v7225_v52 = vmul.f32 0.5, %v2984_v50  ;;  %v2637_v58 = vmul.bf16 %v7870_v22, %v7962_v55  ;;  %v4262_v60 = vcombine.low %v1872_v21, %v1873_v26 }
 0x2ec   : > { %v7229_v11 = vadd.bf16 %v4324_v27, %v2447_v3  ;;  %v7231_v63 = vadd.bf16 %v4325_v45, %v2448_v0  ;;  %v2636_v36 = vmul.bf16 %v7830_v6, %v7963_v46  ;;  %v4263_v8 = vcombine.high %v1872_v21, %v1873_v26  ;;  %v7967_v0 = vld [vmem:[#allocation34_spill] sm:$0xff] }
 0x2ed   : > { %v4292_v14 = vcombine.low %v7965_v39, %v7964_v13  ;;  %v4293_v17 = vcombine.high %v7965_v39, %v7964_v13  ;;  %v2667_v9 = vadd.bf16 %v2637_v58, %v7966_v4  ;;  %v7245_v40 = vadd.bf16 %v7909_v20, %v7968_v23 }
 0x2ee   : > { %v4824_v49 = vpop.eup %4823  ;;  %v2987_v50 = vunpack.c.h.bf16 %v7229_v11  ;;  %v2989_v3 = vunpack.c.h.bf16 %v7231_v63  ;;  %v2666_v16 = vadd.bf16 %v2636_v36, %v7967_v0  ;;  %v2986_v28 = vunpack.c.l.bf16 %v7229_v11 }
 0x2ef   : > { %v4826_v53 = vpop.eup %4825  ;;  %v3235_v33 = vadd.f32 1.0, %v4824_v49  ;;  %v2988_v34 = vunpack.c.l.bf16 %v7231_v63  ;;  %v7251_v1 = vadd.bf16 %v7911_v56, %v7969_v18  ;;  %v2449_v26 = vadd.bf16 %v4292_v14, %v4262_v60 }
 0x2f0   : > { %v4828_v48 = vpop.eup %4827  ;;  %v3237_v35 = vadd.f32 1.0, %v4826_v53  ;;  %v3115_v47 = vmul.f32 0.70710677, %v2987_v50  ;;  %v4326_v27 = vcombine.low %v2666_v16, %v2667_v9  ;;  %v3117_v55 = vmul.f32 0.70710677, %v2989_v3 }
 0x2f1   : > { %v4830_v45 = vpop.eup %4829  ;;  %v3299_v57 = vmul.f32 %v3235_v33, %v3043_v54  ;;  %v3234_v21 = vadd.f32 1.0, %v4828_v48  ;;  %v4327_v58 = vcombine.high %v2666_v16, %v2667_v9  ;;  %v2450_v11 = vadd.bf16 %v4293_v17, %v4263_v8 }
 0x2f2   : > { %v3301_v46 = vmul.f32 %v3237_v35, %v3045_v44  ;;  %v3236_v36 = vadd.f32 1.0, %v4830_v45  ;;  %4839 = verf.f32 %v3115_v47  ;;  %v4832_v13 = vpop.eup %4831  ;;  %v3114_v39 = vmul.f32 0.70710677, %v2986_v28 }
 0x2f3   : > { %v3298_v63 = vmul.f32 %v3234_v21, %v3042_v29  ;;  %4841 = verf.f32 %v3117_v55  ;;  %v3116_v4 = vmul.f32 0.70710677, %v2988_v34  ;;  %v3239_v53 = vadd.f32 1.0, %v4832_v13  ;;  %v7970_v13 = vld [vmem:[#allocation54_spill] sm:$0xff] }
 0x2f4   : > { %v4834_v49 = vpop.eup %4833  ;;  %v3347_v0 = vpack.c.bf16 %v3301_v46, %v3299_v57  ;;  %v3300_v23 = vmul.f32 %v3236_v36, %v3044_v5  ;;  %v7253_v60 = vadd.bf16 %v4326_v27, %v2449_v26  ;;  %4843 = verf.f32 %v3114_v39  ;;  %v7972_v39 = vld [vmem:[#allocation63_spill] sm:$0xff] }
 0x2f5   : > { %v3241_v14 = vadd.f32 1.0, %v4834_v49  ;;  %v7255_v54 = vadd.bf16 %v4327_v58, %v2450_v11  ;;  %v4264_v44 = vcombine.low %v7245_v40, %v7251_v1  ;;  %v3303_v29 = vmul.f32 %v3239_v53, %v3047_v43  ;;  %v7973_v49 = vld [vmem:[#allocation66_spill] sm:$0xff] }
 0x2f6   : > { %v4836_v9 = vpop.eup %4835  ;;  %3588 = vmatprep.mubr.bf16.mxu1 %v3347_v0  ;;  %v3346_v8 = vpack.c.bf16 %v3300_v23, %v3298_v63  ;;  %4845 = verf.f32 %v3116_v4  ;;  %v2991_v17 = vunpack.c.h.bf16 %v7253_v60  ;;  %v2990_v48 = vunpack.c.l.bf16 %v7253_v60  ;;  %v7971_v63 = vld [vmem:[#allocation53_spill] sm:$0xff] }
 0x2f7   : > { %v4838_v16 = vpop.eup %4837  ;;  %v3305_v33 = vmul.f32 %v3241_v14, %v3049_v25  ;;  %v3238_v5 = vadd.f32 1.0, %v4836_v9  ;;  %v2993_v18 = vunpack.c.h.bf16 %v7255_v54  ;;  %v3051_v47 = vmul.f32 0.5, %v2987_v50 }
 0x2f8   : > { %3589 = vmatmul.mubr.bf16.gmra.mxu1 %v3346_v8  ;;  %v3240_v35 = vadd.f32 1.0, %v4838_v16  ;;  %v3119_v26 = vmul.f32 0.70710677, %v2991_v17  ;;  %v2992_v27 = vunpack.c.l.bf16 %v7255_v54  ;;  %v3053_v43 = vmul.f32 0.5, %v2989_v3 }
 0x2f9   : > { %v3349_v45 = vpack.c.bf16 %v3305_v33, %v3303_v29  ;;  %v3302_v57 = vmul.f32 %v3238_v5, %v7223_v51  ;;  %v3121_v21 = vmul.f32 0.70710677, %v2993_v18  ;;  %v3050_v58 = vmul.f32 0.5, %v2986_v28  ;;  %v7974_v33 = vld [vmem:[#allocation61_spill] sm:$0xff]  ;;  %v7976_v5 = vld [vmem:[#allocation86_spill] sm:$0xff] }
 0x2fa   : > { %v3304_v55 = vmul.f32 %v3240_v35, %v7225_v52  ;;  %v3052_v25 = vmul.f32 0.5, %v2988_v34  ;;  %4847 = verf.f32 %v3119_v26  ;;  %v3118_v46 = vmul.f32 0.70710677, %v2990_v48 }
 0x2fb   : > { %3596 = vmatprep.mubr.bf16.mxu1 %v3349_v45  ;;  %4849 = verf.f32 %v3121_v21  ;;  %v3120_v36 = vmul.f32 0.70710677, %v2992_v27  ;;  %v4265_v50 = vcombine.high %v7245_v40, %v7251_v1  ;;  %v4294_v51 = vcombine.low %v7971_v63, %v7970_v13 }
 0x2fc   : > { %v3348_v11 = vpack.c.bf16 %v3304_v55, %v3302_v57  ;;  %v2638_v3 = vmul.bf16 %v7830_v6, %v6877_v15  ;;  %v2639_v52 = vmul.bf16 %v7870_v22, %v6894_v12  ;;  %4851 = verf.f32 %v3118_v46 }
 0x2fd   : > { %v4295_v28 = vcombine.high %v7971_v63, %v7970_v13  ;;  %v1876_v34 = vadd.bf16 %v7909_v20, %v6909_v37  ;;  %v1877_v40 = vadd.bf16 %v7911_v56, %v6934_v38  ;;  %v3055_v1 = vmul.f32 0.5, %v2991_v17  ;;  %v7975_v38 = vld [vmem:[#allocation58_spill] sm:$0xff] }
 0x2fe   : > { %4853 = verf.f32 %v3120_v36  ;;  %v2668_v4 = vadd.bf16 %v2638_v3, %v7972_v39  ;;  %v2669_v0 = vadd.bf16 %v2639_v52, %v7973_v49  ;;  %v3057_v23 = vmul.f32 0.5, %v2993_v18  ;;  %v7303_v49 = vpop.f32.mrf.mxu1 }
 0x2ff   : > { %v4840_v15 = vpop.eup %4839  ;;  %v2451_v53 = vadd.bf16 %v4294_v51, %v4264_v44  ;;  %v2452_v12 = vadd.bf16 %v4295_v28, %v4265_v50  ;;  %v4266_v14 = vcombine.low %v1876_v34, %v1877_v40  ;;  %v4267_v37 = vcombine.high %v1876_v34, %v1877_v40  ;;  %v7977_v50 = vld [vmem:[#allocation56_spill] sm:$0xff] }
 0x300   : > { %v4842_v54 = vpop.eup %4841  ;;  %3597 = vmatmul.mubr.bf16.gmra.mxu1 %v3348_v11  ;;  %v3243_v9 = vadd.f32 1.0, %v4840_v15  ;;  %v4328_v8 = vcombine.low %v2668_v4, %v2669_v0  ;;  %v4329_v29 = vcombine.high %v2668_v4, %v2669_v0  ;;  %v4296_v17 = vcombine.low %v7975_v38, %v7974_v33 }
 0x301   : > { %v3245_v16 = vadd.f32 1.0, %v4842_v54  ;;  %v2640_v35 = vmul.bf16 %v7830_v6, %v7976_v5  ;;  %v2641_v26 = vmul.bf16 %v7870_v22, %v7063_v59  ;;  %v4844_v18 = vpop.eup %4843  ;;  %v4297_v21 = vcombine.high %v7975_v38, %v7974_v33  ;;  %v4375_v33 = vpop.f32.mrf.mxu1 }
 0x302   : > { %v3307_v44 = vmul.f32 %v3243_v9, %v3051_v47  ;;  %v7289_v45 = vadd.bf16 %v4328_v8, %v2451_v53  ;;  %v7291_v57 = vadd.bf16 %v4329_v29, %v2452_v12  ;;  %v3242_v36 = vadd.f32 1.0, %v4844_v18 }
 0x303   : > { %v4846_v55 = vpop.eup %4845  ;;  %v3309_v46 = vmul.f32 %v3245_v16, %v3053_v43  ;;  %v2670_v11 = vadd.bf16 %v2640_v35, %v7977_v50  ;;  %v2671_v13 = vadd.bf16 %v2641_v26, %v7082_v2  ;;  %v3054_v43 = vmul.f32 0.5, %v2990_v48  ;;  %v7978_v16 = vld [vmem:[#allocation71_spill] sm:$0xff] }
 0x304   : > { %v3244_v63 = vadd.f32 1.0, %v4846_v55  ;;  %v2995_v51 = vunpack.c.h.bf16 %v7289_v45  ;;  %v2997_v22 = vunpack.c.h.bf16 %v7291_v57  ;;  %v2994_v47 = vunpack.c.l.bf16 %v7289_v45 }
 0x305   : > { %v3351_v3 = vpack.c.bf16 %v3309_v46, %v3307_v44  ;;  %v3306_v52 = vmul.f32 %v3242_v36, %v3050_v58  ;;  %v2996_v28 = vunpack.c.l.bf16 %v7291_v57  ;;  %v4330_v34 = vcombine.low %v2670_v11, %v2671_v13  ;;  %v7982_v57 = vld [vmem:[#allocation20_spill] sm:$0xff] }
 0x306   : > { %v3308_v40 = vmul.f32 %v3244_v63, %v3052_v25  ;;  %v3056_v39 = vmul.f32 0.5, %v2992_v27  ;;  %v3123_v4 = vmul.f32 0.70710677, %v2995_v51  ;;  %v3125_v0 = vmul.f32 0.70710677, %v2997_v22  ;;  %v4377_v63 = vpop.f32.mrf.mxu1 }
 0x307   : > { %v4848_v2 = vpop.eup %4847  ;;  %3604 = vmatprep.mubr.bf16.mxu1 %v3351_v3  ;;  %v3122_v15 = vmul.f32 0.70710677, %v2994_v47  ;;  %v2453_v58 = vadd.bf16 %v4296_v17, %v4266_v14  ;;  %v2454_v53 = vadd.bf16 %v4297_v21, %v4267_v37  ;;  %v3124_v60 = vmul.f32 0.70710677, %v2996_v28 }
 0x308   : > { %v4850_v12 = vpop.eup %4849  ;;  %v3350_v54 = vpack.c.bf16 %v3308_v40, %v3306_v52  ;;  %v3247_v25 = vadd.f32 1.0, %v4848_v2  ;;  %4855 = verf.f32 %v3123_v4  ;;  %v4331_v27 = vcombine.high %v2670_v11, %v2671_v13  ;;  %v7979_v40 = vld [vmem:[#allocation69_spill] sm:$0xff]  ;;  %v4378_v4 = vpop.f32.mrf.mxu1 }
 0x309   : > { %v3249_v48 = vadd.f32 1.0, %v4850_v12  ;;  %4857 = verf.f32 %v3125_v0  ;;  %v7311_v9 = vadd.bf16 %v4330_v34, %v2453_v58  ;;  %v4852_v8 = vpop.eup %4851  ;;  %v1878_v14 = vadd.bf16 %v7909_v20, %v7978_v16  ;;  %v7981_v12 = vld [vmem:[#allocation19_spill] sm:$0xff] }
 0x30a   : > { %3605 = vmatmul.mubr.bf16.gmra.mxu1 %v3350_v54  ;;  %v3311_v29 = vmul.f32 %v3247_v25, %v3055_v1  ;;  %4859 = verf.f32 %v3122_v15  ;;  %v1879_v37 = vadd.bf16 %v7911_v56, %v7080_v32  ;;  %v3246_v35 = vadd.f32 1.0, %v4852_v8 }
 0x30b   : > { %v4854_v38 = vpop.eup %4853  ;;  %v3313_v17 = vmul.f32 %v3249_v48, %v3057_v23  ;;  %4861 = verf.f32 %v3124_v60  ;;  %v7317_v26 = vadd.bf16 %v4331_v27, %v2454_v53  ;;  %v2999_v44 = vunpack.c.h.bf16 %v7311_v9 }
 0x30c   : > { %v3248_v18 = vadd.f32 1.0, %v4854_v38  ;;  %v2998_v21 = vunpack.c.l.bf16 %v7311_v9  ;;  %v4268_v1 = vcombine.low %v1878_v14, %v1879_v37  ;;  %v3310_v46 = vmul.f32 %v3246_v35, %v3054_v43  ;;  %v7980_v43 = vld [vmem:[#allocation67_spill] sm:$0xff] }
 0x30d   : > { %v3353_v55 = vpack.c.bf16 %v3313_v17, %v3311_v29  ;;  %v3001_v36 = vunpack.c.h.bf16 %v7317_v26  ;;  %v3000_v50 = vunpack.c.l.bf16 %v7317_v26  ;;  %v2672_v32 = vadd.bf16 %v2642_v7, %v7143_v61 }
 0x30e   : > { %v1810_v23 = vadd.bf16 %v1778_v30, %v7168_v24  ;;  %v3312_v11 = vmul.f32 %v3248_v18, %v3056_v39  ;;  %v3127_v13 = vmul.f32 0.70710677, %v2999_v44  ;;  %v3059_v3 = vmul.f32 0.5, %v2995_v51 }
 0x30f   : > { %3612 = vmatprep.mubr.bf16.mxu1 %v3353_v55  ;;  %v3129_v52 = vmul.f32 0.70710677, %v3001_v36  ;;  %v3126_v34 = vmul.f32 0.70710677, %v2998_v21  ;;  %v4298_v6 = vcombine.low %v7980_v43, %v7979_v40  ;;  %v3128_v31 = vmul.f32 0.70710677, %v3000_v50 }
 0x310   : > { %v3352_v41 = vpack.c.bf16 %v3312_v11, %v3310_v46  ;;  %4863 = verf.f32 %v3127_v13  ;;  %v4269_v7 = vcombine.high %v1878_v14, %v1879_v37  ;;  %v4299_v61 = vcombine.high %v7980_v43, %v7979_v40  ;;  %v7983_v14 = vld [vmem:[#allocation59_spill] sm:$0xff] }
 0x311   : > { %4865 = verf.f32 %v3129_v52  ;;  %v2455_v42 = vadd.bf16 %v4298_v6, %v4268_v1  ;;  %v4332_v30 = vcombine.low %v2672_v32, %v7176_v19  ;;  %v3061_v24 = vmul.f32 0.5, %v2997_v22 }
 0x312   : > { %3613 = vmatmul.mubr.bf16.gmra.mxu1 %v3352_v41  ;;  %4867 = verf.f32 %v3126_v34  ;;  %v4333_v51 = vcombine.high %v2672_v32, %v7176_v19  ;;  %v1881_v39 = vadd.bf16 %v7911_v56, %v1810_v23  ;;  %v2456_v2 = vadd.bf16 %v4299_v61, %v4269_v7 }
 0x313   : > { %4869 = verf.f32 %v3128_v31  ;;  %v7346_v0 = vadd.bf16 %v4332_v30, %v2455_v42  ;;  %v1880_v15 = vadd.bf16 %v7909_v20, %v7161_v62  ;;  %v3058_v58 = vmul.f32 0.5, %v2994_v47 }
 0x314   : > { %v3060_v53 = vmul.f32 0.5, %v2996_v28  ;;  %v3063_v22 = vmul.f32 0.5, %v2999_v44  ;;  %v2216_v19 = vmul.bf16 %v7981_v12, %v7976_v5  ;;  %v7356_v56 = vadd.bf16 %v4333_v51, %v2456_v2  ;;  %v7366_v5 = vld [vmem:[%s7562_s6] ss:$0 sm:$0xff]  ;;  %v4380_v28 = vpop.f32.mrf.mxu1 }
 0x315   : > { %v4856_v54 = vpop.eup %4855  ;;  %v3003_v25 = vunpack.c.h.bf16 %v7346_v0  ;;  %v4270_v60 = vcombine.low %v1880_v15, %v1881_v39  ;;  %v4376_v48 = vadd.f32 %v4375_v33, %v7303_v49  ;;  %v3002_v62 = vunpack.c.l.bf16 %v7346_v0 }
 0x316   : > { %v4858_v27 = vpop.eup %4857  ;;  %v3251_v20 = vadd.f32 1.0, %v4856_v54  ;;  %v4271_v45 = vcombine.high %v1880_v15, %v1881_v39  ;;  %v2217_v47 = vmul.bf16 %v7982_v57, %v7063_v59  ;;  %v3005_v16 = vunpack.c.h.bf16 %v7356_v56  ;;  %v4381_v11 = vpop.f32.mrf.mxu1 }
 0x317   : > { %v4860_v8 = vpop.eup %4859  ;;  %v3253_v29 = vadd.f32 1.0, %v4858_v27  ;;  %v3131_v49 = vmul.f32 0.70710677, %v3003_v25  ;;  %v2246_v37 = vadd.bf16 %v2216_v19, %v7983_v14  ;;  %v3004_v59 = vunpack.c.l.bf16 %v7356_v56 }
 0x318   : > { %v4862_v33 = vpop.eup %4861  ;;  %v3315_v38 = vmul.f32 %v3251_v20, %v3059_v3  ;;  %v3250_v17 = vadd.f32 1.0, %v4860_v8  ;;  %v2247_v35 = vadd.bf16 %v2217_v47, %v7074_v10  ;;  %v3133_v1 = vmul.f32 0.70710677, %v3005_v16 }
 0x319   : > { %v3317_v18 = vmul.f32 %v3253_v29, %v3061_v24  ;;  %v3252_v44 = vadd.f32 1.0, %v4862_v33  ;;  %v7377_v55 = vadd.f32 %v4376_v48, %v7366_v5  ;;  %4871 = verf.f32 %v3131_v49 }
 0x31a   : > { %v3314_v46 = vmul.f32 %v3250_v17, %v3058_v58  ;;  %v3130_v32 = vmul.f32 0.70710677, %v3002_v62  ;;  %v4379_v23 = vadd.f32 %v4378_v4, %v4377_v63  ;;  %4873 = verf.f32 %v3133_v1 }
 0x31b   : > { %v3355_v13 = vpack.c.bf16 %v3317_v18, %v3315_v38  ;;  %v3316_v3 = vmul.f32 %v3252_v44, %v3060_v53  ;;  %v3132_v10 = vmul.f32 0.70710677, %v3004_v59  ;;  %v3062_v52 = vmul.f32 0.5, %v2998_v21  ;;  %v4383_v21 = vpop.f32.mrf.mxu1 }
 0x31c   : > { %4875 = verf.f32 %v3130_v32  ;;  %v4300_v34 = vcombine.low %v2246_v37, %v2247_v35  ;;  %v4301_v40 = vcombine.high %v2246_v37, %v2247_v35  ;;  %v3065_v41 = vmul.f32 0.5, %v3001_v36 }
 0x31d   : > { %v4864_v43 = vpop.eup %4863  ;;  %3620 = vmatprep.mubr.bf16.mxu1 %v3355_v13  ;;  %v3354_v6 = vpack.c.bf16 %v3316_v3, %v3314_v46  ;;  %4877 = verf.f32 %v3132_v10  ;;  %v3895_v63 = vmul.f32 0.70710677, %v7377_v55  ;;  %v3064_v61 = vmul.f32 0.5, %v3000_v50 }
 0x31e   : > { %v4866_v31 = vpop.eup %4865  ;;  %v3255_v7 = vadd.f32 1.0, %v4864_v43  ;;  %v7390_v42 = vadd.bf16 %v4300_v34, %v4270_v60  ;;  %v7392_v9 = vadd.bf16 %v4301_v40, %v4271_v45  ;;  %v7395_v51 = vadd.f32 %v4379_v23, %v7366_v5  ;;  %v4384_v60 = vpop.f32.mrf.mxu1 }
 0x31f   : > { %v4868_v30 = vpop.eup %4867  ;;  %3621 = vmatmul.mubr.bf16.gmra.mxu1 %v3354_v6  ;;  %v3257_v24 = vadd.f32 1.0, %v4866_v31  ;;  %4879 = verf.f32 %v3895_v63  ;;  %v4382_v36 = vadd.f32 %v4381_v11, %v4380_v28  ;;  %v4385_v8 = vadd.f32 %v4384_v60, %v4383_v21 }
 0x320   : > { %v4870_v39 = vpop.eup %4869  ;;  %v3319_v4 = vmul.f32 %v3255_v7, %v3063_v22  ;;  %v3254_v2 = vadd.f32 1.0, %v4868_v30  ;;  %v3007_v15 = vunpack.c.h.bf16 %v7390_v42  ;;  %v3009_v26 = vunpack.c.h.bf16 %v7392_v9 }
 0x321   : > { %v3321_v50 = vmul.f32 %v3257_v24, %v3065_v41  ;;  %v3256_v58 = vadd.f32 1.0, %v4870_v39  ;;  %v3006_v53 = vunpack.c.l.bf16 %v7390_v42  ;;  %v3008_v12 = vunpack.c.l.bf16 %v7392_v9 }
 0x322   : > { %v3318_v19 = vmul.f32 %v3254_v2, %v3062_v52  ;;  %v3135_v54 = vmul.f32 0.70710677, %v3007_v15  ;;  %v3137_v22 = vmul.f32 0.70710677, %v3009_v26  ;;  %v3896_v57 = vmul.f32 0.70710677, %v7395_v51 }
 0x323   : > { %v3357_v48 = vpack.c.bf16 %v3321_v50, %v3319_v4  ;;  %v3320_v27 = vmul.f32 %v3256_v58, %v3064_v61  ;;  %v3134_v20 = vmul.f32 0.70710677, %v3006_v53  ;;  %v3136_v45 = vmul.f32 0.70710677, %v3008_v12 }
 0x324   : > { %4881 = verf.f32 %v3135_v54  ;;  %v7411_v28 = vadd.f32 %v4382_v36, %v7366_v5  ;;  %v7415_v14 = vadd.f32 %v4385_v8, %v7366_v5  ;;  %v3067_v38 = vmul.f32 0.5, %v3003_v25 }
 0x325   : > { %3628 = vmatprep.mubr.bf16.mxu1 %v3357_v48  ;;  %v3356_v47 = vpack.c.bf16 %v3320_v27, %v3318_v19  ;;  %4883 = verf.f32 %v3137_v22  ;;  %v4386_v37 = vpop.f32.mrf.mxu1  ;;  %v3069_v18 = vmul.f32 0.5, %v3005_v16  ;;  %v3066_v11 = vmul.f32 0.5, %v3002_v62 }
 0x326   : > { %4885 = verf.f32 %v3134_v20  ;;  %v4872_v29 = vpop.eup %4871  ;;  %v3897_v49 = vmul.f32 0.70710677, %v7411_v28  ;;  %v3898_v1 = vmul.f32 0.70710677, %v7415_v14  ;;  %v3068_v10 = vmul.f32 0.5, %v3004_v59 }
 0x327   : > { %3629 = vmatmul.mubr.bf16.gmra.mxu1 %v3356_v47  ;;  %4887 = verf.f32 %v3136_v45  ;;  %v4874_v33 = vpop.eup %4873  ;;  %v3259_v17 = vadd.f32 1.0, %v4872_v29  ;;  %v4387_v46 = vpop.f32.mrf.mxu1  ;;  %v3863_v63 = vmul.f32 0.5, %v7377_v55  ;;  %v3071_v55 = vmul.f32 0.5, %v3007_v15 }
 0x328   : > { %4889 = verf.f32 %v3896_v57  ;;  %v3261_v44 = vadd.f32 1.0, %v4874_v33  ;;  %v4388_v3 = vadd.f32 %v4387_v46, %v4386_v37  ;;  %v3073_v4 = vmul.f32 0.5, %v3009_v26 }
 0x329   : > { %v4876_v35 = vpop.eup %4875  ;;  %4891 = verf.f32 %v3897_v49  ;;  %v3323_v23 = vmul.f32 %v3259_v17, %v3067_v38  ;;  %v4389_v16 = vpop.f32.mrf.mxu1  ;;  %v3070_v19 = vmul.f32 0.5, %v3006_v53  ;;  %v3072_v27 = vmul.f32 0.5, %v3008_v12 }
 0x32a   : > { %v4878_v32 = vpop.eup %4877  ;;  %v3258_v13 = vadd.f32 1.0, %v4876_v35  ;;  %v3325_v25 = vmul.f32 %v3261_v44, %v3069_v18  ;;  %4893 = verf.f32 %v3898_v1  ;;  %v3835_v43 = vadd.f32 %v4388_v3, %v7366_v5 }
 0x32b   : > { %v3260_v52 = vadd.f32 1.0, %v4878_v32  ;;  %v4390_v62 = vpop.f32.mrf.mxu1  ;;  %v3864_v26 = vmul.f32 0.5, %v7395_v51  ;;  %v3865_v42 = vmul.f32 0.5, %v7411_v28  ;;  %v3866_v49 = vmul.f32 0.5, %v7415_v14 }
 0x32c   : > { %v4880_v34 = vpop.eup %4879  ;;  %v3322_v40 = vmul.f32 %v3258_v13, %v3066_v11  ;;  %v3359_v6 = vpack.c.bf16 %v3325_v25, %v3323_v23  ;;  %v3899_v31 = vmul.f32 0.70710677, %v3835_v43  ;;  %v4391_v7 = vadd.f32 %v4390_v62, %v4389_v16 }
 0x32d   : > { %v3324_v41 = vmul.f32 %v3260_v52, %v3068_v10  ;;  %v3959_v0 = vadd.f32 1.0, %v4880_v34  ;;  %v3867_v38 = vmul.f32 0.5, %v3835_v43 }
 0x32e   : > { %3636 = vmatprep.mubr.bf16.mxu1 %v3359_v6  ;;  %4895 = verf.f32 %v3899_v31  ;;  %v3836_v59 = vadd.f32 %v4391_v7, %v7366_v5 }
 0x32f   : > { %v3358_v61 = vpack.c.bf16 %v3324_v41, %v3322_v40  ;;  %v3991_v56 = vmul.f32 %v3959_v0, %v3863_v63 }
 0x330   : > { %v3900_v36 = vmul.f32 0.70710677, %v3836_v59  ;;  %v3868_v18 = vmul.f32 0.5, %v3836_v59 }
 0x331   : > { %v4882_v21 = vpop.eup %4881  ;;  %3637 = vmatmul.mubr.bf16.gmra.mxu1 %v3358_v61  ;;  %4023 = vst [vmem:[%s7430_s17] sm:$0xff] %v3991_v56 }
 0x332   : > { %v4884_v30 = vpop.eup %4883  ;;  %v3263_v24 = vadd.f32 1.0, %v4882_v21  ;;  %4897 = verf.f32 %v3900_v36 }
 0x333   : > { %v4886_v39 = vpop.eup %4885  ;;  %v3265_v2 = vadd.f32 1.0, %v4884_v30 }
 0x334   : > { %v4888_v50 = vpop.eup %4887  ;;  %v3327_v58 = vmul.f32 %v3263_v24, %v3071_v55  ;;  %v3262_v54 = vadd.f32 1.0, %v4886_v39 }
 0x335   : > { %v4890_v60 = vpop.eup %4889  ;;  %v3329_v48 = vmul.f32 %v3265_v2, %v3073_v4  ;;  %v3264_v15 = vadd.f32 1.0, %v4888_v50 }
 0x336   : > { %v4892_v22 = vpop.eup %4891  ;;  %v3326_v20 = vmul.f32 %v3262_v54, %v3070_v19  ;;  %v3960_v45 = vadd.f32 1.0, %v4890_v60 }
 0x337   : > { %v3361_v57 = vpack.c.bf16 %v3329_v48, %v3327_v58  ;;  %v3328_v47 = vmul.f32 %v3264_v15, %v3072_v27  ;;  %v3961_v53 = vadd.f32 1.0, %v4892_v22  ;;  %v4894_v8 = vpop.eup %4893 }
 0x338   : > { %v3992_v29 = vmul.f32 %v3960_v45, %v3864_v26  ;;  %v3962_v37 = vadd.f32 1.0, %v4894_v8 }
 0x339   : > { %3644 = vmatprep.mubr.bf16.mxu1 %v3361_v57  ;;  %v3360_v9 = vpack.c.bf16 %v3328_v47, %v3326_v20  ;;  %v3993_v12 = vmul.f32 %v3961_v53, %v3865_v42 }
 0x33a   : > { %4024 = vst [vmem:[%s7430_s17 + $0x8] sm:$0xff] %v3992_v29  ;;  %v3994_v51 = vmul.f32 %v3962_v37, %v3866_v49 }
 0x33b   : > { %3645 = vmatmul.mubr.bf16.gmra.mxu1 %v3360_v9  ;;  %4025 = vst [vmem:[%s7430_s17 + $0x10] sm:$0xff] %v3993_v12  ;;  %v4896_v33 = vpop.eup %4895 }
 0x33c   : > { %4026 = vst [vmem:[%s7430_s17 + $0x18] sm:$0xff] %v3994_v51  ;;  %v3963_v17 = vadd.f32 1.0, %v4896_v33 }
 0x33e   : > { %v3995_v28 = vmul.f32 %v3963_v17, %v3867_v38 }
 0x33f   : > { %v4898_v35 = vpop.eup %4897 }
 0x340   : > { %4027 = vst [vmem:[%s7430_s17 + $0x20] sm:$0xff] %v3995_v28  ;;  %v3964_v44 = vadd.f32 1.0, %v4898_v35 }
 0x341   : > { %v4392_v46 = vpop.f32.mrf.mxu1 }
 0x342   : > { %v3996_v1 = vmul.f32 %v3964_v44, %v3868_v18 }
 0x343   : > { %v4393_v32 = vpop.f32.mrf.mxu1 }
 0x344   : > { %4028 = vst [vmem:[%s7430_s17 + $0x28] sm:$0xff] %v3996_v1  ;;  %v4394_v14 = vadd.f32 %v4393_v32, %v4392_v46 }
 0x345   : > { %v4395_v23 = vpop.f32.mrf.mxu1 }
 0x346   : > { %v3837_v11 = vadd.f32 %v4394_v14, %v7366_v5 }
 0x347   : > { %v4396_v13 = vpop.f32.mrf.mxu1 }
 0x348   : > { %v3901_v3 = vmul.f32 0.70710677, %v3837_v11  ;;  %v4397_v25 = vadd.f32 %v4396_v13, %v4395_v23  ;;  %v3869_v34 = vmul.f32 0.5, %v3837_v11 }
 0x34a   : > { %4899 = verf.f32 %v3901_v3  ;;  %v3838_v10 = vadd.f32 %v4397_v25, %v7366_v5 }
 0x34c   : > { %v3902_v52 = vmul.f32 0.70710677, %v3838_v10  ;;  %v3870_v41 = vmul.f32 0.5, %v3838_v10 }
 0x34e   : > { %4901 = verf.f32 %v3902_v52 }
 0x357   : > { %v4900_v16 = vpop.eup %4899 }
 0x358   : > { %v3965_v40 = vadd.f32 1.0, %v4900_v16 }
 0x35a   : > { %v3997_v43 = vmul.f32 %v3965_v40, %v3869_v34 }
 0x35b   : > { %v4902_v6 = vpop.eup %4901 }
 0x35c   : > { %4029 = vst [vmem:[%s7430_s17 + $0x30] sm:$0xff] %v3997_v43  ;;  %v3966_v63 = vadd.f32 1.0, %v4902_v6 }
 0x35e   : > { %v3998_v0 = vmul.f32 %v3966_v63, %v3870_v41 }
 0x360   : > { %4030 = vst [vmem:[%s7430_s17 + $0x38] sm:$0xff] %v3998_v0 }
 0x369   : > { %v4398_v62 = vpop.f32.mrf.mxu1 }
 0x36b   : > { %v4399_v31 = vpop.f32.mrf.mxu1 }
 0x36c   : > { %v4400_v7 = vadd.f32 %v4399_v31, %v4398_v62 }
 0x36d   : > { %v4401_v61 = vpop.f32.mrf.mxu1 }
 0x36e   : > { %v3839_v56 = vadd.f32 %v4400_v7, %v7366_v5 }
 0x36f   : > { %v4402_v59 = vpop.f32.mrf.mxu1 }
 0x370   : > { %v3903_v21 = vmul.f32 0.70710677, %v3839_v56  ;;  %v4403_v30 = vadd.f32 %v4402_v59, %v4401_v61  ;;  %v3871_v4 = vmul.f32 0.5, %v3839_v56 }
 0x372   : > { %4903 = verf.f32 %v3903_v21  ;;  %v3840_v55 = vadd.f32 %v4403_v30, %v7366_v5 }
 0x374   : > { %v3904_v24 = vmul.f32 0.70710677, %v3840_v55  ;;  %v3872_v48 = vmul.f32 0.5, %v3840_v55 }
 0x376   : > { %4905 = verf.f32 %v3904_v24 }
 0x37e   : > { %v4404_v39 = vpop.f32.mrf.mxu1 }
 0x37f   : > { %v4904_v36 = vpop.eup %4903 }
 0x380   : > { %v3967_v2 = vadd.f32 1.0, %v4904_v36  ;;  %v4405_v50 = vpop.f32.mrf.mxu1 }
 0x381   : > { %v4406_v19 = vadd.f32 %v4405_v50, %v4404_v39 }
 0x382   : > { %v3999_v58 = vmul.f32 %v3967_v2, %v3871_v4  ;;  %v4407_v60 = vpop.f32.mrf.mxu1 }
 0x383   : > { %v4906_v54 = vpop.eup %4905  ;;  %v3841_v15 = vadd.f32 %v4406_v19, %v7366_v5 }
 0x384   : > { %4031 = vst [vmem:[%s7430_s17 + $0x40] sm:$0xff] %v3999_v58  ;;  %v3968_v27 = vadd.f32 1.0, %v4906_v54  ;;  %v4408_v22 = vpop.f32.mrf.mxu1 }
 0x385   : > { %v3905_v26 = vmul.f32 0.70710677, %v3841_v15  ;;  %v4409_v45 = vadd.f32 %v4408_v22, %v4407_v60  ;;  %v3873_v53 = vmul.f32 0.5, %v3841_v15 }
 0x386   : > { %v4000_v20 = vmul.f32 %v3968_v27, %v3872_v48 }
 0x387   : > { %4907 = verf.f32 %v3905_v26  ;;  %v3842_v57 = vadd.f32 %v4409_v45, %v7366_v5 }
 0x388   : > { %4032 = vst [vmem:[%s7430_s17 + $0x48] sm:$0xff] %v4000_v20 }
 0x389   : > { %v3906_v47 = vmul.f32 0.70710677, %v3842_v57  ;;  %v3874_v49 = vmul.f32 0.5, %v3842_v57 }
 0x38b   : > { %4909 = verf.f32 %v3906_v47 }
 0x394   : > { %v4908_v42 = vpop.eup %4907 }
 0x395   : > { %v3969_v8 = vadd.f32 1.0, %v4908_v42 }
 0x397   : > { %v4001_v29 = vmul.f32 %v3969_v8, %v3873_v53 }
 0x398   : > { %v4910_v9 = vpop.eup %4909  ;;  %v4410_v12 = vpop.f32.mrf.mxu1 }
 0x399   : > { %4033 = vst [vmem:[%s7430_s17 + $0x50] sm:$0xff] %v4001_v29  ;;  %v3970_v37 = vadd.f32 1.0, %v4910_v9 }
 0x39a   : > { %v4411_v51 = vpop.f32.mrf.mxu1 }
 0x39b   : > { %v4002_v33 = vmul.f32 %v3970_v37, %v3874_v49  ;;  %v4412_v38 = vadd.f32 %v4411_v51, %v4410_v12 }
 0x39c   : > { %v4413_v17 = vpop.f32.mrf.mxu1 }
 0x39d   : > { %4034 = vst [vmem:[%s7430_s17 + $0x58] sm:$0xff] %v4002_v33  ;;  %v3843_v28 = vadd.f32 %v4412_v38, %v7366_v5 }
 0x39e   : > { %v4414_v35 = vpop.f32.mrf.mxu1 }
 0x39f   : > { %v3907_v18 = vmul.f32 0.70710677, %v3843_v28  ;;  %v4415_v44 = vadd.f32 %v4414_v35, %v4413_v17  ;;  %v3875_v10 = vmul.f32 0.5, %v3843_v28 }
 0x3a1   : > { %4911 = verf.f32 %v3907_v18  ;;  %v3844_v1 = vadd.f32 %v4415_v44, %v7366_v5 }
 0x3a3   : > { %v3908_v46 = vmul.f32 0.70710677, %v3844_v1  ;;  %v3876_v41 = vmul.f32 0.5, %v3844_v1 }
 0x3a5   : > { %4913 = verf.f32 %v3908_v46 }
 0x3aa   : > { %v4416_v32 = vpop.f32.mrf.mxu1 }
 0x3ac   : > { %v4417_v14 = vpop.f32.mrf.mxu1 }
 0x3ad   : > { %v4418_v23 = vadd.f32 %v4417_v14, %v4416_v32 }
 0x3ae   : > { %v4419_v11 = vpop.f32.mrf.mxu1  ;;  %v4912_v3 = vpop.eup %4911 }
 0x3af   : > { %v3845_v13 = vadd.f32 %v4418_v23, %v7366_v5  ;;  %v3971_v52 = vadd.f32 1.0, %v4912_v3 }
 0x3b0   : > { %v4420_v25 = vpop.f32.mrf.mxu1 }
 0x3b1   : > { %v3909_v16 = vmul.f32 0.70710677, %v3845_v13  ;;  %v4421_v34 = vadd.f32 %v4420_v25, %v4419_v11  ;;  %v4003_v40 = vmul.f32 %v3971_v52, %v3875_v10  ;;  %v3877_v36 = vmul.f32 0.5, %v3845_v13 }
 0x3b2   : > { %v4914_v6 = vpop.eup %4913 }
 0x3b3   : > { %4915 = verf.f32 %v3909_v16  ;;  %v3846_v43 = vadd.f32 %v4421_v34, %v7366_v5  ;;  %4035 = vst [vmem:[%s7430_s17 + $0x60] sm:$0xff] %v4003_v40  ;;  %v3972_v63 = vadd.f32 1.0, %v4914_v6 }
 0x3b5   : > { %v3910_v0 = vmul.f32 0.70710677, %v3846_v43  ;;  %v4004_v62 = vmul.f32 %v3972_v63, %v3876_v41  ;;  %v3878_v48 = vmul.f32 0.5, %v3846_v43 }
 0x3b7   : > { %4917 = verf.f32 %v3910_v0  ;;  %4036 = vst [vmem:[%s7430_s17 + $0x68] sm:$0xff] %v4004_v62 }
 0x3b8   : > { %v4422_v31 = vpop.f32.mrf.mxu1 }
 0x3ba   : > { %v4423_v7 = vpop.f32.mrf.mxu1 }
 0x3bb   : > { %v4424_v61 = vadd.f32 %v4423_v7, %v4422_v31 }
 0x3bc   : > { %v4425_v56 = vpop.f32.mrf.mxu1 }
 0x3bd   : > { %v3847_v59 = vadd.f32 %v4424_v61, %v7366_v5 }
 0x3be   : > { %v4426_v21 = vpop.f32.mrf.mxu1 }
 0x3bf   : > { %v3911_v55 = vmul.f32 0.70710677, %v3847_v59  ;;  %v4427_v24 = vadd.f32 %v4426_v21, %v4425_v56  ;;  %v3879_v49 = vmul.f32 0.5, %v3847_v59 }
 0x3c0   : > { %v4916_v30 = vpop.eup %4915  ;;  %v4428_v4 = vpop.f32.mrf.mxu1 }
 0x3c1   : > { %v3973_v39 = vadd.f32 1.0, %v4916_v30  ;;  %4919 = verf.f32 %v3911_v55  ;;  %v3848_v2 = vadd.f32 %v4427_v24, %v7366_v5 }
 0x3c2   : > { %v4429_v58 = vpop.f32.mrf.mxu1 }
 0x3c3   : > { %v4005_v50 = vmul.f32 %v3973_v39, %v3877_v36  ;;  %v3912_v54 = vmul.f32 0.70710677, %v3848_v2  ;;  %v4430_v60 = vadd.f32 %v4429_v58, %v4428_v4  ;;  %v3880_v44 = vmul.f32 0.5, %v3848_v2 }
 0x3c4   : > { %v4918_v19 = vpop.eup %4917  ;;  %v4431_v15 = vpop.f32.mrf.mxu1 }
 0x3c5   : > { %4037 = vst [vmem:[%s7430_s17 + $0x70] sm:$0xff] %v4005_v50  ;;  %v3974_v27 = vadd.f32 1.0, %v4918_v19  ;;  %4921 = verf.f32 %v3912_v54  ;;  %v3849_v22 = vadd.f32 %v4430_v60, %v7366_v5 }
 0x3c6   : > { %v4432_v26 = vpop.f32.mrf.mxu1 }
 0x3c7   : > { %v4006_v20 = vmul.f32 %v3974_v27, %v3878_v48  ;;  %v3913_v45 = vmul.f32 0.70710677, %v3849_v22  ;;  %v4433_v57 = vadd.f32 %v4432_v26, %v4431_v15  ;;  %v3881_v25 = vmul.f32 0.5, %v3849_v22 }
 0x3c9   : > { %4038 = vst [vmem:[%s7430_s17 + $0x78] sm:$0xff] %v4006_v20  ;;  %4923 = verf.f32 %v3913_v45  ;;  %v3850_v47 = vadd.f32 %v4433_v57, %v7366_v5 }
 0x3ca   : > { %v4434_v42 = vpop.f32.mrf.mxu1 }
 0x3cb   : > { %v3914_v53 = vmul.f32 0.70710677, %v3850_v47  ;;  %v3882_v41 = vmul.f32 0.5, %v3850_v47 }
 0x3cc   : > { %v4435_v8 = vpop.f32.mrf.mxu1 }
 0x3cd   : > { %4925 = verf.f32 %v3914_v53  ;;  %v4436_v29 = vadd.f32 %v4435_v8, %v4434_v42 }
 0x3ce   : > { %v4920_v9 = vpop.eup %4919  ;;  %v4437_v12 = vpop.f32.mrf.mxu1 }
 0x3cf   : > { %v3975_v37 = vadd.f32 1.0, %v4920_v9  ;;  %v3851_v51 = vadd.f32 %v4436_v29, %v7366_v5 }
 0x3d0   : > { %v4438_v33 = vpop.f32.mrf.mxu1 }
 0x3d1   : > { %v4007_v38 = vmul.f32 %v3975_v37, %v3879_v49  ;;  %v3915_v17 = vmul.f32 0.70710677, %v3851_v51  ;;  %v4439_v28 = vadd.f32 %v4438_v33, %v4437_v12  ;;  %v3883_v56 = vmul.f32 0.5, %v3851_v51 }
 0x3d2   : > { %v4922_v35 = vpop.eup %4921  ;;  %v4440_v18 = vpop.f32.mrf.mxu1 }
 0x3d3   : > { %4039 = vst [vmem:[%s7430_s17 + $0x80] sm:$0xff] %v4007_v38  ;;  %v3976_v1 = vadd.f32 1.0, %v4922_v35  ;;  %4927 = verf.f32 %v3915_v17  ;;  %v3852_v46 = vadd.f32 %v4439_v28, %v7366_v5 }
 0x3d4   : > { %v4441_v32 = vpop.f32.mrf.mxu1 }
 0x3d5   : > { %v4008_v14 = vmul.f32 %v3976_v1, %v3880_v44  ;;  %v3916_v23 = vmul.f32 0.70710677, %v3852_v46  ;;  %v4442_v11 = vadd.f32 %v4441_v32, %v4440_v18  ;;  %v3884_v4 = vmul.f32 0.5, %v3852_v46 }
 0x3d6   : > { %v4924_v13 = vpop.eup %4923  ;;  %v4443_v3 = vpop.f32.mrf.mxu1 }
 0x3d7   : > { %4040 = vst [vmem:[%s7430_s17 + $0x88] sm:$0xff] %v4008_v14  ;;  %v3977_v10 = vadd.f32 1.0, %v4924_v13  ;;  %4929 = verf.f32 %v3916_v23  ;;  %v3853_v52 = vadd.f32 %v4442_v11, %v7366_v5 }
 0x3d8   : > { %v4444_v16 = vpop.f32.mrf.mxu1 }
 0x3d9   : > { %v4009_v34 = vmul.f32 %v3977_v10, %v3881_v25  ;;  %v3917_v40 = vmul.f32 0.70710677, %v3853_v52  ;;  %v4445_v43 = vadd.f32 %v4444_v16, %v4443_v3  ;;  %v3885_v15 = vmul.f32 0.5, %v3853_v52 }
 0x3da   : > { %v4926_v6 = vpop.eup %4925 }
 0x3db   : > { %4041 = vst [vmem:[%s7430_s17 + $0x90] sm:$0xff] %v4009_v34  ;;  %v3978_v63 = vadd.f32 1.0, %v4926_v6  ;;  %4931 = verf.f32 %v3917_v40  ;;  %v3854_v0 = vadd.f32 %v4445_v43, %v7366_v5 }
 0x3dd   : > { %v4010_v62 = vmul.f32 %v3978_v63, %v3882_v41  ;;  %v3918_v31 = vmul.f32 0.70710677, %v3854_v0  ;;  %v3886_v8 = vmul.f32 0.5, %v3854_v0 }
 0x3df   : > { %4042 = vst [vmem:[%s7430_s17 + $0x98] sm:$0xff] %v4010_v62  ;;  %4933 = verf.f32 %v3918_v31  ;;  %v4446_v7 = vpop.f32.mrf.mxu1 }
 0x3e0   : > { %v4928_v61 = vpop.eup %4927 }
 0x3e1   : > { %v3979_v59 = vadd.f32 1.0, %v4928_v61  ;;  %v4447_v21 = vpop.f32.mrf.mxu1 }
 0x3e2   : > { %v4448_v30 = vadd.f32 %v4447_v21, %v4446_v7 }
 0x3e3   : > { %v4011_v55 = vmul.f32 %v3979_v59, %v3883_v56  ;;  %v4449_v24 = vpop.f32.mrf.mxu1 }
 0x3e4   : > { %v4930_v36 = vpop.eup %4929  ;;  %v3855_v39 = vadd.f32 %v4448_v30, %v7366_v5 }
 0x3e5   : > { %4043 = vst [vmem:[%s7430_s17 + $0xa0] sm:$0xff] %v4011_v55  ;;  %v3980_v2 = vadd.f32 1.0, %v4930_v36  ;;  %v4450_v50 = vpop.f32.mrf.mxu1 }
 0x3e6   : > { %v3919_v58 = vmul.f32 0.70710677, %v3855_v39  ;;  %v4451_v19 = vadd.f32 %v4450_v50, %v4449_v24  ;;  %v3887_v44 = vmul.f32 0.5, %v3855_v39 }
 0x3e7   : > { %v4012_v54 = vmul.f32 %v3980_v2, %v3884_v4  ;;  %v4452_v60 = vpop.f32.mrf.mxu1 }
 0x3e8   : > { %v4932_v48 = vpop.eup %4931  ;;  %4935 = verf.f32 %v3919_v58  ;;  %v3856_v27 = vadd.f32 %v4451_v19, %v7366_v5 }
 0x3e9   : > { %4044 = vst [vmem:[%s7430_s17 + $0xa8] sm:$0xff] %v4012_v54  ;;  %v3981_v22 = vadd.f32 1.0, %v4932_v48  ;;  %v4453_v20 = vpop.f32.mrf.mxu1 }
 0x3ea   : > { %v3920_v26 = vmul.f32 0.70710677, %v3856_v27  ;;  %v4454_v45 = vadd.f32 %v4453_v20, %v4452_v60  ;;  %v3888_v3 = vmul.f32 0.5, %v3856_v27 }
 0x3eb   : > { %v4013_v57 = vmul.f32 %v3981_v22, %v3885_v15  ;;  %v4455_v47 = vpop.f32.mrf.mxu1 }
 0x3ec   : > { %v4934_v42 = vpop.eup %4933  ;;  %4937 = verf.f32 %v3920_v26  ;;  %v3857_v53 = vadd.f32 %v4454_v45, %v7366_v5 }
 0x3ed   : > { %4045 = vst [vmem:[%s7430_s17 + $0xb0] sm:$0xff] %v4013_v57  ;;  %v3982_v29 = vadd.f32 1.0, %v4934_v42  ;;  %v4456_v9 = vpop.f32.mrf.mxu1 }
 0x3ee   : > { %v3921_v12 = vmul.f32 0.70710677, %v3857_v53  ;;  %v4457_v49 = vadd.f32 %v4456_v9, %v4455_v47  ;;  %v3889_v6 = vmul.f32 0.5, %v3857_v53 }
 0x3ef   : > { %v4014_v37 = vmul.f32 %v3982_v29, %v3886_v8 }
 0x3f0   : > { %4939 = verf.f32 %v3921_v12  ;;  %v3858_v51 = vadd.f32 %v4457_v49, %v7366_v5 }
 0x3f1   : > { %4046 = vst [vmem:[%s7430_s17 + $0xb8] sm:$0xff] %v4014_v37  ;;  %v4458_v33 = vpop.f32.mrf.mxu1 }
 0x3f2   : > { %v3922_v38 = vmul.f32 0.70710677, %v3858_v51  ;;  %v3890_v56 = vmul.f32 0.5, %v3858_v51 }
 0x3f3   : > { %v4459_v17 = vpop.f32.mrf.mxu1 }
 0x3f4   : > { %4941 = verf.f32 %v3922_v38  ;;  %v4460_v28 = vadd.f32 %v4459_v17, %v4458_v33 }
 0x3f5   : > { %v4936_v35 = vpop.eup %4935  ;;  %v4461_v18 = vpop.f32.mrf.mxu1 }
 0x3f6   : > { %v3983_v1 = vadd.f32 1.0, %v4936_v35  ;;  %v3859_v46 = vadd.f32 %v4460_v28, %v7366_v5 }
 0x3f7   : > { %v4462_v32 = vpop.f32.mrf.mxu1 }
 0x3f8   : > { %v4015_v14 = vmul.f32 %v3983_v1, %v3887_v44  ;;  %v3923_v23 = vmul.f32 0.70710677, %v3859_v46  ;;  %v4463_v11 = vadd.f32 %v4462_v32, %v4461_v18  ;;  %v3891_v4 = vmul.f32 0.5, %v3859_v46 }
 0x3f9   : > { %v4938_v13 = vpop.eup %4937 }
 0x3fa   : > { %4047 = vst [vmem:[%s7430_s17 + $0xc0] sm:$0xff] %v4015_v14  ;;  %v3984_v25 = vadd.f32 1.0, %v4938_v13  ;;  %4943 = verf.f32 %v3923_v23  ;;  %v3860_v10 = vadd.f32 %v4463_v11, %v7366_v5 }
 0x3fb   : > { %v4464_v52 = vpop.f32.mrf.mxu1 }
 0x3fc   : > { %v4016_v16 = vmul.f32 %v3984_v25, %v3888_v3  ;;  %v3924_v34 = vmul.f32 0.70710677, %v3860_v10  ;;  %v3892_v19 = vmul.f32 0.5, %v3860_v10 }
 0x3fd   : > { %v4940_v40 = vpop.eup %4939  ;;  %v4465_v43 = vpop.f32.mrf.mxu1 }
 0x3fe   : > { %4048 = vst [vmem:[%s7430_s17 + $0xc8] sm:$0xff] %v4016_v16  ;;  %v3985_v41 = vadd.f32 1.0, %v4940_v40  ;;  %4945 = verf.f32 %v3924_v34  ;;  %v4466_v63 = vadd.f32 %v4465_v43, %v4464_v52 }
 0x3ff   : > { %v4467_v0 = vpop.f32.mrf.mxu1 }
 0x400   : > { %v4017_v62 = vmul.f32 %v3985_v41, %v3889_v6  ;;  %v3861_v31 = vadd.f32 %v4466_v63, %v7366_v5 }
 0x401   : > { %v4942_v7 = vpop.eup %4941  ;;  %v4468_v61 = vpop.f32.mrf.mxu1 }
 0x402   : > { %4049 = vst [vmem:[%s7430_s17 + $0xd0] sm:$0xff] %v4017_v62  ;;  %v3986_v59 = vadd.f32 1.0, %v4942_v7  ;;  %v3925_v21 = vmul.f32 0.70710677, %v3861_v31  ;;  %v4469_v30 = vadd.f32 %v4468_v61, %v4467_v0 }
 0x404   : > { %v4018_v55 = vmul.f32 %v3986_v59, %v3890_v56  ;;  %4947 = verf.f32 %v3925_v21  ;;  %v3862_v24 = vadd.f32 %v4469_v30, %v7366_v5  ;;  %v3893_v5 = vmul.f32 0.5, %v3861_v31 }
 0x406   : > { %4050 = vst [vmem:[%s7430_s17 + $0xd8] sm:$0xff] %v4018_v55  ;;  %v3926_v36 = vmul.f32 0.70710677, %v3862_v24  ;;  %v3894_v20 = vmul.f32 0.5, %v3862_v24 }
 0x407   : > { %v4944_v39 = vpop.eup %4943 }
 0x408   : > { %v3987_v2 = vadd.f32 1.0, %v4944_v39  ;;  %4949 = verf.f32 %v3926_v36 }
 0x40a   : > { %v4019_v50 = vmul.f32 %v3987_v2, %v3891_v4 }
 0x40b   : > { %v4946_v58 = vpop.eup %4945 }
 0x40c   : > { %4051 = vst [vmem:[%s7430_s17 + $0xe0] sm:$0xff] %v4019_v50  ;;  %v3988_v54 = vadd.f32 1.0, %v4946_v58 }
 0x40e   : > { %v4020_v60 = vmul.f32 %v3988_v54, %v3892_v19 }
 0x410   : > { %4052 = vst [vmem:[%s7430_s17 + $0xe8] sm:$0xff] %v4020_v60 }
 0x411   : > { %v4948_v48 = vpop.eup %4947 }
 0x412   : > { %v3989_v27 = vadd.f32 1.0, %v4948_v48 }
 0x414   : > { %v4021_v15 = vmul.f32 %v3989_v27, %v3893_v5 }
 0x415   : > { %v4950_v22 = vpop.eup %4949 }
 0x416   : > { %4053 = vst [vmem:[%s7430_s17 + $0xf0] sm:$0xff] %v4021_v15  ;;  %v3990_v26 = vadd.f32 1.0, %v4950_v22 }
 0x418   : > { %v4022_v45 = vmul.f32 %v3990_v26, %v3894_v20 }
 0x41a   : > { %4054 = vst [vmem:[%s7430_s17 + $0xf8] sm:$0xff] %v4022_v45 }
 0x41b   : > { %5070 = shalt.err (!%p5067_p13)
}
 0x41c   : > { %s5071_s9 = scalar_lea.hbm %s7505_s5, 4096  ;;  %s5075_s18 = scalar_lea.hbm %s7563_s7, 8192 }
 0x41d   : > { %p5072_p1 = scmp.ne.s32.totalorder %s7505_s5, %s5071_s9  ;;  %p5076_p12 = scmp.lt.s32.totalorder %s7505_s5, %s7563_s7 }
 0x41e   : > { %p5077_p5 = scmp.lt.s32.totalorder %s5075_s18, %s5071_s9 }
 0x41f   : > { %p5073_p4 = pnand %p5072_p1, %p5303_p0 }
 0x420   : > { %p5078_p3 = por %p5077_p5, %p5076_p12 }
 0x421   : > { %p5074_p8 = pneg %p5073_p4 }
 0x423   : > { %p5079_p10 = pnand %p5078_p3, %p5074_p8 }
 0x425   : > { %5082 = shalt.err (!%p5079_p10)
}
 0x426   : > { %s5158_s30 = smov 128   ;;  %s5159_s21 = smov 8  }
 0x427   : > { %4484 = dma.vmem_to_hbm [thread:$0]  (%p5303_p0), %s7507_s19, 4096, %s7505_s5, %s4056_s22, %s5158_s30, %s5158_s30, %s5159_s21  }
 0x428 PF: > { %s4084_s20 = sand.u32 1, %s5125_s24   ;;  %p7984_p2 = scmp.ne.s32.totalorder %s7660_s12, 0 }
 0x429   : > { %p7985_p11 = scmp.ge.s32.totalorder %s5145_s29, 2  ;;  %s4085_s23 = scalar_lea.sflag [#allocation5], %s4084_s20 }
 0x42b   : > { %p4501_p7 = pnand %p7985_p11, %p7984_p2 }
 0x42d   : > { %p4502_p6 = pneg %p4501_p7 }
 0x42f   : > { %5120 = dma.done.wait (%p4502_p6), %s4085_s23, 4096  }
 0x430   : > { %5122 = vsyncadd (%p4502_p6), %s4085_s23, 4294963200  ;;  %s25_s29 = sadd.s32 1, %s5145_s29   ;;  %s7986_s24 = smov %s5129_s25 }
 0x431   : > { %p22_p9 = scmp.ge.s32.totalorder %s25_s29, 4   ;;  %s7987_s25 = smov %s5133_s26 }
 0x432   : > { %s7988_s26 = smov %s5315_s15  ;;  %s7989_s27 = smov %s5141_s28 }
 0x433   : > { %s7990_s28 = smov %s7992_s8  ;;  %24 = sbr.rel (!%p22_p9) target bundleno = 12 (0xc), region = 123 }
 0x438   :  { %4090 = vsyncpa [#allocation4], 1 }
 0x439   :  { %4092 = vsyncpa [#allocation4 + $0x1], 1 }
 0x43a   :  { %4093 = vsyncpa [#allocation7], 1 }
 0x43b   :  { %4094 = vsyncpa [#allocation10], 1 }
 0x43c   :  { %4095 = vsyncpa [#allocation5], 1 }
 0x43d   :  { %4097 = vsyncpa [#allocation5 + $0x1], 1 }

</bundles_post_ra>
